<compile_context>
chip_gen: v7x
topology: tpu7x:2x2x1
jax: 0.10.0
libtpu: 0.0.40
codegen_flags: <defaults>
</compile_context>

<pallas_src>
import jax
import jax.numpy as jnp
import numpy as np
from jax.experimental import pallas as pl
from jax.experimental.pallas import tpu as pltpu

SCALE = 0.05
QMIN, QMAX = -128.0, 127.0

_CompilerParams = getattr(pltpu, "CompilerParams", None) or getattr(
    pltpu, "TPUCompilerParams")


def _quantize(t):
    """quantize_tensor: symmetric int8 fake quantization (float, int-valued)."""
    return jnp.clip(jnp.round(t / SCALE), QMIN, QMAX)


def _round_up(x, m):
    return (x + m - 1) // m * m


def _prefers_int8():
    """v5e/v6e MXUs have a native int8 path; v7x does not (keep bf16 there)."""
    try:
        kind = jax.devices()[0].device_kind.lower()
    except Exception:
        return False
    return ("v5" in kind) or ("v6" in kind)


def _invariant_spec(shape, index_map, allow_buffered):
    """BlockSpec for a (mostly) grid-invariant operand; single-buffer it when
    the running JAX exposes pipeline_mode/Buffered (frees one redundant VMEM
    copy of the resident weights / bias)."""
    if allow_buffered and hasattr(pl, "Buffered"):
        try:
            return pl.BlockSpec(shape, index_map, pipeline_mode=pl.Buffered(1))
        except Exception:  # older BlockSpec signature
            pass
    return pl.BlockSpec(shape, index_map)


def quantized_conv2d(x, weight, bias, stride=1, padding=1,
                     q_dtype=jnp.bfloat16, acc_dtype=jnp.float32,
                     out_dtype=jnp.float32, allow_buffered=True):
    """dequantize(conv2d(quantize(x), quantize(w), quantize(b))).

    x: [N, C, H, W] f32, weight: [OC, C, KH, KW] f32, bias: [OC] f32.
    """
    if stride != 1:
        # TODO(synk): stride > 1 (and dilation/groups kwargs of nn.Conv2d) need
        # strided in-kernel slices; not exercised by the module's example use.
        raise NotImplementedError("fused Pallas path currently assumes stride=1")

    N, C, H, W = x.shape
    OC, _, KH, KW = weight.shape
    Hp, Wp = H + 2 * padding, W + 2 * padding
    OH, OW = Hp - KH + 1, Wp - KW + 1
    n_taps = KH * KW

    # Quantize activation ONCE (quantize(0)==0, so padding after quantizing is
    # exact), go to NHWC (channels on lanes), zero-pad spatially, flatten rows.
    xq = _quantize(x).transpose(0, 2, 3, 1)                       # NHWC
    xq = jnp.pad(xq, ((0, 0), (padding, padding), (padding, padding), (0, 0)))
    xq = xq.reshape(N, Hp * Wp, C)

    # Lane/sublane friendly padding.
    C_p = _round_up(C, 32)                  # int8 sublane packing / dot K dim
    OCp = _round_up(OC, 128)                # lane-dense output columns
    TOC = 256 if (OCp % 256 == 0) else 128  # full MXU width on v6e/v7x
    Mrows = _round_up(OH * Wp, 32)          # output rows on the Wp-wide grid
    max_start = (KH - 1) * Wp + (KW - 1)    # largest shifted-slab offset
    R_pad = _round_up(max(Hp * Wp, max_start + Mrows), 32)

    xq = jnp.pad(xq, ((0, 0), (0, R_pad - Hp * Wp), (0, C_p - C))).astype(q_dtype)

    # Weights stacked per tap in (kh, kw) order -> (KH*KW, C, OC); quantize once.
    wq = _quantize(weight).transpose(2, 3, 1, 0).reshape(n_taps, C, OC)
    wq = jnp.pad(wq, ((0, 0), (0, C_p - C), (0, OCp - OC))).astype(q_dtype)
    bq = jnp.pad(_quantize(bias), (0, OCp - OC)).astype(jnp.float32).reshape(1, OCp)

    # ---- kernel: fused im2col (shifted-slab matmuls) + bias + dequantize ----
    def kernel(x_ref, w_ref, b_ref, o_ref):
        # x_ref: (R_pad, C_p)  one padded, quantized image (int8 / bf16 / f32)
        # w_ref: (KH*KW, C_p, TOC), b_ref: (1, TOC) f32, o_ref: (Mrows, TOC)
        acc = jnp.zeros((Mrows, TOC), acc_dtype)
        for t in range(n_taps):                       # static unroll (<= 9 taps)
            kh, kw = divmod(t, KW)
            xs = x_ref[pl.ds(kh * Wp + kw, Mrows), :]  # shifted slab (static ds)
            acc = acc + jnp.dot(xs, w_ref[t],
                                preferred_element_type=acc_dtype)  # MXU
        o_ref[...] = ((acc.astype(jnp.float32) + b_ref[...]) * SCALE
                      ).astype(o_ref.dtype)

    # ---- VMEM-aware limit -----------------------------------------------------
    q_bytes = jnp.dtype(q_dtype).itemsize
    o_bytes = jnp.dtype(out_dtype).itemsize
    est = (2 * R_pad * C_p * q_bytes             # image block (double-buffered)
           + 2 * n_taps * C_p * TOC * q_bytes    # weight stack
           + 2 * Mrows * TOC * o_bytes           # output block
           + Mrows * TOC * 4                     # accumulator
           + (2 << 20))                          # headroom
    vmem_limit = int(min(48 * 2 ** 20, max(32 * 2 ** 20, est)))
    # TODO(synk): for very large images / channel counts, additionally tile the
    # output rows (halo blocks) and C so the per-step working set stays bounded.

    grid = (N, OCp // TOC)
    out = pl.pallas_call(
        kernel,
        out_shape=jax.ShapeDtypeStruct((N, Mrows, OCp), out_dtype),
        grid=grid,
        in_specs=[
            pl.BlockSpec((None, R_pad, C_p), lambda n, j: (n, 0, 0)),
            _invariant_spec((n_taps, C_p, TOC), lambda n, j: (0, 0, j),
                            allow_buffered),
            _invariant_spec((1, TOC), lambda n, j: (0, j), allow_buffered),
        ],
        out_specs=pl.BlockSpec((None, Mrows, TOC), lambda n, j: (n, 0, j)),
        compiler_params=_CompilerParams(
            dimension_semantics=("parallel", "parallel"),
            vmem_limit_bytes=vmem_limit),
    )(xq, wq, bq)

    # Drop garbage columns (ow >= OW on the Wp-wide row grid) and padding.
    out = out[:, :OH * Wp, :OC].reshape(N, OH, Wp, OC)[:, :, :OW, :]
    return out.transpose(0, 3, 1, 2)                      # back to NCHW


if __name__ == "__main__":
    key = jax.random.PRNGKey(0)
    k1, k2, k3 = jax.random.split(key, 3)

    N, C, H, W = 2, 4, 16, 16
    OC, K = 8, 3

    x = jax.random.normal(k1, (N, C, H, W), dtype=jnp.float32)
    weight = jax.random.normal(k2, (OC, C, K, K), dtype=jnp.float32) * 0.2
    bias = jax.random.normal(k3, (OC,), dtype=jnp.float32) * 0.1

    use_int8 = _prefers_int8()

    def run(conservative):
        if conservative:                       # most robust lowering path
            q_dt, acc_dt = jnp.float32, jnp.float32
        elif use_int8:                         # v5e / v6e: native int8 MXU
            q_dt, acc_dt = jnp.int8, jnp.int32
        else:                                  # v7x etc.: exact bf16 -> f32
            q_dt, acc_dt = jnp.bfloat16, jnp.float32
        fn = jax.jit(lambda a, w, b: quantized_conv2d(
            a, w, b, stride=1, padding=1, q_dtype=q_dt, acc_dtype=acc_dt,
            out_dtype=jnp.float32, allow_buffered=not conservative))
        return jax.block_until_ready(fn(x, weight, bias))

    try:
        out = run(conservative=False)
    except Exception:                          # dtype/feature fallback only;
        out = run(conservative=True)           # correctness asserted below

    # Pure-JAX reference of the exact module semantics.
    xq_ref, wq_ref, bq_ref = _quantize(x), _quantize(weight), _quantize(bias)
    ref_q = jax.lax.conv_general_dilated(
        xq_ref, wq_ref, window_strides=(1, 1), padding=((1, 1), (1, 1)),
        dimension_numbers=("NCHW", "OIHW", "NCHW"),
    ) + bq_ref[None, :, None, None]
    ref = ref_q * SCALE

    assert out.shape == (N, OC, H, W), out.shape
    np.testing.assert_allclose(np.asarray(out), np.asarray(ref),
                               rtol=1e-5, atol=1e-4)
    print("KERNEL_OK")
</pallas_src>

<mosaic_0001>
module attributes {stable_mosaic.version = 11 : i64} {
  func.func @kernel(%arg0: i32, %arg1: i32, %arg2: memref<1x352x32xbf16, #tpu.memory_space<vmem>>, %arg3: memref<9x32x128xbf16, #tpu.memory_space<vmem>>, %arg4: memref<1x128xf32, #tpu.memory_space<vmem>>, %arg5: memref<1x288x128xf32, #tpu.memory_space<vmem>>) attributes {dimension_semantics = [#tpu.dimension_semantics<parallel>, #tpu.dimension_semantics<parallel>], iteration_bounds = array<i64: 2, 1>, scalar_prefetch = 0 : i64, scratch_operands = 0 : i64, tpu.core_type = #tpu.core_type<tc>, window_params = [{transform_indices = @transform_0, window_bounds = array<i64: 1, 352, 32>}, {pipeline_mode = #tpu.pipeline_mode<synchronous>, transform_indices = @transform_1, window_bounds = array<i64: 9, 32, 128>}, {pipeline_mode = #tpu.pipeline_mode<synchronous>, transform_indices = @transform_2, window_bounds = array<i64: 1, 128>}, {transform_indices = @transform_3, window_bounds = array<i64: 1, 288, 128>}]} {
    %cst = arith.constant 0.000000e+00 : f32
    %0 = vector.broadcast %cst : f32 to vector<288x128xf32>
    %c0 = arith.constant 0 : index
    %c0_0 = arith.constant 0 : index
    %c0_1 = arith.constant 0 : index
    %1 = vector.load %arg2[%c0, %c0_0, %c0_1] : memref<1x352x32xbf16, #tpu.memory_space<vmem>>, vector<1x288x32xbf16>
    %2 = vector.shape_cast %1 : vector<1x288x32xbf16> to vector<288x32xbf16>
    %c0_2 = arith.constant 0 : index
    %c0_3 = arith.constant 0 : index
    %c0_4 = arith.constant 0 : index
    %3 = vector.load %arg3[%c0_2, %c0_3, %c0_4] : memref<9x32x128xbf16, #tpu.memory_space<vmem>>, vector<1x32x128xbf16>
    %4 = vector.shape_cast %3 : vector<1x32x128xbf16> to vector<32x128xbf16>
    %cst_5 = arith.constant dense<0.000000e+00> : vector<288x128xf32>
    %5 = tpu.matmul %2, %4, %cst_5 {dimension_numbers = #tpu.dot_dimension_numbers<[1], [0], [0], [1], [0, 0, 1, 1], [], []>} : vector<288x32xbf16>, vector<32x128xbf16>, vector<288x128xf32> -> vector<288x128xf32>
    %6 = arith.addf %0, %5 : vector<288x128xf32>
    %c0_6 = arith.constant 0 : index
    %c1 = arith.constant 1 : index
    %c0_7 = arith.constant 0 : index
    %7 = vector.load %arg2[%c0_6, %c1, %c0_7] : memref<1x352x32xbf16, #tpu.memory_space<vmem>>, vector<1x288x32xbf16>
    %8 = vector.shape_cast %7 : vector<1x288x32xbf16> to vector<288x32xbf16>
    %c1_8 = arith.constant 1 : index
    %c0_9 = arith.constant 0 : index
    %c0_10 = arith.constant 0 : index
    %9 = vector.load %arg3[%c1_8, %c0_9, %c0_10] : memref<9x32x128xbf16, #tpu.memory_space<vmem>>, vector<1x32x128xbf16>
    %10 = vector.shape_cast %9 : vector<1x32x128xbf16> to vector<32x128xbf16>
    %cst_11 = arith.constant dense<0.000000e+00> : vector<288x128xf32>
    %11 = tpu.matmul %8, %10, %cst_11 {dimension_numbers = #tpu.dot_dimension_numbers<[1], [0], [0], [1], [0, 0, 1, 1], [], []>} : vector<288x32xbf16>, vector<32x128xbf16>, vector<288x128xf32> -> vector<288x128xf32>
    %12 = arith.addf %6, %11 : vector<288x128xf32>
    %c0_12 = arith.constant 0 : index
    %c2 = arith.constant 2 : index
    %c0_13 = arith.constant 0 : index
    %13 = vector.load %arg2[%c0_12, %c2, %c0_13] : memref<1x352x32xbf16, #tpu.memory_space<vmem>>, vector<1x288x32xbf16>
    %14 = vector.shape_cast %13 : vector<1x288x32xbf16> to vector<288x32xbf16>
    %c2_14 = arith.constant 2 : index
    %c0_15 = arith.constant 0 : index
    %c0_16 = arith.constant 0 : index
    %15 = vector.load %arg3[%c2_14, %c0_15, %c0_16] : memref<9x32x128xbf16, #tpu.memory_space<vmem>>, vector<1x32x128xbf16>
    %16 = vector.shape_cast %15 : vector<1x32x128xbf16> to vector<32x128xbf16>
    %cst_17 = arith.constant dense<0.000000e+00> : vector<288x128xf32>
    %17 = tpu.matmul %14, %16, %cst_17 {dimension_numbers = #tpu.dot_dimension_numbers<[1], [0], [0], [1], [0, 0, 1, 1], [], []>} : vector<288x32xbf16>, vector<32x128xbf16>, vector<288x128xf32> -> vector<288x128xf32>
    %18 = arith.addf %12, %17 : vector<288x128xf32>
    %c0_18 = arith.constant 0 : index
    %c18 = arith.constant 18 : index
    %c0_19 = arith.constant 0 : index
    %19 = vector.load %arg2[%c0_18, %c18, %c0_19] : memref<1x352x32xbf16, #tpu.memory_space<vmem>>, vector<1x288x32xbf16>
    %20 = vector.shape_cast %19 : vector<1x288x32xbf16> to vector<288x32xbf16>
    %c3 = arith.constant 3 : index
    %c0_20 = arith.constant 0 : index
    %c0_21 = arith.constant 0 : index
    %21 = vector.load %arg3[%c3, %c0_20, %c0_21] : memref<9x32x128xbf16, #tpu.memory_space<vmem>>, vector<1x32x128xbf16>
    %22 = vector.shape_cast %21 : vector<1x32x128xbf16> to vector<32x128xbf16>
    %cst_22 = arith.constant dense<0.000000e+00> : vector<288x128xf32>
    %23 = tpu.matmul %20, %22, %cst_22 {dimension_numbers = #tpu.dot_dimension_numbers<[1], [0], [0], [1], [0, 0, 1, 1], [], []>} : vector<288x32xbf16>, vector<32x128xbf16>, vector<288x128xf32> -> vector<288x128xf32>
    %24 = arith.addf %18, %23 : vector<288x128xf32>
    %c0_23 = arith.constant 0 : index
    %c19 = arith.constant 19 : index
    %c0_24 = arith.constant 0 : index
    %25 = vector.load %arg2[%c0_23, %c19, %c0_24] : memref<1x352x32xbf16, #tpu.memory_space<vmem>>, vector<1x288x32xbf16>
    %26 = vector.shape_cast %25 : vector<1x288x32xbf16> to vector<288x32xbf16>
    %c4 = arith.constant 4 : index
    %c0_25 = arith.constant 0 : index
    %c0_26 = arith.constant 0 : index
    %27 = vector.load %arg3[%c4, %c0_25, %c0_26] : memref<9x32x128xbf16, #tpu.memory_space<vmem>>, vector<1x32x128xbf16>
    %28 = vector.shape_cast %27 : vector<1x32x128xbf16> to vector<32x128xbf16>
    %cst_27 = arith.constant dense<0.000000e+00> : vector<288x128xf32>
    %29 = tpu.matmul %26, %28, %cst_27 {dimension_numbers = #tpu.dot_dimension_numbers<[1], [0], [0], [1], [0, 0, 1, 1], [], []>} : vector<288x32xbf16>, vector<32x128xbf16>, vector<288x128xf32> -> vector<288x128xf32>
    %30 = arith.addf %24, %29 : vector<288x128xf32>
    %c0_28 = arith.constant 0 : index
    %c20 = arith.constant 20 : index
    %c0_29 = arith.constant 0 : index
    %31 = vector.load %arg2[%c0_28, %c20, %c0_29] : memref<1x352x32xbf16, #tpu.memory_space<vmem>>, vector<1x288x32xbf16>
    %32 = vector.shape_cast %31 : vector<1x288x32xbf16> to vector<288x32xbf16>
    %c5 = arith.constant 5 : index
    %c0_30 = arith.constant 0 : index
    %c0_31 = arith.constant 0 : index
    %33 = vector.load %arg3[%c5, %c0_30, %c0_31] : memref<9x32x128xbf16, #tpu.memory_space<vmem>>, vector<1x32x128xbf16>
    %34 = vector.shape_cast %33 : vector<1x32x128xbf16> to vector<32x128xbf16>
    %cst_32 = arith.constant dense<0.000000e+00> : vector<288x128xf32>
    %35 = tpu.matmul %32, %34, %cst_32 {dimension_numbers = #tpu.dot_dimension_numbers<[1], [0], [0], [1], [0, 0, 1, 1], [], []>} : vector<288x32xbf16>, vector<32x128xbf16>, vector<288x128xf32> -> vector<288x128xf32>
    %36 = arith.addf %30, %35 : vector<288x128xf32>
    %c0_33 = arith.constant 0 : index
    %c36 = arith.constant 36 : index
    %c0_34 = arith.constant 0 : index
    %37 = vector.load %arg2[%c0_33, %c36, %c0_34] : memref<1x352x32xbf16, #tpu.memory_space<vmem>>, vector<1x288x32xbf16>
    %38 = vector.shape_cast %37 : vector<1x288x32xbf16> to vector<288x32xbf16>
    %c6 = arith.constant 6 : index
    %c0_35 = arith.constant 0 : index
    %c0_36 = arith.constant 0 : index
    %39 = vector.load %arg3[%c6, %c0_35, %c0_36] : memref<9x32x128xbf16, #tpu.memory_space<vmem>>, vector<1x32x128xbf16>
    %40 = vector.shape_cast %39 : vector<1x32x128xbf16> to vector<32x128xbf16>
    %cst_37 = arith.constant dense<0.000000e+00> : vector<288x128xf32>
    %41 = tpu.matmul %38, %40, %cst_37 {dimension_numbers = #tpu.dot_dimension_numbers<[1], [0], [0], [1], [0, 0, 1, 1], [], []>} : vector<288x32xbf16>, vector<32x128xbf16>, vector<288x128xf32> -> vector<288x128xf32>
    %42 = arith.addf %36, %41 : vector<288x128xf32>
    %c0_38 = arith.constant 0 : index
    %c37 = arith.constant 37 : index
    %c0_39 = arith.constant 0 : index
    %43 = vector.load %arg2[%c0_38, %c37, %c0_39] : memref<1x352x32xbf16, #tpu.memory_space<vmem>>, vector<1x288x32xbf16>
    %44 = vector.shape_cast %43 : vector<1x288x32xbf16> to vector<288x32xbf16>
    %c7 = arith.constant 7 : index
    %c0_40 = arith.constant 0 : index
    %c0_41 = arith.constant 0 : index
    %45 = vector.load %arg3[%c7, %c0_40, %c0_41] : memref<9x32x128xbf16, #tpu.memory_space<vmem>>, vector<1x32x128xbf16>
    %46 = vector.shape_cast %45 : vector<1x32x128xbf16> to vector<32x128xbf16>
    %cst_42 = arith.constant dense<0.000000e+00> : vector<288x128xf32>
    %47 = tpu.matmul %44, %46, %cst_42 {dimension_numbers = #tpu.dot_dimension_numbers<[1], [0], [0], [1], [0, 0, 1, 1], [], []>} : vector<288x32xbf16>, vector<32x128xbf16>, vector<288x128xf32> -> vector<288x128xf32>
    %48 = arith.addf %42, %47 : vector<288x128xf32>
    %c0_43 = arith.constant 0 : index
    %c38 = arith.constant 38 : index
    %c0_44 = arith.constant 0 : index
    %49 = vector.load %arg2[%c0_43, %c38, %c0_44] : memref<1x352x32xbf16, #tpu.memory_space<vmem>>, vector<1x288x32xbf16>
    %50 = vector.shape_cast %49 : vector<1x288x32xbf16> to vector<288x32xbf16>
    %c8 = arith.constant 8 : index
    %c0_45 = arith.constant 0 : index
    %c0_46 = arith.constant 0 : index
    %51 = vector.load %arg3[%c8, %c0_45, %c0_46] : memref<9x32x128xbf16, #tpu.memory_space<vmem>>, vector<1x32x128xbf16>
    %52 = vector.shape_cast %51 : vector<1x32x128xbf16> to vector<32x128xbf16>
    %cst_47 = arith.constant dense<0.000000e+00> : vector<288x128xf32>
    %53 = tpu.matmul %50, %52, %cst_47 {dimension_numbers = #tpu.dot_dimension_numbers<[1], [0], [0], [1], [0, 0, 1, 1], [], []>} : vector<288x32xbf16>, vector<32x128xbf16>, vector<288x128xf32> -> vector<288x128xf32>
    %54 = arith.addf %48, %53 : vector<288x128xf32>
    %c0_48 = arith.constant 0 : index
    %c0_49 = arith.constant 0 : index
    %55 = vector.load %arg4[%c0_48, %c0_49] : memref<1x128xf32, #tpu.memory_space<vmem>>, vector<1x128xf32>
    %56 = vector.broadcast %55 : vector<1x128xf32> to vector<288x128xf32>
    %57 = arith.addf %54, %56 : vector<288x128xf32>
    %cst_50 = arith.constant 5.000000e-02 : f32
    %58 = vector.broadcast %cst_50 : f32 to vector<288x128xf32>
    %59 = arith.mulf %57, %58 : vector<288x128xf32>
    %c0_51 = arith.constant 0 : index
    %c0_52 = arith.constant 0 : index
    %c0_53 = arith.constant 0 : index
    %60 = vector.load %arg5[%c0_51, %c0_52, %c0_53] : memref<1x288x128xf32, #tpu.memory_space<vmem>>, vector<1x288x128xf32>
    %61 = vector.shape_cast %60 : vector<1x288x128xf32> to vector<288x128xf32>
    %62 = vector.shape_cast %59 : vector<288x128xf32> to vector<1x288x128xf32>
    tpu.vector_store %arg5[%c0_51, %c0_52, %c0_53], %62 {strides = array<i32>} : memref<1x288x128xf32, #tpu.memory_space<vmem>>, vector<1x288x128xf32>,
    return
  }
  func.func @transform_0(%arg0: i32, %arg1: i32) -> (i32, i32, i32) {
    %c0_i32 = arith.constant 0 : i32
    %c0_i32_0 = arith.constant 0 : i32
    %c0_i32_1 = arith.constant 0 : i32
    return %arg0, %c0_i32, %c0_i32_0 : i32, i32, i32
  }
  func.func @transform_1(%arg0: i32, %arg1: i32) -> (i32, i32, i32) {
    %c0_i32 = arith.constant 0 : i32
    %c0_i32_0 = arith.constant 0 : i32
    %c0_i32_1 = arith.constant 0 : i32
    return %c0_i32, %c0_i32_0, %arg1 : i32, i32, i32
  }
  func.func @transform_2(%arg0: i32, %arg1: i32) -> (i32, i32) {
    %c0_i32 = arith.constant 0 : i32
    %c0_i32_0 = arith.constant 0 : i32
    return %c0_i32, %arg1 : i32, i32
  }
  func.func @transform_3(%arg0: i32, %arg1: i32) -> (i32, i32, i32) {
    %c0_i32 = arith.constant 0 : i32
    %c0_i32_0 = arith.constant 0 : i32
    return %arg0, %c0_i32, %arg1 : i32, i32, i32
  }
}

module attributes {stable_mosaic.version = 11 : i64} {
  func.func @kernel(%arg0: i32, %arg1: i32, %arg2: memref<1x352x32xf32, #tpu.memory_space<vmem>>, %arg3: memref<9x32x128xf32, #tpu.memory_space<vmem>>, %arg4: memref<1x128xf32, #tpu.memory_space<vmem>>, %arg5: memref<1x288x128xf32, #tpu.memory_space<vmem>>) attributes {dimension_semantics = [#tpu.dimension_semantics<parallel>, #tpu.dimension_semantics<parallel>], iteration_bounds = array<i64: 2, 1>, scalar_prefetch = 0 : i64, scratch_operands = 0 : i64, tpu.core_type = #tpu.core_type<tc>, window_params = [{transform_indices = @transform_0, window_bounds = array<i64: 1, 352, 32>}, {transform_indices = @transform_1, window_bounds = array<i64: 9, 32, 128>}, {transform_indices = @transform_2, window_bounds = array<i64: 1, 128>}, {transform_indices = @transform_3, window_bounds = array<i64: 1, 288, 128>}]} {
    %cst = arith.constant 0.000000e+00 : f32
    %0 = vector.broadcast %cst : f32 to vector<288x128xf32>
    %c0 = arith.constant 0 : index
    %c0_0 = arith.constant 0 : index
    %c0_1 = arith.constant 0 : index
    %1 = vector.load %arg2[%c0, %c0_0, %c0_1] : memref<1x352x32xf32, #tpu.memory_space<vmem>>, vector<1x288x32xf32>
    %2 = vector.shape_cast %1 : vector<1x288x32xf32> to vector<288x32xf32>
    %c0_2 = arith.constant 0 : index
    %c0_3 = arith.constant 0 : index
    %c0_4 = arith.constant 0 : index
    %3 = vector.load %arg3[%c0_2, %c0_3, %c0_4] : memref<9x32x128xf32, #tpu.memory_space<vmem>>, vector<1x32x128xf32>
    %4 = vector.shape_cast %3 : vector<1x32x128xf32> to vector<32x128xf32>
    %cst_5 = arith.constant dense<0.000000e+00> : vector<288x128xf32>
    %5 = tpu.matmul %2, %4, %cst_5 {dimension_numbers = #tpu.dot_dimension_numbers<[1], [0], [0], [1], [0, 0, 1, 1], [], []>} : vector<288x32xf32>, vector<32x128xf32>, vector<288x128xf32> -> vector<288x128xf32>
    %6 = arith.addf %0, %5 : vector<288x128xf32>
    %c0_6 = arith.constant 0 : index
    %c1 = arith.constant 1 : index
    %c0_7 = arith.constant 0 : index
    %7 = vector.load %arg2[%c0_6, %c1, %c0_7] : memref<1x352x32xf32, #tpu.memory_space<vmem>>, vector<1x288x32xf32>
    %8 = vector.shape_cast %7 : vector<1x288x32xf32> to vector<288x32xf32>
    %c1_8 = arith.constant 1 : index
    %c0_9 = arith.constant 0 : index
    %c0_10 = arith.constant 0 : index
    %9 = vector.load %arg3[%c1_8, %c0_9, %c0_10] : memref<9x32x128xf32, #tpu.memory_space<vmem>>, vector<1x32x128xf32>
    %10 = vector.shape_cast %9 : vector<1x32x128xf32> to vector<32x128xf32>
    %cst_11 = arith.constant dense<0.000000e+00> : vector<288x128xf32>
    %11 = tpu.matmul %8, %10, %cst_11 {dimension_numbers = #tpu.dot_dimension_numbers<[1], [0], [0], [1], [0, 0, 1, 1], [], []>} : vector<288x32xf32>, vector<32x128xf32>, vector<288x128xf32> -> vector<288x128xf32>
    %12 = arith.addf %6, %11 : vector<288x128xf32>
    %c0_12 = arith.constant 0 : index
    %c2 = arith.constant 2 : index
    %c0_13 = arith.constant 0 : index
    %13 = vector.load %arg2[%c0_12, %c2, %c0_13] : memref<1x352x32xf32, #tpu.memory_space<vmem>>, vector<1x288x32xf32>
    %14 = vector.shape_cast %13 : vector<1x288x32xf32> to vector<288x32xf32>
    %c2_14 = arith.constant 2 : index
    %c0_15 = arith.constant 0 : index
    %c0_16 = arith.constant 0 : index
    %15 = vector.load %arg3[%c2_14, %c0_15, %c0_16] : memref<9x32x128xf32, #tpu.memory_space<vmem>>, vector<1x32x128xf32>
    %16 = vector.shape_cast %15 : vector<1x32x128xf32> to vector<32x128xf32>
    %cst_17 = arith.constant dense<0.000000e+00> : vector<288x128xf32>
    %17 = tpu.matmul %14, %16, %cst_17 {dimension_numbers = #tpu.dot_dimension_numbers<[1], [0], [0], [1], [0, 0, 1, 1], [], []>} : vector<288x32xf32>, vector<32x128xf32>, vector<288x128xf32> -> vector<288x128xf32>
    %18 = arith.addf %12, %17 : vector<288x128xf32>
    %c0_18 = arith.constant 0 : index
    %c18 = arith.constant 18 : index
    %c0_19 = arith.constant 0 : index
    %19 = vector.load %arg2[%c0_18, %c18, %c0_19] : memref<1x352x32xf32, #tpu.memory_space<vmem>>, vector<1x288x32xf32>
    %20 = vector.shape_cast %19 : vector<1x288x32xf32> to vector<288x32xf32>
    %c3 = arith.constant 3 : index
    %c0_20 = arith.constant 0 : index
    %c0_21 = arith.constant 0 : index
    %21 = vector.load %arg3[%c3, %c0_20, %c0_21] : memref<9x32x128xf32, #tpu.memory_space<vmem>>, vector<1x32x128xf32>
    %22 = vector.shape_cast %21 : vector<1x32x128xf32> to vector<32x128xf32>
    %cst_22 = arith.constant dense<0.000000e+00> : vector<288x128xf32>
    %23 = tpu.matmul %20, %22, %cst_22 {dimension_numbers = #tpu.dot_dimension_numbers<[1], [0], [0], [1], [0, 0, 1, 1], [], []>} : vector<288x32xf32>, vector<32x128xf32>, vector<288x128xf32> -> vector<288x128xf32>
    %24 = arith.addf %18, %23 : vector<288x128xf32>
    %c0_23 = arith.constant 0 : index
    %c19 = arith.constant 19 : index
    %c0_24 = arith.constant 0 : index
    %25 = vector.load %arg2[%c0_23, %c19, %c0_24] : memref<1x352x32xf32, #tpu.memory_space<vmem>>, vector<1x288x32xf32>
    %26 = vector.shape_cast %25 : vector<1x288x32xf32> to vector<288x32xf32>
    %c4 = arith.constant 4 : index
    %c0_25 = arith.constant 0 : index
    %c0_26 = arith.constant 0 : index
    %27 = vector.load %arg3[%c4, %c0_25, %c0_26] : memref<9x32x128xf32, #tpu.memory_space<vmem>>, vector<1x32x128xf32>
    %28 = vector.shape_cast %27 : vector<1x32x128xf32> to vector<32x128xf32>
    %cst_27 = arith.constant dense<0.000000e+00> : vector<288x128xf32>
    %29 = tpu.matmul %26, %28, %cst_27 {dimension_numbers = #tpu.dot_dimension_numbers<[1], [0], [0], [1], [0, 0, 1, 1], [], []>} : vector<288x32xf32>, vector<32x128xf32>, vector<288x128xf32> -> vector<288x128xf32>
    %30 = arith.addf %24, %29 : vector<288x128xf32>
    %c0_28 = arith.constant 0 : index
    %c20 = arith.constant 20 : index
    %c0_29 = arith.constant 0 : index
    %31 = vector.load %arg2[%c0_28, %c20, %c0_29] : memref<1x352x32xf32, #tpu.memory_space<vmem>>, vector<1x288x32xf32>
    %32 = vector.shape_cast %31 : vector<1x288x32xf32> to vector<288x32xf32>
    %c5 = arith.constant 5 : index
    %c0_30 = arith.constant 0 : index
    %c0_31 = arith.constant 0 : index
    %33 = vector.load %arg3[%c5, %c0_30, %c0_31] : memref<9x32x128xf32, #tpu.memory_space<vmem>>, vector<1x32x128xf32>
    %34 = vector.shape_cast %33 : vector<1x32x128xf32> to vector<32x128xf32>
    %cst_32 = arith.constant dense<0.000000e+00> : vector<288x128xf32>
    %35 = tpu.matmul %32, %34, %cst_32 {dimension_numbers = #tpu.dot_dimension_numbers<[1], [0], [0], [1], [0, 0, 1, 1], [], []>} : vector<288x32xf32>, vector<32x128xf32>, vector<288x128xf32> -> vector<288x128xf32>
    %36 = arith.addf %30, %35 : vector<288x128xf32>
    %c0_33 = arith.constant 0 : index
    %c36 = arith.constant 36 : index
    %c0_34 = arith.constant 0 : index
    %37 = vector.load %arg2[%c0_33, %c36, %c0_34] : memref<1x352x32xf32, #tpu.memory_space<vmem>>, vector<1x288x32xf32>
    %38 = vector.shape_cast %37 : vector<1x288x32xf32> to vector<288x32xf32>
    %c6 = arith.constant 6 : index
    %c0_35 = arith.constant 0 : index
    %c0_36 = arith.constant 0 : index
    %39 = vector.load %arg3[%c6, %c0_35, %c0_36] : memref<9x32x128xf32, #tpu.memory_space<vmem>>, vector<1x32x128xf32>
    %40 = vector.shape_cast %39 : vector<1x32x128xf32> to vector<32x128xf32>
    %cst_37 = arith.constant dense<0.000000e+00> : vector<288x128xf32>
    %41 = tpu.matmul %38, %40, %cst_37 {dimension_numbers = #tpu.dot_dimension_numbers<[1], [0], [0], [1], [0, 0, 1, 1], [], []>} : vector<288x32xf32>, vector<32x128xf32>, vector<288x128xf32> -> vector<288x128xf32>
    %42 = arith.addf %36, %41 : vector<288x128xf32>
    %c0_38 = arith.constant 0 : index
    %c37 = arith.constant 37 : index
    %c0_39 = arith.constant 0 : index
    %43 = vector.load %arg2[%c0_38, %c37, %c0_39] : memref<1x352x32xf32, #tpu.memory_space<vmem>>, vector<1x288x32xf32>
    %44 = vector.shape_cast %43 : vector<1x288x32xf32> to vector<288x32xf32>
    %c7 = arith.constant 7 : index
    %c0_40 = arith.constant 0 : index
    %c0_41 = arith.constant 0 : index
    %45 = vector.load %arg3[%c7, %c0_40, %c0_41] : memref<9x32x128xf32, #tpu.memory_space<vmem>>, vector<1x32x128xf32>
    %46 = vector.shape_cast %45 : vector<1x32x128xf32> to vector<32x128xf32>
    %cst_42 = arith.constant dense<0.000000e+00> : vector<288x128xf32>
    %47 = tpu.matmul %44, %46, %cst_42 {dimension_numbers = #tpu.dot_dimension_numbers<[1], [0], [0], [1], [0, 0, 1, 1], [], []>} : vector<288x32xf32>, vector<32x128xf32>, vector<288x128xf32> -> vector<288x128xf32>
    %48 = arith.addf %42, %47 : vector<288x128xf32>
    %c0_43 = arith.constant 0 : index
    %c38 = arith.constant 38 : index
    %c0_44 = arith.constant 0 : index
    %49 = vector.load %arg2[%c0_43, %c38, %c0_44] : memref<1x352x32xf32, #tpu.memory_space<vmem>>, vector<1x288x32xf32>
    %50 = vector.shape_cast %49 : vector<1x288x32xf32> to vector<288x32xf32>
    %c8 = arith.constant 8 : index
    %c0_45 = arith.constant 0 : index
    %c0_46 = arith.constant 0 : index
    %51 = vector.load %arg3[%c8, %c0_45, %c0_46] : memref<9x32x128xf32, #tpu.memory_space<vmem>>, vector<1x32x128xf32>
    %52 = vector.shape_cast %51 : vector<1x32x128xf32> to vector<32x128xf32>
    %cst_47 = arith.constant dense<0.000000e+00> : vector<288x128xf32>
    %53 = tpu.matmul %50, %52, %cst_47 {dimension_numbers = #tpu.dot_dimension_numbers<[1], [0], [0], [1], [0, 0, 1, 1], [], []>} : vector<288x32xf32>, vector<32x128xf32>, vector<288x128xf32> -> vector<288x128xf32>
    %54 = arith.addf %48, %53 : vector<288x128xf32>
    %c0_48 = arith.constant 0 : index
    %c0_49 = arith.constant 0 : index
    %55 = vector.load %arg4[%c0_48, %c0_49] : memref<1x128xf32, #tpu.memory_space<vmem>>, vector<1x128xf32>
    %56 = vector.broadcast %55 : vector<1x128xf32> to vector<288x128xf32>
    %57 = arith.addf %54, %56 : vector<288x128xf32>
    %cst_50 = arith.constant 5.000000e-02 : f32
    %58 = vector.broadcast %cst_50 : f32 to vector<288x128xf32>
    %59 = arith.mulf %57, %58 : vector<288x128xf32>
    %c0_51 = arith.constant 0 : index
    %c0_52 = arith.constant 0 : index
    %c0_53 = arith.constant 0 : index
    %60 = vector.load %arg5[%c0_51, %c0_52, %c0_53] : memref<1x288x128xf32, #tpu.memory_space<vmem>>, vector<1x288x128xf32>
    %61 = vector.shape_cast %60 : vector<1x288x128xf32> to vector<288x128xf32>
    %62 = vector.shape_cast %59 : vector<288x128xf32> to vector<1x288x128xf32>
    tpu.vector_store %arg5[%c0_51, %c0_52, %c0_53], %62 {strides = array<i32>} : memref<1x288x128xf32, #tpu.memory_space<vmem>>, vector<1x288x128xf32>,
    return
  }
  func.func @transform_0(%arg0: i32, %arg1: i32) -> (i32, i32, i32) {
    %c0_i32 = arith.constant 0 : i32
    %c0_i32_0 = arith.constant 0 : i32
    %c0_i32_1 = arith.constant 0 : i32
    return %arg0, %c0_i32, %c0_i32_0 : i32, i32, i32
  }
  func.func @transform_1(%arg0: i32, %arg1: i32) -> (i32, i32, i32) {
    %c0_i32 = arith.constant 0 : i32
    %c0_i32_0 = arith.constant 0 : i32
    %c0_i32_1 = arith.constant 0 : i32
    return %c0_i32, %c0_i32_0, %arg1 : i32, i32, i32
  }
  func.func @transform_2(%arg0: i32, %arg1: i32) -> (i32, i32) {
    %c0_i32 = arith.constant 0 : i32
    %c0_i32_0 = arith.constant 0 : i32
    return %c0_i32, %arg1 : i32, i32
  }
  func.func @transform_3(%arg0: i32, %arg1: i32) -> (i32, i32, i32) {
    %c0_i32 = arith.constant 0 : i32
    %c0_i32_0 = arith.constant 0 : i32
    return %arg0, %c0_i32, %arg1 : i32, i32, i32
  }
}

</mosaic_0001>

<bundles_post_ra>
// kernel: _lambda_.1
= control target key start
LH: loop header
LB: loop body
LE: loop exit
PB: predicated region body
PF: predicated region fallthrough
CT: control target
= control target key end

     0   :  { %s5278_s12 = smov 0   ;;  %s5280_s13 = smov 0   ;;  %s6230_s0 = inlined_call_operand.vmem [shape: bf16[2,352,32], index: 0, kind: input, shape index: {}]   ;;  %s6231_s1 = inlined_call_operand.vmem [shape: bf16[9,32,128], index: 1, kind: input, shape index: {}]   ;;  %s6232_s2 = inlined_call_operand.vmem [shape: f32[1,128], index: 2, kind: input, shape index: {}]   ;;  %s6233_s3 = inlined_call_operand.vmem [shape: f32[2,288,128], index: 3, kind: output, shape index: {}]  }
   0x1   :  { %s5282_s14 = smov 0  }
   0x2 LB: > { %s25_s15 = sadd.s32 1, %s5252_s13  ;;  %p4004_p0 = scmp.ge.s32.totalorder %s5256_s14, 1  ;;  %s5256_s14 = sphi %s5282_s14, %s13_s14   ;;  %s5252_s13 = sphi %s5280_s13, %s6235_s13   ;;  %s5248_s12 = sphi %s5278_s12, %s6234_s12  }
   0x3   : > { %p27_p1 = scmp.ge.s32.totalorder %s25_s15, 2  ;;  %p168_p2 = scmp.lt.s32.totalorder %s5256_s14, 3 }
   0x5   : > { %s6237_s15 = smov (%p27_p1, %s25_s15), 0  ;;  %p169_p3 = pnand %p4004_p0, %p168_p2 }
   0x6   : > { %v5142_v0 = vld [vmem:[%s6231_s1 + $0x40] sm:$0xff] (!%p169_p3)   ;;  %p202_p4 = scmp.lt.s32.totalorder (!%p169_p3), %s5248_s12, 1  ;;  %v5143_v1 = vld [vmem:[%s6231_s1 + $0x10] sm:$0xff] (!%p169_p3)   ;;  %v5144_v2 = vld [vmem:[%s6231_s1 + $0x48] sm:$0xff] (!%p169_p3)   ;;  %vm362_vm0 = vsmask.f32 (!%p169_p3), 7424 }
   0x7   : > { %172 = sbr.rel (%p169_p3) target bundleno = 574 (0x23e), region = 32  ;;  %4624 = vmatprep.subr.bf16.mxu0 (!%p169_p3), %v5142_v0  ;;  %4464 = vmatprep.subr.bf16.mxu1 (!%p169_p3), %v5143_v1  ;;  %v5145_v3 = vld [vmem:[%s6231_s1 + $0x18] sm:$0xff] (!%p169_p3)   ;;  %v5314_v4 = vld [vmem:[%s6231_s1 + $0x50] sm:$0xff] (!%p169_p3)   ;;  %v5154_v5 = vld [vmem:[%s6231_s1] sm:$0xff] (!%p169_p3)   ;;  %vm523_vm1 = vcmask (!%p169_p3), 261120   ;;  %vm2225_vm3 = vcmask (!%p169_p3), 1045504  }
   0x8   : > { %4625 = vmatpush3.bf16.msra.mxu0 (!%p169_p3), %v5142_v0  ;;  %4465 = vmatpush3.bf16.msra.mxu1 (!%p169_p3), %v5143_v1  ;;  %vm1766_vm2 = vsmask.f32 (!%p169_p3), 6400  ;;  %vm989_vm4 = vcmask (!%p169_p3), 1046528   ;;  %vm3002_vm5 = vsmask.f32 (!%p169_p3), 5376  ;;  %vm3461_vm6 = vcmask (!%p169_p3), 1044480  }
   0x9   : > { %4626 = vmatprep.subr.bf16.mxu0 (!%p169_p3), %v5144_v2  ;;  %4466 = vmatprep.subr.bf16.mxu1 (!%p169_p3), %v5145_v3 }
   0xc   : > { %4627 = vmatpush3.bf16.msra.mxu0 (!%p169_p3), %v5144_v2  ;;  %4467 = vmatpush3.bf16.msra.mxu1 (!%p169_p3), %v5145_v3 }
   0xd   : > { %4664 = vmatprep.subr.bf16.mxu0 (!%p169_p3), %v5314_v4  ;;  %4504 = vmatprep.subr.bf16.mxu1 (!%p169_p3), %v5154_v5 }
   0xe   : > { %s6239_s12 = smov (!%p202_p4, %s5248_s12), 1 }
   0xf   : > { %s5116_s24 = smul.u32 176, %s6239_s12 }
  0x11   : > { %s5319_s29 = scalar_lea.vmem %s6230_s0, %s5116_s24 }
  0x12   : > { %v223_v6 = vld [vmem:[%s5319_s29] sm:$0xf]  ;;  %v5326_v7 = vld [vmem:[%s5319_s29 + $0x4] sm:$0xf]  ;;  %v5332_v9 = vld [vmem:[%s5319_s29 + $0x8] sm:$0xff]  }
  0x13   : > { %v5329_v8 = vcombine.low %v223_v6, %v5326_v7  ;;  %v1306_v10 = vld [vmem:[%s5319_s29 + $0x8] sm:$0xe]  ;;  %v5337_v11 = vld [vmem:[%s5319_s29 + $0xc] sm:$0xf]  ;;  %v371_v14 = vshll.u32 %v5332_v9, 16  ;;  %v375_v15 = vshrl.u32 %v5332_v9, 16 }
  0x14   : > { %v5344_v16 = vld [vmem:[%s5319_s29 + $0x10] sm:$0xff]   ;;  %v5350_v18 = vcombine.low %v1306_v10, %v5337_v11  ;;  %v5358_v26 = vld [vmem:[%s5319_s29 + $0x18] sm:$0xff]   ;;  %v5364_v32 = vld [vmem:[%s5319_s29 + $0x20] sm:$0xff]  }
  0x15   : > { %v364_v12 = vshrl.u32 %v5329_v8, 16  ;;  %v366_v13 = vshll.u32 %v5329_v8, 16  ;;  %v5347_v17 = vld [vmem:[%s5319_s29 + $0x10] sm:$0xff]   ;;  %v373_v20 = vrot.slane %v371_v14, 1  ;;  %v1776_v21 = vshrl.u32 %v5344_v16, 16  ;;  %v5361_v31 = vld [vmem:[%s5319_s29 + $0x18] sm:$0xff]  }
  0x16   : > { %v1779_v22 = vshll.u32 %v5344_v16, 16  ;;  %v1768_v23 = vshrl.u32 %v5350_v18, 16  ;;  %v1771_v24 = vshll.u32 %v5350_v18, 16  ;;  %v379_v25 = vshll.u32 %v5347_v17, 16  ;;  %v5374_v45 = vld [vmem:[%s5319_s29 + $0x20] sm:$0xff]   ;;  %v5377_v46 = vld [vmem:[%s5319_s29 + $0x28] sm:$0xff]  }
  0x17   : > { %v368_v19 = vrot.slane %v366_v13, 1  ;;  %v377_v28 = vor.u32 %v375_v15, %v373_v20  ;;  %v1778_v29 = vrot.slane %v1776_v21, 1  ;;  %v1785_v36 = vshrl.u32 %v5358_v26, 16  ;;  %v5383_v51 = vld [vmem:[%s5319_s29 + $0x28] sm:$0xff]   ;;  %v5389_v56 = vld [vmem:[%s5319_s29 + $0x30] sm:$0xff]   ;;  %v5406_v15 = vld [vmem:[%s5319_s29 + $0x38] sm:$0xff]  }
  0x18   : > { %v1781_v30 = vrot.slane %v1779_v22, 2  ;;  %v1770_v33 = vrot.slane %v1768_v23, 1  ;;  %v1773_v34 = vrot.slane %v1771_v24, 2  ;;  %v381_v35 = vrot.slane %v379_v25, 1  ;;  %v5394_v61 = vld [vmem:[%s5319_s29 + $0x30] sm:$0xff]  }
  0x19   : > { %v369_v27 = vor.u32 %v368_v19, %v364_v12  ;;  %v1788_v39 = vshll.u32 %v5358_v26, 16  ;;  %v383_v40 = vshrl.u32 %v5347_v17, 16  ;;  %v1787_v43 = vrot.slane %v1785_v36, 1 }
  0x1a   : > { %v1782_v38 = vor.u32 %v1781_v30, %v1778_v29  ;;  %v1774_v41 = vor.u32 %v1773_v34, %v1770_v33  ;;  %v382_v42 = vsel %vm362_vm0, %v377_v28, %v381_v35  ;;  %v387_v44 = vshll.u32 %v5361_v31, 16  ;;  %v5162_v28 = vld [vmem:[%s6231_s1 + $0x58] sm:$0xff]  }
  0x1b   : > { %v374_v37 = vsel %vm362_vm0, %v369_v27, %v373_v20  ;;  %v1790_v47 = vrot.slane %v1788_v39, 2  ;;  %v385_v48 = vor.u32 %v383_v40, %v381_v35  ;;  %v1794_v49 = vshrl.u32 %v5364_v32, 16  ;;  %v5421_v33 = vld [vmem:[%s5319_s29 + $0x38] sm:$0xff]  }
  0x1c   : > { %4468 = vmatprep.mubr.msk.bf16.mxu1 %vm523_vm1, %v374_v37  ;;  %v1797_v50 = vshll.u32 %v5364_v32, 16  ;;  %v1783_v52 = vsel %vm1766_vm2, %v1774_v41, %v1782_v38  ;;  %v389_v53 = vrot.slane %v387_v44, 1  ;;  %v391_v54 = vshrl.u32 %v5361_v31, 16 }
  0x1d   : > { %4469 = vmatmul.mubr.msk.bf16.vlgmr.msra.gmra.mrb[0].mxu1 %vm523_vm1, %v382_v42  ;;  %v395_v55 = vshll.u32 %v5374_v45, 16  ;;  %4628 = vmatprep.mubr.msk.bf16.mxu0 %vm523_vm1, %v1783_v52  ;;  %v1791_v57 = vor.u32 %v1790_v47, %v1787_v43  ;;  %v1796_v58 = vrot.slane %v1794_v49, 1  ;;  %v1803_v60 = vshrl.u32 %v5377_v46, 16  ;;  %v5431_v43 = vld [vmem:[%s5319_s29 + $0x40] sm:$0xff]   ;;  %v5437_v49 = vld [vmem:[%s5319_s29 + $0x48] sm:$0xff]  }
  0x1e   : > { %4505 = vmatpush3.bf16.msra.mxu1 %v5154_v5  ;;  %v1799_v59 = vrot.slane %v1797_v50, 2  ;;  %v390_v62 = vsel %vm362_vm0, %v385_v48, %v389_v53  ;;  %v393_v63 = vor.u32 %v391_v54, %v389_v53  ;;  %v1806_v1 = vshll.u32 %v5377_v46, 16 }
  0x1f   : > { %v397_v0 = vrot.slane %v395_v55, 1  ;;  %v1792_v2 = vsel %vm1766_vm2, %v1782_v38, %v1791_v57  ;;  %4472 = vmatprep.mubr.msk.bf16.mxu1 %vm523_vm1, %v390_v62  ;;  %v1805_v5 = vrot.slane %v1803_v60, 1  ;;  %v399_v6 = vshrl.u32 %v5374_v45, 16  ;;  %v5426_v38 = vld [vmem:[%s5319_s29 + $0x40] sm:$0xff]   ;;  %v5443_v55 = vld [vmem:[%s5319_s29 + $0x48] sm:$0xff]  }
  0x20   : > { %v1800_v3 = vor.u32 %v1799_v59, %v1796_v58  ;;  %4629 = vmatmul.mubr.msk.bf16.vlgmr.msra.gmra.mrb[0].mxu0 %vm523_vm1, %v1792_v2  ;;  %v1808_v12 = vrot.slane %v1806_v1, 2  ;;  %v403_v13 = vshll.u32 %v5383_v51, 16  ;;  %v1812_v14 = vshrl.u32 %v5389_v56, 16 }
  0x21   : > { %v398_v10 = vsel %vm362_vm0, %v393_v63, %v397_v0  ;;  %4665 = vmatpush3.bf16.msra.mxu0 %v5314_v4  ;;  %v401_v20 = vor.u32 %v399_v6, %v397_v0  ;;  %v1815_v21 = vshll.u32 %v5389_v56, 16  ;;  %v407_v22 = vshrl.u32 %v5383_v51, 16 }
  0x22   : > { %v1801_v19 = vsel %vm1766_vm2, %v1791_v57, %v1800_v3  ;;  %v1809_v23 = vor.u32 %v1808_v12, %v1805_v5  ;;  %v405_v24 = vrot.slane %v403_v13, 1  ;;  %v1814_v25 = vrot.slane %v1812_v14, 1  ;;  %4666 = vmatprep.subr.bf16.mxu0 %v5162_v28 }
  0x23   : > { %4632 = vmatprep.mubr.msk.bf16.mxu0 %vm523_vm1, %v1801_v19  ;;  %v411_v27 = vshll.u32 %v5394_v61, 16  ;;  %v1817_v4 = vrot.slane %v1815_v21, 2  ;;  %v1821_v29 = vshrl.u32 %v5406_v15, 16  ;;  %v1824_v30 = vshll.u32 %v5406_v15, 16  ;;  %v5464_v21 = vld [vmem:[%s5319_s29 + $0x58] sm:$0xff]  }
  0x24   : > { %v1810_v34 = vsel %vm1766_vm2, %v1800_v3, %v1809_v23  ;;  %v406_v35 = vsel %vm362_vm0, %v401_v20, %v405_v24  ;;  %v409_v36 = vor.u32 %v407_v22, %v405_v24  ;;  %v415_v42 = vshrl.u32 %v5394_v61, 16  ;;  %v5452_v3 = vld [vmem:[%s5319_s29 + $0x50] sm:$0xff]  }
  0x25   : > { %4473 = vmatmul.mubr.msk.bf16.gmra.mrb[4].mxu1 %vm523_vm1, %v398_v10  ;;  %v413_v37 = vrot.slane %v411_v27, 1  ;;  %v1818_v39 = vor.u32 %v1817_v4, %v1814_v25  ;;  %v1823_v40 = vrot.slane %v1821_v29, 1  ;;  %v1826_v41 = vrot.slane %v1824_v30, 2  ;;  %4667 = vmatpush3.bf16.msra.mxu0 %v5162_v28  ;;  %v5461_v20 = vld [vmem:[%s5319_s29 + $0x50] sm:$0xff]  }
  0x26   : > { %4476 = vmatprep.mubr.msk.bf16.mxu1 %vm523_vm1, %v406_v35  ;;  %v419_v44 = vshll.u32 %v5421_v33, 16  ;;  %v1830_v47 = vshrl.u32 %v5426_v38, 16  ;;  %v1833_v48 = vshll.u32 %v5426_v38, 16  ;;  %v423_v54 = vshrl.u32 %v5421_v33, 16  ;;  %v5472_v35 = vld [vmem:[%s5319_s29 + $0x58] sm:$0xff]  }
  0x27   : > { %v1819_v50 = vsel %vm1766_vm2, %v1809_v23, %v1818_v39  ;;  %v414_v52 = vsel %vm362_vm0, %v409_v36, %v413_v37  ;;  %v417_v53 = vor.u32 %v415_v42, %v413_v37  ;;  %v427_v60 = vshll.u32 %v5431_v43, 16 }
  0x28   : > { %4633 = vmatmul.mubr.msk.bf16.gmra.mrb[4].mxu0 %vm523_vm1, %v1810_v34  ;;  %v421_v57 = vrot.slane %v419_v44, 1  ;;  %v1832_v58 = vrot.slane %v1830_v47, 1  ;;  %v1835_v59 = vrot.slane %v1833_v48, 2  ;;  %v1827_v62 = vor.u32 %v1826_v41, %v1823_v40  ;;  %v2216_v47 = vld [vmem:[%s5319_s29 + $0x8] sm:$0xc] }
  0x29   : > { %4636 = vmatprep.mubr.msk.bf16.mxu0 %vm523_vm1, %v1819_v50  ;;  %v1839_v63 = vshrl.u32 %v5437_v49, 16  ;;  %v1842_v0 = vshll.u32 %v5437_v49, 16  ;;  %v429_v5 = vrot.slane %v427_v60, 1  ;;  %v431_v10 = vshrl.u32 %v5431_v43, 16  ;;  %v5175_v50 = vld [vmem:[%s6231_s1 + $0x8] sm:$0xff]  }
  0x2a   : > { %v422_v1 = vsel %vm362_vm0, %v417_v53, %v421_v57  ;;  %v1836_v2 = vor.u32 %v1835_v59, %v1832_v58  ;;  %v435_v12 = vshll.u32 %v5443_v55, 16  ;;  %v425_v13 = vor.u32 %v423_v54, %v421_v57  ;;  %v5493_v57 = vld [vmem:[%s5319_s29 + $0x60] sm:$0xff]   ;;  %4506 = vmatprep.subr.bf16.mxu1 %v5175_v50  ;;  %v5497_v60 = vld [vmem:[%s5319_s29 + $0x68] sm:$0xff]  }
  0x2b   : > { %v1841_v6 = vrot.slane %v1839_v63, 1  ;;  %v1848_v14 = vshrl.u32 %v5452_v3, 16  ;;  %v1851_v19 = vshll.u32 %v5452_v3, 16  ;;  %v1828_v22 = vsel %vm1766_vm2, %v1818_v39, %v1827_v62  ;;  %v5480_v39 = vld [vmem:[%s6231_s1 + $0x60] sm:$0xff]   ;;  %4507 = vmatpush3.bf16.msra.mxu1 %v5175_v50 }
  0x2c   : > { %v1844_v23 = vrot.slane %v1842_v0, 2  ;;  %v433_v24 = vor.u32 %v431_v10, %v429_v5  ;;  %v437_v25 = vrot.slane %v435_v12, 1  ;;  %v1837_v27 = vsel %vm1766_vm2, %v1827_v62, %v1836_v2  ;;  %4704 = vmatprep.subr.bf16.mxu0 %v5480_v39 }
  0x2d   : > { %4477 = vmatmul.mubr.msk.bf16.gmra.mrb[8].mxu1 %vm523_vm1, %v414_v52  ;;  %v1850_v28 = vrot.slane %v1848_v14, 1  ;;  %v1853_v4 = vrot.slane %v1851_v19, 2  ;;  %v443_v29 = vshll.u32 %v5461_v20, 16  ;;  %v1857_v30 = vshrl.u32 %v5464_v21, 16 }
  0x2e   : > { %4480 = vmatprep.mubr.msk.bf16.mxu1 %vm523_vm1, %v422_v1  ;;  %v1860_v34 = vshll.u32 %v5464_v21, 16  ;;  %v430_v36 = vsel %vm362_vm0, %v425_v13, %v429_v5  ;;  %v439_v37 = vshrl.u32 %v5443_v55, 16  ;;  %v1845_v40 = vor.u32 %v1844_v23, %v1841_v6  ;;  %v5515_v23 = vld [vmem:[%s5319_s29 + $0x70] sm:$0xff]  }
  0x2f   : > { %v438_v41 = vsel %vm362_vm0, %v433_v24, %v437_v25  ;;  %v447_v42 = vshrl.u32 %v5461_v20, 16  ;;  %v451_v44 = vshll.u32 %v5472_v35, 16  ;;  %v1854_v48 = vor.u32 %v1853_v4, %v1850_v28 }
  0x30   : > { %4637 = vmatmul.mubr.msk.bf16.gmra.mrb[8].mxu0 %vm523_vm1, %v1828_v22  ;;  %v445_v52 = vrot.slane %v443_v29, 1  ;;  %v1859_v53 = vrot.slane %v1857_v30, 1  ;;  %v1862_v54 = vrot.slane %v1860_v34, 2  ;;  %v441_v58 = vor.u32 %v439_v37, %v437_v25  ;;  %v5519_v25 = vld [vmem:[%s5319_s29 + $0x78] sm:$0xff]  }
  0x31   : > { %4640 = vmatprep.mubr.msk.bf16.mxu0 %vm523_vm1, %v1837_v27  ;;  %v453_v59 = vrot.slane %v451_v44, 1  ;;  %v1846_v62 = vsel %vm1766_vm2, %v1836_v2, %v1845_v40  ;;  %v1855_v0 = vsel %vm1766_vm2, %v1845_v40, %v1854_v48  ;;  %v4167_v1 = vcombine.low %v2216_v47, %v5337_v11 }
  0x32   : > { %v449_v63 = vor.u32 %v447_v42, %v445_v52  ;;  %v459_v5 = vshll.u32 %v5493_v57, 16  ;;  %v446_v6 = vsel %vm362_vm0, %v441_v58, %v445_v52  ;;  %v455_v10 = vshrl.u32 %v5472_v35, 16 }
  0x33   : > { %v5507_v12 = vor.u32 %v1862_v54, %v1859_v53  ;;  %v463_v13 = vshrl.u32 %v5493_v57, 16  ;;  %v467_v14 = vshll.u32 %v5497_v60, 16  ;;  %v2226_v11 = vrot.slane %v4167_v1, 2  ;;  %v5547_v54 = vld [vmem:[%s5319_s29 + $0x88] sm:$0xff]  }
  0x34   : > { %v454_v2 = vsel %vm362_vm0, %v449_v63, %v453_v59  ;;  %v2227_v19 = vrot.slane %v5344_v16, 2  ;;  %v461_v22 = vrot.slane %v459_v5, 1  ;;  %v457_v24 = vor.u32 %v455_v10, %v453_v59  ;;  %v5526_v16 = vld [vmem:[%s6231_s1 + $0x20] sm:$0xff]  }
  0x35   : > { %4481 = vmatmul.mubr.msk.bf16.gmra.mrb[12].mxu1 %vm523_vm1, %v430_v36  ;;  %v1864_v27 = vsel %vm1766_vm2, %v1854_v48, %v5507_v12  ;;  %v469_v4 = vrot.slane %v467_v14, 1  ;;  %v475_v30 = vshll.u32 %v5515_v23, 16  ;;  %4544 = vmatprep.subr.bf16.mxu1 %v5526_v16  ;;  %v2229_v36 = vrot.slane %v5358_v26, 2  ;;  %v5542_v48 = vld [vmem:[%s5319_s29 + $0x80] sm:$0xff]  }
  0x36   : > { %4484 = vmatprep.mubr.msk.bf16.mxu1 %vm523_vm1, %v438_v41  ;;  %v465_v28 = vor.u32 %v463_v13, %v461_v22  ;;  %v2228_v29 = vsel %vm2225_vm3, %v2226_v11, %v2227_v19  ;;  %v462_v34 = vsel %vm362_vm0, %v457_v24, %v461_v22  ;;  %v471_v37 = vshrl.u32 %v5497_v60, 16 }
  0x37   : > { %v479_v41 = vshrl.u32 %v5515_v23, 16  ;;  %v483_v42 = vshll.u32 %v5519_v25, 16  ;;  %v2231_v44 = vrot.slane %v5364_v32, 2  ;;  %v477_v47 = vrot.slane %v475_v30, 1  ;;  %v5182_v32 = vld [vmem:[%s6231_s1 + $0x68] sm:$0xff]  }
  0x38   : > { %4641 = vmatmul.mubr.msk.bf16.gmra.mrb[12].mxu0 %vm523_vm1, %v1846_v62  ;;  %v470_v40 = vsel %vm362_vm0, %v465_v28, %v469_v4  ;;  %v473_v26 = vor.u32 %v471_v37, %v469_v4  ;;  %v2230_v50 = vsel %vm2225_vm3, %v2227_v19, %v2229_v36  ;;  %v491_v59 = vshll.u32 %v5542_v48, 16 }
  0x39   : > { %4644 = vmatprep.mubr.msk.bf16.mxu0 %vm523_vm1, %v1855_v0  ;;  %v481_v52 = vor.u32 %v479_v41, %v477_v47  ;;  %v485_v53 = vrot.slane %v483_v42, 1  ;;  %v2232_v58 = vsel %vm2225_vm3, %v2229_v36, %v2231_v44  ;;  %v2233_v63 = vrot.slane %v5377_v46, 2  ;;  %v5570_v46 = vld [vmem:[%s6231_s1 + $0x70] sm:$0xff]  }
  0x3a   : > { %v478_v62 = vsel %vm362_vm0, %v473_v26, %v477_v47  ;;  %v487_v0 = vshrl.u32 %v5519_v25, 16  ;;  %v495_v5 = vshrl.u32 %v5542_v48, 16  ;;  %v2235_v10 = vrot.slane %v5389_v56, 2  ;;  %v5616_v26 = vld [vmem:[%s5319_s29 + $0x68] sm:$0xff]  }
  0x3b   : > { %v486_v1 = vsel %vm362_vm0, %v481_v52, %v485_v53  ;;  %v2234_v14 = vsel %vm2225_vm3, %v2231_v44, %v2233_v63  ;;  %v503_v24 = vshrl.u32 %v5547_v54, 16  ;;  %v2237_v28 = vrot.slane %v5406_v15, 2  ;;  %v5600_v44 = vld [vmem:[%s5319_s29 + $0x60] sm:$0xff]   ;;  %v5625_v52 = vld [vmem:[%s5319_s29 + $0x70] sm:$0xff]  }
  0x3c   : > { %v489_v13 = vor.u32 %v487_v0, %v485_v53  ;;  %v2236_v56 = vsel %vm2225_vm3, %v2233_v63, %v2235_v10  ;;  %v2241_v15 = vrot.slane %v5437_v49, 2  ;;  %v2245_v49 = vrot.slane %v5464_v21, 2  ;;  %v5621_v21 = vld [vmem:[%s6231_s1 + $0x30] sm:$0xff]  }
  0x3d   : > { %4485 = vmatmul.mubr.msk.bf16.gmra.mrb[16].mxu1 %vm523_vm1, %v446_v6  ;;  %v499_v6 = vshll.u32 %v5547_v54, 16  ;;  %v2238_v36 = vsel %vm2225_vm3, %v2235_v10, %v2237_v28  ;;  %v2247_v47 = vrot.slane %v5600_v44, 2  ;;  %v2251_v53 = vrot.slane %v5625_v52, 2  ;;  %v5658_v10 = vld [vmem:[%s5319_s29 + $0x90] sm:$0xff]  }
  0x3e   : > { %4488 = vmatprep.mubr.msk.bf16.mxu1 %vm523_vm1, %v454_v2  ;;  %v5565_v2 = vld [vmem:[%s5319_s29 + $0x90] ss:$0 sps:$4 sm:$0x11]  }
  0x3f   : > { %v501_v19 = vrot.slane %v499_v6, 1 }
  0x40   : > { %4645 = vmatmul.mubr.msk.bf16.gmra.mrb[16].mxu0 %vm523_vm1, %v1864_v27  ;;  %v507_v27 = vshll.u32 %v5565_v2, 16 }
  0x41   : > { %4668 = vmatprep.mubr.msk.bf16.mxu0 %vm523_vm1, %v2228_v29  ;;  %v2239_v29 = vrot.slane %v5426_v38, 2  ;;  %v505_v30 = vor.u32 %v503_v24, %v501_v19  ;;  %v2243_v38 = vrot.slane %v5452_v3, 2  ;;  %v5196_v3 = vld [vmem:[%s6231_s1 + $0x28] sm:$0xff]  }
  0x43   : > { %v2240_v37 = vsel %vm2225_vm3, %v2237_v28, %v2239_v29  ;;  %v2242_v41 = vsel %vm2225_vm3, %v2239_v29, %v2241_v15  ;;  %v2244_v42 = vsel %vm2225_vm3, %v2241_v15, %v2243_v38 }
  0x45   : > { %4489 = vmatmul.mubr.msk.bf16.gmra.mrb[20].mxu1 %vm523_vm1, %v462_v34  ;;  %v509_v34 = vrot.slane %v507_v27, 1  ;;  %v5681_v27 = vld [vmem:[%s5319_s29 + $0x18] sm:$0xff]  }
  0x46   : > { %4492 = vmatprep.mubr.msk.bf16.mxu1 %vm523_vm1, %v470_v40  ;;  %v2678_v29 = vrot.slane %v5681_v27, 2 }
  0x47   : > { %v510_v40 = vsel %vm362_vm0, %v505_v30, %v509_v34  ;;  %v5694_v34 = vld [vmem:[%s5319_s29 + $0x20] sm:$0xff]  }
  0x48   : > { %4669 = vmatmul.mubr.msk.bf16.vlgmr.msra.gmra.mrb[0].mxu0 %vm523_vm1, %v2230_v50  ;;  %v2248_v50 = vsel %vm2225_vm3, %v2245_v49, %v2247_v47 }
  0x49   : > { %4705 = vmatpush3.bf16.msra.mxu0 %v5480_v39  ;;  %4672 = vmatprep.mubr.msk.bf16.mxu0 %vm523_vm1, %v2232_v58  ;;  %v493_v39 = vrot.slane %v491_v59, 1 }
  0x4a   : > { %4706 = vmatprep.subr.bf16.mxu0 %v5182_v32 }
  0x4b   : > { %v497_v11 = vor.u32 %v495_v5, %v493_v39  ;;  %v494_v22 = vsel %vm362_vm0, %v489_v13, %v493_v39  ;;  %v5654_v5 = vld [vmem:[%s5319_s29 + $0x88] sm:$0xff]   ;;  %v2259_v13 = vrot.slane %v5658_v10, 2 }
  0x4c   : > { %v2257_v39 = vrot.slane %v5654_v5, 2 }
  0x4d   : > { %4493 = vmatmul.mubr.msk.bf16.gmra.mrb[24].mxu1 %vm523_vm1, %v478_v62  ;;  %4707 = vmatpush3.bf16.msra.mxu0 %v5182_v32  ;;  %v502_v4 = vsel %vm362_vm0, %v497_v11, %v501_v19  ;;  %v5638_v32 = vld [vmem:[%s5319_s29 + $0x78] sm:$0xff]   ;;  %v5642_v62 = vld [vmem:[%s5319_s29 + $0x80] sm:$0xff]   ;;  %v5668_v11 = vld [vmem:[%s5319_s29 + $0x14] sm:$0xf] }
  0x4e   : > { %4496 = vmatprep.mubr.msk.bf16.mxu1 %vm523_vm1, %v486_v1  ;;  %4744 = vmatprep.subr.bf16.mxu0 %v5570_v46  ;;  %v2253_v63 = vrot.slane %v5638_v32, 2  ;;  %v2255_v0 = vrot.slane %v5642_v62, 2 }
  0x50   : > { %4673 = vmatmul.mubr.msk.bf16.gmra.mrb[4].mxu0 %vm523_vm1, %v2234_v14  ;;  %v2254_v1 = vsel %vm2225_vm3, %v2251_v53, %v2253_v63  ;;  %v2256_v6 = vsel %vm2225_vm3, %v2253_v63, %v2255_v0  ;;  %v2542_v14 = vld [vmem:[%s5319_s29 + $0x10] sm:$0xc]  ;;  %v2258_v19 = vsel %vm2225_vm3, %v2255_v0, %v2257_v39 }
  0x51   : > { %4676 = vmatprep.mubr.msk.bf16.mxu0 %vm523_vm1, %v2236_v56  ;;  %v5674_v56 = vld [vmem:[%s5319_s29 + $0x98] ss:$0 sps:$4 sm:$0x33]   ;;  %v5678_v24 = vcombine.low %v2542_v14, %v5668_v11  ;;  %v991_v14 = vrot.slane %v5332_v9, 1 }
  0x52   : > { %v2261_v28 = vrot.slane %v5674_v56, 2 }
  0x54   : > { %v2262_v30 = vsel %vm2225_vm3, %v2259_v13, %v2261_v28 }
  0x55   : > { %4497 = vmatmul.mubr.msk.bf16.gmra.mrb[28].mxu1 %vm523_vm1, %v494_v22  ;;  %v2260_v22 = vsel %vm2225_vm3, %v2257_v39, %v2259_v13  ;;  %v5754_v39 = vld [vmem:[%s5319_s29 + $0x50] sm:$0xff]  }
  0x56   : > { %4500 = vmatprep.mubr.msk.bf16.mxu1 %vm523_vm1, %v502_v4  ;;  %v2677_v4 = vrot.slane %v5678_v24, 2 }
  0x58   : > { %4677 = vmatmul.mubr.msk.bf16.gmra.mrb[8].mxu0 %vm523_vm1, %v2238_v36  ;;  %v2679_v36 = vsel %vm2225_vm3, %v2677_v4, %v2678_v29 }
  0x59   : > { %4680 = vmatprep.mubr.msk.bf16.mxu0 %vm523_vm1, %v2240_v37  ;;  %v5698_v37 = vld [vmem:[%s5319_s29 + $0x28] sm:$0xff]  }
  0x5a   : > { %v2682_v15 = vrot.slane %v5698_v37, 2 }
  0x5d   : > { %4501 = vmatmul.mubr.msk.bf16.gmra.mrb[32].mxu1 %vm523_vm1, %v510_v40  ;;  %v2680_v40 = vrot.slane %v5694_v34, 2 }
  0x5e   : > { %4508 = vmatprep.mubr.msk.bf16.mxu1 %vm523_vm1, %v5329_v8  ;;  %v2246_v8 = vsel %vm2225_vm3, %v2243_v38, %v2245_v49  ;;  %v5714_v49 = vld [vmem:[%s5319_s29 + $0x38] sm:$0xff]  }
  0x5f   : > { %v2681_v38 = vsel %vm2225_vm3, %v2678_v29, %v2680_v40 }
  0x60   : > { %4681 = vmatmul.mubr.msk.bf16.gmra.mrb[12].mxu0 %vm523_vm1, %v2242_v41  ;;  %v5710_v41 = vld [vmem:[%s5319_s29 + $0x30] sm:$0xff]  }
  0x61   : > { %4684 = vmatprep.mubr.msk.bf16.mxu0 %vm523_vm1, %v2244_v42  ;;  %v2683_v42 = vsel %vm2225_vm3, %v2680_v40, %v2682_v15 }
  0x65   : > { %4509 = vmatmul.mubr.msk.bf16.vlgmr.msra.gmra.mrb[0].mxu1 %vm523_vm1, %v5332_v9  ;;  %v993_v9 = vrot.slane %v5347_v17, 1 }
  0x66   : > { %4512 = vmatprep.mubr.msk.bf16.mxu1 %vm523_vm1, %v5347_v17  ;;  %4545 = vmatpush3.bf16.msra.mxu1 %v5526_v16  ;;  %v2249_v16 = vrot.slane %v5616_v26, 2 }
  0x67   : > { %4546 = vmatprep.subr.bf16.mxu1 %v5196_v3 }
  0x68   : > { %4685 = vmatmul.mubr.msk.bf16.gmra.mrb[16].mxu0 %vm523_vm1, %v2246_v8  ;;  %v2250_v58 = vsel %vm2225_vm3, %v2247_v47, %v2249_v16  ;;  %v2252_v59 = vsel %vm2225_vm3, %v2249_v16, %v2251_v53  ;;  %v2684_v47 = vrot.slane %v5710_v41, 2  ;;  %v2686_v8 = vrot.slane %v5714_v49, 2  ;;  %v5735_v16 = vld [vmem:[%s5319_s29 + $0x40] sm:$0xff]  }
  0x69   : > { %4688 = vmatprep.mubr.msk.bf16.mxu0 %vm523_vm1, %v2248_v50  ;;  %v5727_v50 = vld [vmem:[%s6231_s1 + $0x80] sm:$0xff]   ;;  %v2688_v63 = vrot.slane %v5735_v16, 2 }
  0x6a   : > { %4547 = vmatpush3.bf16.msra.mxu1 %v5196_v3  ;;  %v5206_v3 = vld [vmem:[%s6231_s1 + $0x78] sm:$0xff]   ;;  %v2687_v53 = vsel %vm2225_vm3, %v2684_v47, %v2686_v8 }
  0x6b   : > { %4584 = vmatprep.subr.bf16.mxu1 %v5621_v21 }
  0x6d   : > { %4513 = vmatmul.mubr.msk.bf16.gmra.mrb[4].mxu1 %vm523_vm1, %v5361_v31 }
  0x6e   : > { %4516 = vmatprep.mubr.msk.bf16.mxu1 %vm523_vm1, %v5374_v45 }
  0x70   : > { %4689 = vmatmul.mubr.msk.bf16.gmra.mrb[20].mxu0 %vm523_vm1, %v2250_v58  ;;  %v5739_v58 = vld [vmem:[%s5319_s29 + $0x48] sm:$0xff]  }
  0x71   : > { %4692 = vmatprep.mubr.msk.bf16.mxu0 %vm523_vm1, %v2252_v59  ;;  %v980_v59 = vld [vmem:[%s5319_s29] sm:$0xe] }
  0x72   : > { %v4074_v0 = vcombine.low %v980_v59, %v5326_v7  ;;  %v5759_v7 = vld [vmem:[%s5319_s29 + $0x58] sm:$0xff]  }
  0x73   : > { %v2694_v4 = vrot.slane %v5759_v7, 2 }
  0x74   : > { %v990_v13 = vrot.slane %v4074_v0, 1 }
  0x75   : > { %4517 = vmatmul.mubr.msk.bf16.gmra.mrb[8].mxu1 %vm523_vm1, %v5383_v51 }
  0x76   : > { %4520 = vmatprep.mubr.msk.bf16.mxu1 %vm523_vm1, %v5394_v61  ;;  %v992_v28 = vsel %vm989_vm4, %v990_v13, %v991_v14 }
  0x78   : > { %4693 = vmatmul.mubr.msk.bf16.gmra.mrb[24].mxu0 %vm523_vm1, %v2254_v1  ;;  %v2690_v1 = vrot.slane %v5739_v58, 2 }
  0x79   : > { %4696 = vmatprep.mubr.msk.bf16.mxu0 %vm523_vm1, %v2256_v6  ;;  %v2689_v6 = vsel %vm2225_vm3, %v2686_v8, %v2688_v63 }
  0x7d   : > { %4521 = vmatmul.mubr.msk.bf16.gmra.mrb[12].mxu1 %vm523_vm1, %v5421_v33 }
  0x7e   : > { %4524 = vmatprep.mubr.msk.bf16.mxu1 %vm523_vm1, %v5431_v43 }
  0x80   : > { %4697 = vmatmul.mubr.msk.bf16.gmra.mrb[28].mxu0 %vm523_vm1, %v2258_v19  ;;  %v2691_v19 = vsel %vm2225_vm3, %v2688_v63, %v2690_v1  ;;  %v5799_v63 = vld [vmem:[%s5319_s29 + $0x78] sm:$0xff]  }
  0x81   : > { %4700 = vmatprep.mubr.msk.bf16.mxu0 %vm523_vm1, %v2260_v22  ;;  %v2692_v22 = vrot.slane %v5754_v39, 2 }
  0x83   : > { %v2693_v29 = vsel %vm2225_vm3, %v2690_v1, %v2692_v22  ;;  %v2695_v40 = vsel %vm2225_vm3, %v2692_v22, %v2694_v4  ;;  %v2702_v1 = vrot.slane %v5799_v63, 2 }
  0x85   : > { %4525 = vmatmul.mubr.msk.bf16.gmra.mrb[16].mxu1 %vm523_vm1, %v5443_v55 }
  0x86   : > { %4528 = vmatprep.mubr.msk.bf16.mxu1 %vm523_vm1, %v5461_v20 }
  0x88   : > { %4701 = vmatmul.mubr.msk.bf16.gmra.mrb[32].mxu0 %vm523_vm1, %v2262_v30  ;;  %v5772_v30 = vld [vmem:[%s5319_s29 + $0x60] sm:$0xff]  }
  0x89   : > { %4708 = vmatprep.mubr.msk.bf16.mxu0 %vm523_vm1, %v2679_v36  ;;  %v995_v36 = vrot.slane %v5361_v31, 1  ;;  %v2696_v17 = vrot.slane %v5772_v30, 2 }
  0x8b   : > { %v2697_v8 = vsel %vm2225_vm3, %v2694_v4, %v2696_v17 }
  0x8d   : > { %4529 = vmatmul.mubr.msk.bf16.gmra.mrb[20].mxu1 %vm523_vm1, %v5472_v35 }
  0x8e   : > { %4532 = vmatprep.mubr.msk.bf16.mxu1 %vm523_vm1, %v5493_v57 }
  0x90   : > { %4709 = vmatmul.mubr.msk.bf16.vlgmr.msra.gmra.mrb[0].mxu0 %vm523_vm1, %v2681_v38  ;;  %v994_v38 = vsel %vm989_vm4, %v991_v14, %v993_v9  ;;  %v5818_v14 = vld [vmem:[%s5319_s29 + $0x80] sm:$0xff]  }
  0x91   : > { %4745 = vmatpush3.bf16.msra.mxu0 %v5570_v46  ;;  %4712 = vmatprep.mubr.msk.bf16.mxu0 %vm523_vm1, %v2683_v42  ;;  %v2685_v46 = vsel %vm2225_vm3, %v2682_v15, %v2684_v47  ;;  %v5777_v15 = vld [vmem:[%s5319_s29 + $0x68] sm:$0xff]   ;;  %v996_v42 = vsel %vm989_vm4, %v993_v9, %v995_v36  ;;  %v997_v47 = vrot.slane %v5374_v45, 1 }
  0x92   : > { %4746 = vmatprep.subr.bf16.mxu0 %v5206_v3  ;;  %v2698_v31 = vrot.slane %v5777_v15, 2 }
  0x93   : > { %v998_v0 = vsel %vm989_vm4, %v995_v36, %v997_v47 }
  0x94   : > { %v2699_v59 = vsel %vm2225_vm3, %v2696_v17, %v2698_v31  ;;  %v5840_v17 = vld [vmem:[%s5319_s29 + $0x98] sm:$0xff]  }
  0x95   : > { %4533 = vmatmul.mubr.msk.bf16.gmra.mrb[24].mxu1 %vm523_vm1, %v5497_v60  ;;  %4747 = vmatpush3.bf16.msra.mxu0 %v5206_v3  ;;  %v5217_v3 = vld [vmem:[%s6231_s1 + $0x38] sm:$0xff]  }
  0x96   : > { %4536 = vmatprep.mubr.msk.bf16.mxu1 %vm523_vm1, %v5515_v23  ;;  %4784 = vmatprep.subr.bf16.mxu0 %v5727_v50 }
  0x98   : > { %4713 = vmatmul.mubr.msk.bf16.gmra.mrb[4].mxu0 %vm523_vm1, %v2685_v46  ;;  %v5794_v46 = vld [vmem:[%s5319_s29 + $0x70] sm:$0xff]  }
  0x99   : > { %4716 = vmatprep.mubr.msk.bf16.mxu0 %vm523_vm1, %v2687_v53  ;;  %v999_v53 = vrot.slane %v5383_v51, 1  ;;  %v2700_v45 = vrot.slane %v5794_v46, 2  ;;  %v5809_v51 = vld [vmem:[%s6231_s1 + $0x40] sm:$0xff]  }
  0x9b   : > { %v2701_v13 = vsel %vm2225_vm3, %v2698_v31, %v2700_v45  ;;  %v2703_v22 = vsel %vm2225_vm3, %v2700_v45, %v2702_v1 }
  0x9d   : > { %4537 = vmatmul.mubr.msk.bf16.gmra.mrb[28].mxu1 %vm523_vm1, %v5519_v25 }
  0x9e   : > { %4540 = vmatprep.mubr.msk.bf16.mxu1 %vm523_vm1, %v5542_v48 }
  0xa0   : > { %4717 = vmatmul.mubr.msk.bf16.gmra.mrb[8].mxu0 %vm523_vm1, %v2689_v6  ;;  %v1001_v6 = vrot.slane %v5394_v61, 1  ;;  %v2704_v61 = vrot.slane %v5818_v14, 2 }
  0xa1   : > { %4720 = vmatprep.mubr.msk.bf16.mxu0 %vm523_vm1, %v2691_v19  ;;  %v1003_v19 = vrot.slane %v5421_v33, 1  ;;  %v1005_v33 = vrot.slane %v5431_v43, 1 }
  0xa2   : > { %v1002_v4 = vsel %vm989_vm4, %v999_v53, %v1001_v6  ;;  %v2705_v36 = vsel %vm2225_vm3, %v2702_v1, %v2704_v61  ;;  %v5215_v1 = vld [vmem:[%s5319_s29 + $0xa0] ss:$0 sps:$4 sm:$0x33]  }
  0xa3   : > { %v1004_v9 = vsel %vm989_vm4, %v1001_v6, %v1003_v19  ;;  %v1011_v6 = vrot.slane %v5472_v35, 1  ;;  %v3030_v35 = vshrl.u32 %v5698_v37, 16 }
  0xa5   : > { %4541 = vmatmul.mubr.msk.bf16.gmra.mrb[32].mxu1 %vm523_vm1, %v5547_v54 }
  0xa6   : > { %4548 = vmatprep.mubr.msk.bf16.mxu1 %vm523_vm1, %v992_v28  ;;  %v5823_v28 = vld [vmem:[%s5319_s29 + $0x88] sm:$0xff]  }
  0xa8   : > { %4721 = vmatmul.mubr.msk.bf16.gmra.mrb[12].mxu0 %vm523_vm1, %v2693_v29  ;;  %v2706_v29 = vrot.slane %v5823_v28, 2 }
  0xa9   : > { %4724 = vmatprep.mubr.msk.bf16.mxu0 %vm523_vm1, %v2695_v40  ;;  %v5836_v40 = vld [vmem:[%s5319_s29 + $0x90] sm:$0xff]  }
  0xaa   : > { %v2708_v31 = vrot.slane %v5836_v40, 2 }
  0xac   : > { %v2709_v45 = vsel %vm2225_vm3, %v2706_v29, %v2708_v31 }
  0xad   : > { %4549 = vmatmul.mubr.msk.bf16.vlgmr.msra.gmra.mrb[0].mxu1 %vm523_vm1, %v994_v38  ;;  %v1007_v38 = vrot.slane %v5443_v55, 1  ;;  %v3007_v55 = vshll.u32 %v5678_v24, 16 }
  0xae   : > { %4552 = vmatprep.mubr.msk.bf16.mxu1 %vm523_vm1, %v996_v42  ;;  %4585 = vmatpush3.bf16.msra.mxu1 %v5621_v21  ;;  %v1000_v21 = vsel %vm989_vm4, %v997_v47, %v999_v53  ;;  %v2707_v42 = vsel %vm2225_vm3, %v2704_v61, %v2706_v29  ;;  %v2710_v47 = vrot.slane %v5840_v17, 2  ;;  %v3012_v53 = vshrl.u32 %v5681_v27, 16 }
  0xaf   : > { %4586 = vmatprep.subr.bf16.mxu1 %v5217_v3  ;;  %v1008_v43 = vsel %vm989_vm4, %v1005_v33, %v1007_v38  ;;  %v2712_v61 = vrot.slane %v5215_v1, 2  ;;  %v3024_v29 = vshll.u32 %v5694_v34, 16 }
  0xb0   : > { %4725 = vmatmul.mubr.msk.bf16.gmra.mrb[16].mxu0 %vm523_vm1, %v2697_v8  ;;  %v3004_v8 = vshrl.u32 %v5678_v24, 16  ;;  %v3014_v24 = vrot.slane %v3012_v53, 2  ;;  %v3032_v53 = vrot.slane %v3030_v35, 2  ;;  %v3060_v35 = vshll.u32 %v5735_v16, 16 }
  0xb1   : > { %4728 = vmatprep.mubr.msk.bf16.mxu0 %vm523_vm1, %v2699_v59  ;;  %v3015_v59 = vshll.u32 %v5681_v27, 16 }
  0xb2   : > { %4587 = vmatpush3.bf16.msra.mxu1 %v5217_v3  ;;  %v1006_v3 = vsel %vm989_vm4, %v1003_v19, %v1005_v33  ;;  %v3009_v19 = vrot.slane %v3007_v55, 3 }
  0xb3   : > { %4824 = vmatprep.subr.bf16.mxu1 %v5809_v51 }
  0xb5   : > { %4553 = vmatmul.mubr.msk.bf16.gmra.mrb[4].mxu1 %vm523_vm1, %v998_v0  ;;  %v1009_v0 = vrot.slane %v5461_v20, 1 }
  0xb6   : > { %4556 = vmatprep.mubr.msk.bf16.mxu1 %vm523_vm1, %v1000_v21  ;;  %v2711_v21 = vsel %vm2225_vm3, %v2708_v31, %v2710_v47 }
  0xb7   : > { %v1012_v20 = vsel %vm989_vm4, %v1009_v0, %v1011_v6 }
  0xb8   : > { %4729 = vmatmul.mubr.msk.bf16.gmra.mrb[20].mxu0 %vm523_vm1, %v2701_v13  ;;  %v3006_v13 = vrot.slane %v3004_v8, 2  ;;  %v1015_v8 = vrot.slane %v5497_v60, 1  ;;  %v3048_v60 = vshrl.u32 %v5714_v49, 16 }
  0xb9   : > { %4732 = vmatprep.mubr.msk.bf16.mxu0 %vm523_vm1, %v2703_v22  ;;  %v3017_v22 = vrot.slane %v3015_v59, 3 }
  0xba   : > { %v3010_v33 = vor.u32 %v3009_v19, %v3006_v13  ;;  %v3051_v13 = vshll.u32 %v5714_v49, 16 }
  0xbd   : > { %4557 = vmatmul.mubr.msk.bf16.gmra.mrb[8].mxu1 %vm523_vm1, %v1002_v4  ;;  %v1010_v4 = vsel %vm989_vm4, %v1007_v38, %v1009_v0  ;;  %v1013_v38 = vrot.slane %v5493_v57, 1  ;;  %v3039_v57 = vshrl.u32 %v5710_v41, 16 }
  0xbe   : > { %4560 = vmatprep.mubr.msk.bf16.mxu1 %vm523_vm1, %v1004_v9  ;;  %v3021_v9 = vshrl.u32 %v5694_v34, 16 }
  0xbf   : > { %v1014_v0 = vsel %vm989_vm4, %v1011_v6, %v1013_v38  ;;  %v1017_v6 = vrot.slane %v5515_v23, 1 }
  0xc0   : > { %4733 = vmatmul.mubr.msk.bf16.gmra.mrb[24].mxu0 %vm523_vm1, %v2705_v36  ;;  %v3018_v36 = vor.u32 %v3017_v22, %v3014_v24  ;;  %v3023_v31 = vrot.slane %v3021_v9, 2  ;;  %v3041_v24 = vrot.slane %v3039_v57, 2  ;;  %v3053_v9 = vrot.slane %v3051_v13, 3 }
  0xc1   : > { %4736 = vmatprep.mubr.msk.bf16.mxu0 %vm523_vm1, %v2707_v42  ;;  %v3033_v42 = vshll.u32 %v5698_v37, 16  ;;  %v3075_v57 = vshrl.u32 %v5754_v39, 16  ;;  %v1025_v13 = vrot.slane %v5565_v2, 1 }
  0xc2   : > { %v3019_v55 = vsel %vm3002_vm5, %v3010_v33, %v3018_v36  ;;  %v1018_v33 = vsel %vm989_vm4, %v1015_v8, %v1017_v6 }
  0xc3   : > { %v3035_v59 = vrot.slane %v3033_v42, 3 }
  0xc5   : > { %4561 = vmatmul.mubr.msk.bf16.gmra.mrb[12].mxu1 %vm523_vm1, %v1006_v3  ;;  %v2713_v3 = vsel %vm2225_vm3, %v2710_v47, %v2712_v61  ;;  %v3042_v47 = vshll.u32 %v5710_v41, 16  ;;  %v3036_v1 = vor.u32 %v3035_v59, %v3032_v53 }
  0xc6   : > { %4564 = vmatprep.mubr.msk.bf16.mxu1 %vm523_vm1, %v1008_v43  ;;  %v3026_v43 = vrot.slane %v3024_v29, 3  ;;  %v5218_v29 = vld [vmem:[%s6231_s1 + $0x88] sm:$0xff]  }
  0xc7   : > { %v3044_v22 = vrot.slane %v3042_v47, 3  ;;  %v3078_v47 = vshll.u32 %v5754_v39, 16 }
  0xc8   : > { %4737 = vmatmul.mubr.msk.bf16.gmra.mrb[28].mxu0 %vm523_vm1, %v2709_v45  ;;  %v3027_v45 = vor.u32 %v3026_v43, %v3023_v31 }
  0xc9   : > { %4740 = vmatprep.mubr.msk.bf16.mxu0 %vm523_vm1, %v2711_v21  ;;  %v1016_v21 = vsel %vm989_vm4, %v1013_v38, %v1015_v8  ;;  %v3045_v23 = vor.u32 %v3044_v22, %v3041_v24  ;;  %v3066_v38 = vshrl.u32 %v5739_v58, 16  ;;  %v3062_v8 = vrot.slane %v3060_v35, 3 }
  0xca   : > { %v3028_v19 = vsel %vm3002_vm5, %v3018_v36, %v3027_v45  ;;  %v3037_v61 = vsel %vm3002_vm5, %v3027_v45, %v3036_v1  ;;  %v3077_v24 = vrot.slane %v3075_v57, 2  ;;  %v3080_v22 = vrot.slane %v3078_v47, 3 }
  0xcb   : > { %v3046_v31 = vsel %vm3002_vm5, %v3036_v1, %v3045_v23  ;;  %v3068_v59 = vrot.slane %v3066_v38, 2  ;;  %v3084_v1 = vshrl.u32 %v5759_v7, 16  ;;  %v3102_v35 = vshrl.u32 %v5777_v15, 16  ;;  %v5224_v38 = vld [vmem:[%s5319_s29 + $0x18] sm:$0xff]  }
  0xcc   : > { %v3081_v2 = vor.u32 %v3080_v22, %v3077_v24  ;;  %v3111_v57 = vshrl.u32 %v5794_v46, 16  ;;  %v3114_v47 = vshll.u32 %v5794_v46, 16 }
  0xcd   : > { %4565 = vmatmul.mubr.msk.bf16.gmra.mrb[16].mxu1 %vm523_vm1, %v1010_v4  ;;  %v1019_v4 = vrot.slane %v5519_v25, 1  ;;  %v3057_v25 = vshrl.u32 %v5735_v16, 16 }
  0xce   : > { %4568 = vmatprep.mubr.msk.bf16.mxu1 %vm523_vm1, %v1012_v20  ;;  %v3050_v20 = vrot.slane %v3048_v60, 2  ;;  %v3087_v60 = vshll.u32 %v5759_v7, 16  ;;  %v3113_v24 = vrot.slane %v3111_v57, 2  ;;  %v3116_v22 = vrot.slane %v3114_v47, 3 }
  0xcf   : > { %v1020_v36 = vsel %vm989_vm4, %v1017_v6, %v1019_v4  ;;  %v3059_v43 = vrot.slane %v3057_v25, 2  ;;  %v1441_v6 = vrot.slane %v5350_v18, 1  ;;  %v3147_v57 = vshrl.u32 %v5836_v40, 16 }
  0xd0   : > { %4741 = vmatmul.mubr.msk.bf16.gmra.mrb[32].mxu0 %vm523_vm1, %v2713_v3  ;;  %v3054_v42 = vor.u32 %v3053_v9, %v3050_v20  ;;  %v3069_v3 = vshll.u32 %v5739_v58, 16  ;;  %v3086_v9 = vrot.slane %v3084_v1, 2  ;;  %v3120_v1 = vshrl.u32 %v5799_v63, 16 }
  0xd1   : > { %4748 = vmatprep.mubr.msk.bf16.mxu0 %vm523_vm1, %v3019_v55  ;;  %v1023_v55 = vrot.slane %v5547_v54, 1  ;;  %v3150_v47 = vshll.u32 %v5836_v40, 16 }
  0xd2   : > { %v3055_v53 = vsel %vm3002_vm5, %v3045_v23, %v3054_v42  ;;  %v3093_v23 = vshrl.u32 %v5772_v30, 16 }
  0xd5   : > { %4569 = vmatmul.mubr.msk.bf16.gmra.mrb[20].mxu1 %vm523_vm1, %v1014_v0  ;;  %v3071_v0 = vrot.slane %v3069_v3, 3  ;;  %v1444_v3 = vrot.slane %v5224_v38, 1  ;;  %v5229_v38 = vld [vmem:[%s5319_s29 + $0x38] sm:$0xff]  }
  0xd6   : > { %4572 = vmatprep.mubr.msk.bf16.mxu1 %vm523_vm1, %v1016_v21  ;;  %v3063_v21 = vor.u32 %v3062_v8, %v3059_v43  ;;  %v5225_v8 = vld [vmem:[%s5319_s29 + $0x20] sm:$0xff]  }
  0xd7   : > { %v3072_v54 = vor.u32 %v3071_v0, %v3068_v59  ;;  %v3104_v59 = vrot.slane %v3102_v35, 2  ;;  %v3138_v35 = vshrl.u32 %v5823_v28, 16 }
  0xd8   : > { %4749 = vmatmul.mubr.msk.bf16.vlgmr.msra.gmra.mrb[0].mxu0 %vm523_vm1, %v3028_v19  ;;  %v3064_v19 = vsel %vm3002_vm5, %v3054_v42, %v3063_v21  ;;  %v3105_v42 = vshll.u32 %v5777_v15, 16 }
  0xd9   : > { %4785 = vmatpush3.bf16.msra.mxu0 %v5727_v50  ;;  %4752 = vmatprep.mubr.msk.bf16.mxu0 %vm523_vm1, %v3037_v61  ;;  %v1021_v50 = vrot.slane %v5542_v48, 1  ;;  %v3073_v20 = vsel %vm3002_vm5, %v3063_v21, %v3072_v54 }
  0xda   : > { %4786 = vmatprep.subr.bf16.mxu0 %v5218_v29  ;;  %v3107_v0 = vrot.slane %v3105_v42, 3  ;;  %v3141_v42 = vshll.u32 %v5823_v28, 16 }
  0xdb   : > { %v1022_v45 = vsel %vm989_vm4, %v1019_v4, %v1021_v50  ;;  %v1024_v48 = vsel %vm989_vm4, %v1021_v50, %v1023_v55  ;;  %v5223_v4 = vld [vmem:[%s5319_s29 + $0x10] sm:$0xff]   ;;  %v3082_v50 = vsel %vm3002_vm5, %v3072_v54, %v3081_v2 }
  0xdc   : > { %v1442_v61 = vrot.slane %v5223_v4, 1  ;;  %v3108_v54 = vor.u32 %v3107_v0, %v3104_v59  ;;  %v5227_v4 = vld [vmem:[%s5319_s29 + $0x30] sm:$0xff]   ;;  %v3140_v59 = vrot.slane %v3138_v35, 2  ;;  %v3143_v0 = vrot.slane %v3141_v42, 3  ;;  %v5233_v42 = vld [vmem:[%s5319_s29 + $0x58] sm:$0xff]  }
  0xdd   : > { %4573 = vmatmul.mubr.msk.bf16.gmra.mrb[24].mxu1 %vm523_vm1, %v1018_v33  ;;  %4787 = vmatpush3.bf16.msra.mxu0 %v5218_v29  ;;  %v3089_v29 = vrot.slane %v3087_v60, 3  ;;  %v1026_v33 = vsel %vm989_vm4, %v1023_v55, %v1025_v13  ;;  %v1446_v55 = vrot.slane %v5225_v8, 1  ;;  %v3123_v60 = vshll.u32 %v5799_v63, 16  ;;  %v5226_v13 = vld [vmem:[%s5319_s29 + $0x28] sm:$0xff]   ;;  %v5230_v8 = vld [vmem:[%s5319_s29 + $0x40] sm:$0xff]  }
  0xde   : > { %4576 = vmatprep.mubr.msk.bf16.mxu1 %vm523_vm1, %v1020_v36  ;;  %v1443_v18 = vsel %vm989_vm4, %v1441_v6, %v1442_v61  ;;  %v3096_v36 = vshll.u32 %v5772_v30, 16  ;;  %v1448_v6 = vrot.slane %v5226_v13, 1  ;;  %v5231_v13 = vld [vmem:[%s5319_s29 + $0x48] sm:$0xff]   ;;  %v3452_v35 = vld [vmem:[%s5319_s29 + $0x10] sm:$0x8] }
  0xdf   : > { %v3090_v25 = vor.u32 %v3089_v29, %v3086_v9  ;;  %v3122_v29 = vrot.slane %v3120_v1, 2  ;;  %v3156_v1 = vshrl.u32 %v5840_v17, 16 }
  0xe0   : > { %4753 = vmatmul.mubr.msk.bf16.gmra.mrb[4].mxu0 %vm523_vm1, %v3046_v31  ;;  %v3095_v31 = vrot.slane %v3093_v23, 2  ;;  %v3098_v43 = vrot.slane %v3096_v36, 3  ;;  %v3129_v23 = vshrl.u32 %v5818_v14, 16  ;;  %v3132_v36 = vshll.u32 %v5818_v14, 16 }
  0xe1   : > { %4756 = vmatprep.mubr.msk.bf16.mxu0 %vm523_vm1, %v3055_v53  ;;  %v3091_v53 = vsel %vm3002_vm5, %v3081_v2, %v3090_v25  ;;  %v3117_v2 = vor.u32 %v3116_v22, %v3113_v24  ;;  %v3149_v24 = vrot.slane %v3147_v57, 2  ;;  %v3152_v22 = vrot.slane %v3150_v47, 3 }
  0xe2   : > { %v3099_v21 = vor.u32 %v3098_v43, %v3095_v31  ;;  %v3131_v31 = vrot.slane %v3129_v23, 2  ;;  %v3134_v43 = vrot.slane %v3132_v36, 3  ;;  %v1466_v57 = vrot.slane %v5625_v52, 1 }
  0xe4   : > { %v3109_v9 = vsel %vm3002_vm5, %v3099_v21, %v3108_v54 }
  0xe5   : > { %4577 = vmatmul.mubr.msk.bf16.gmra.mrb[28].mxu1 %vm523_vm1, %v1022_v45  ;;  %v1445_v45 = vsel %vm989_vm4, %v1442_v61, %v1444_v3  ;;  %v1450_v61 = vrot.slane %v5227_v4, 1  ;;  %v5232_v4 = vld [vmem:[%s5319_s29 + $0x50] sm:$0xff]  }
  0xe6   : > { %4580 = vmatprep.mubr.msk.bf16.mxu1 %vm523_vm1, %v1024_v48  ;;  %v1447_v48 = vsel %vm989_vm4, %v1444_v3, %v1446_v55  ;;  %v1452_v3 = vrot.slane %v5229_v38, 1  ;;  %v1460_v38 = vrot.slane %v5233_v42, 1  ;;  %v1875_v42 = vshrl.u32 %v5616_v26, 16 }
  0xe8   : > { %4757 = vmatmul.mubr.msk.bf16.gmra.mrb[8].mxu0 %vm523_vm1, %v3064_v19  ;;  %v3100_v19 = vsel %vm3002_vm5, %v3090_v25, %v3099_v21  ;;  %v3135_v21 = vor.u32 %v3134_v43, %v3131_v31  ;;  %v1462_v43 = vrot.slane %v5600_v44, 1 }
  0xe9   : > { %4760 = vmatprep.mubr.msk.bf16.mxu0 %vm523_vm1, %v3073_v20  ;;  %v5228_v20 = vld [vmem:[%s6231_s1 + $0x48] sm:$0xff]  }
  0xed   : > { %4581 = vmatmul.mubr.msk.bf16.gmra.mrb[32].mxu1 %vm523_vm1, %v1026_v33  ;;  %v3125_v33 = vrot.slane %v3123_v60, 3  ;;  %v3159_v60 = vshll.u32 %v5840_v17, 16 }
  0xee   : > { %4588 = vmatprep.mubr.msk.bf16.mxu1 %vm523_vm1, %v1443_v18  ;;  %v1451_v18 = vsel %vm989_vm4, %v1448_v6, %v1450_v61 }
  0xef   : > { %v3126_v25 = vor.u32 %v3125_v33, %v3122_v29  ;;  %v3158_v29 = vrot.slane %v3156_v1, 2  ;;  %v3161_v33 = vrot.slane %v3159_v60, 3  ;;  %v3467_v60 = vrot.slane %v5698_v37, 3 }
  0xf0   : > { %4761 = vmatmul.mubr.msk.bf16.gmra.mrb[12].mxu0 %vm523_vm1, %v3082_v50  ;;  %v3118_v50 = vsel %vm3002_vm5, %v3108_v54, %v3117_v2  ;;  %v3144_v54 = vor.u32 %v3143_v0, %v3140_v59  ;;  %v1463_v0 = vsel %vm989_vm4, %v1460_v38, %v1462_v43  ;;  %v3469_v37 = vrot.slane %v5710_v41, 3 }
  0xf1   : > { %4764 = vmatprep.mubr.msk.bf16.mxu0 %vm523_vm1, %v3091_v53  ;;  %v3127_v53 = vsel %vm3002_vm5, %v3117_v2, %v3126_v25  ;;  %v3153_v2 = vor.u32 %v3152_v22, %v3149_v24 }
  0xf5   : > { %4589 = vmatmul.mubr.msk.bf16.vlgmr.msra.gmra.mrb[0].mxu1 %vm523_vm1, %v1445_v45  ;;  %v1453_v45 = vsel %vm989_vm4, %v1450_v61, %v1452_v3  ;;  %v1458_v61 = vrot.slane %v5232_v4, 1  ;;  %v3471_v4 = vrot.slane %v5714_v49, 3 }
  0xf6   : > { %4592 = vmatprep.mubr.msk.bf16.mxu1 %vm523_vm1, %v1447_v48  ;;  %4826 = vmatpush3.bf16.msra.mxu1 %v5809_v51  ;;  %v1449_v51 = vsel %vm989_vm4, %v1446_v55, %v1448_v6  ;;  %v1454_v55 = vrot.slane %v5230_v8, 1  ;;  %v1456_v6 = vrot.slane %v5231_v13, 1  ;;  %v1468_v13 = vrot.slane %v5638_v32, 1 }
  0xf7   : > { %4825 = vmatprep.subr.bf16.mxu1 %v5228_v20  ;;  %v3472_v41 = vsel %vm3461_vm6, %v3469_v37, %v3471_v4 }
  0xf8   : > { %4765 = vmatmul.mubr.msk.bf16.gmra.mrb[16].mxu0 %vm523_vm1, %v3100_v19  ;;  %v1455_v48 = vsel %vm989_vm4, %v1452_v3, %v1454_v55  ;;  %v3136_v19 = vsel %vm3002_vm5, %v3126_v25, %v3135_v21  ;;  %v3162_v25 = vor.u32 %v3161_v33, %v3158_v29  ;;  %v3154_v3 = vsel %vm3002_vm5, %v3144_v54, %v3153_v2 }
  0xf9   : > { %4768 = vmatprep.mubr.msk.bf16.mxu0 %vm523_vm1, %v3109_v9  ;;  %v3145_v9 = vsel %vm3002_vm5, %v3135_v21, %v3144_v54  ;;  %v3463_v21 = vrot.slane %v5681_v27, 3  ;;  %v3465_v27 = vrot.slane %v5694_v34, 3  ;;  %v1469_v34 = vsel %vm989_vm4, %v1466_v57, %v1468_v13 }
  0xfa   : > { %4827 = vmatpush3.bf16.msra.mxu1 %v5228_v20  ;;  %v5981_v20 = vld [vmem:[%s5319_s29 + $0xa0] ss:$0 sps:$4 sm:$0x77]   ;;  %v3163_v8 = vsel %vm3002_vm5, %v3153_v2, %v3162_v25  ;;  %v1474_v29 = vrot.slane %v5658_v10, 1  ;;  %v1866_v33 = vshrl.u32 %v5600_v44, 16 }
  0xfb   : > { %v3165_v23 = vshrl.u32 %v5981_v20, 16  ;;  %v3168_v36 = vshll.u32 %v5981_v20, 16  ;;  %v3468_v24 = vsel %vm3461_vm6, %v3465_v27, %v3467_v60  ;;  %v5221_v2 = vld [vmem:[%s5319_s29 + $0x98] ss:$0 sps:$4 sm:$0x11]   ;;  %s5117_s29 = smul.u32 288, %s6239_s12 }
  0xfd   : > { %4593 = vmatmul.mubr.msk.bf16.gmra.mrb[4].mxu1 %vm523_vm1, %v1449_v51  ;;  %v1457_v51 = vsel %vm989_vm4, %v1454_v55, %v1456_v6  ;;  %v3170_v31 = vrot.slane %v3168_v36, 3  ;;  %v4260_v55 = vcombine.low %v3452_v35, %v5668_v11  ;;  %v1868_v36 = vrot.slane %v1866_v33, 1  ;;  %s6140_s19 = scalar_lea.vmem %s6233_s3, %s5117_s29 }
  0xfe   : > { %4596 = vmatprep.mubr.msk.bf16.mxu1 %vm523_vm1, %v1451_v18  ;;  %v1459_v18 = vsel %vm989_vm4, %v1456_v6, %v1458_v61  ;;  %v3466_v6 = vsel %vm3461_vm6, %v3463_v21, %v3465_v27  ;;  %v3475_v35 = vrot.slane %v5739_v58, 3 }
 0x100   : > { %4769 = vmatmul.mubr.msk.bf16.gmra.mrb[20].mxu0 %vm523_vm1, %v3118_v50  ;;  %v3167_v50 = vrot.slane %v3165_v23, 2 }
 0x101   : > { %4772 = vmatprep.mubr.msk.bf16.mxu0 %vm523_vm1, %v3127_v53  ;;  %v1461_v53 = vsel %vm989_vm4, %v1458_v61, %v1460_v38  ;;  %v1472_v61 = vrot.slane %v5654_v5, 1  ;;  %v1878_v38 = vshll.u32 %v5616_v26, 16 }
 0x102   : > { %v3171_v59 = vor.u32 %v3170_v31, %v3167_v50  ;;  %v1887_v31 = vshll.u32 %v5625_v52, 16 }
 0x103   : > { %v1475_v23 = vsel %vm989_vm4, %v1472_v61, %v1474_v29 }
 0x104   : > { %v3172_v11 = vsel %vm3002_vm5, %v3162_v25, %v3171_v59 }
 0x105   : > { %4597 = vmatmul.mubr.msk.bf16.gmra.mrb[8].mxu1 %vm523_vm1, %v1453_v45  ;;  %v3462_v45 = vrot.slane %v4260_v55, 3  ;;  %v1880_v55 = vrot.slane %v1878_v38, 2 }
 0x106   : > { %4600 = vmatprep.mubr.msk.bf16.mxu1 %vm523_vm1, %v1455_v48  ;;  %v1464_v48 = vrot.slane %v5616_v26, 1 }
 0x107   : > { %v3464_v47 = vsel %vm3461_vm6, %v3462_v45, %v3463_v21  ;;  %v3479_v45 = vrot.slane %v5759_v7, 3  ;;  %v1893_v21 = vshrl.u32 %v5638_v32, 16 }
 0x108   : > { %4773 = vmatmul.mubr.msk.bf16.gmra.mrb[24].mxu0 %vm523_vm1, %v3136_v19  ;;  %v1465_v54 = vsel %vm989_vm4, %v1462_v43, %v1464_v48  ;;  %v1467_v1 = vsel %vm989_vm4, %v1464_v48, %v1466_v57  ;;  %v1470_v19 = vrot.slane %v5642_v62, 1  ;;  %v1896_v48 = vshll.u32 %v5638_v32, 16 }
 0x109   : > { %4776 = vmatprep.mubr.msk.bf16.mxu0 %vm523_vm1, %v3145_v9  ;;  %v3470_v9 = vsel %vm3461_vm6, %v3467_v60, %v3469_v37 }
 0x10a   : > { %v1471_v22 = vsel %vm989_vm4, %v1468_v13, %v1470_v19  ;;  %v1473_v49 = vsel %vm989_vm4, %v1470_v19, %v1472_v61  ;;  %v1898_v27 = vrot.slane %v1896_v48, 2  ;;  %v1911_v19 = vshrl.u32 %v5654_v5, 16 }
 0x10c   : > { %v1913_v61 = vrot.slane %v1911_v19, 1 }
 0x10d   : > { %4601 = vmatmul.mubr.msk.bf16.gmra.mrb[12].mxu1 %vm523_vm1, %v1457_v51  ;;  %v1869_v51 = vshll.u32 %v5600_v44, 16  ;;  %v1476_v44 = vrot.slane %v5221_v2, 1  ;;  %v1932_v2 = vshll.u32 %v5674_v56, 16 }
 0x10e   : > { %4604 = vmatprep.mubr.msk.bf16.mxu1 %vm523_vm1, %v1459_v18  ;;  %v3473_v18 = vrot.slane %v5735_v16, 3  ;;  %v1884_v16 = vshrl.u32 %v5625_v52, 16 }
 0x10f   : > { %v1871_v25 = vrot.slane %v1869_v51, 2  ;;  %v1477_v58 = vsel %vm989_vm4, %v1474_v29, %v1476_v44  ;;  %v3485_v29 = vrot.slane %v5794_v46, 3 }
 0x110   : > { %4777 = vmatmul.mubr.msk.bf16.gmra.mrb[28].mxu0 %vm523_vm1, %v3154_v3  ;;  %v3474_v3 = vsel %vm3461_vm6, %v3471_v4, %v3473_v18  ;;  %v3476_v43 = vsel %vm3461_vm6, %v3473_v18, %v3475_v35  ;;  %v1886_v59 = vrot.slane %v1884_v16, 1  ;;  %v3495_v16 = vrot.slane %v5840_v17, 3 }
 0x111   : > { %4780 = vmatprep.mubr.msk.bf16.mxu0 %vm523_vm1, %v3163_v8  ;;  %v1872_v50 = vor.u32 %v1871_v25, %v1868_v36  ;;  %v1877_v8 = vrot.slane %v1875_v42, 1  ;;  %v3491_v42 = vrot.slane %v5823_v28, 3 }
 0x113   : > { %v1873_v26 = vsel %vm1766_vm2, %v5507_v12, %v1872_v50  ;;  %v1881_v52 = vor.u32 %v1880_v55, %v1877_v8  ;;  %v1905_v12 = vshll.u32 %v5642_v62, 16 }
 0x115   : > { %4605 = vmatmul.mubr.msk.bf16.gmra.mrb[16].mxu1 %vm523_vm1, %v1461_v53  ;;  %v3477_v53 = vrot.slane %v5754_v39, 3  ;;  %v1902_v39 = vshrl.u32 %v5642_v62, 16  ;;  %v1882_v7 = vsel %vm1766_vm2, %v1872_v50, %v1881_v52  ;;  %v1907_v13 = vrot.slane %v1905_v12, 2 }
 0x116   : > { %4608 = vmatprep.mubr.msk.bf16.mxu1 %vm523_vm1, %v1463_v0  ;;  %v1889_v0 = vrot.slane %v1887_v31, 2 }
 0x117   : > { %v1904_v60 = vrot.slane %v1902_v39, 1 }
 0x118   : > { %4781 = vmatmul.mubr.msk.bf16.gmra.mrb[32].mxu0 %vm523_vm1, %v3172_v11  ;;  %v3478_v11 = vsel %vm3461_vm6, %v3475_v35, %v3477_v53  ;;  %v1890_v57 = vor.u32 %v1889_v0, %v1886_v59  ;;  %v3489_v35 = vrot.slane %v5818_v14, 3  ;;  %v3493_v14 = vrot.slane %v5836_v40, 3 }
 0x119   : > { %4788 = vmatprep.mubr.msk.bf16.mxu0 %vm523_vm1, %v3464_v47  ;;  %v3480_v47 = vsel %vm3461_vm6, %v3477_v53, %v3479_v45  ;;  %v1908_v37 = vor.u32 %v1907_v13, %v1904_v60 }
 0x11a   : > { %v1891_v32 = vsel %vm1766_vm2, %v1881_v52, %v1890_v57  ;;  %v3494_v28 = vsel %vm3461_vm6, %v3491_v42, %v3493_v14  ;;  %v3496_v31 = vsel %vm3461_vm6, %v3493_v14, %v3495_v16 }
 0x11d   : > { %4609 = vmatmul.mubr.msk.bf16.gmra.mrb[20].mxu1 %vm523_vm1, %v1465_v54  ;;  %v1895_v54 = vrot.slane %v1893_v21, 1 }
 0x11e   : > { %4612 = vmatprep.mubr.msk.bf16.mxu1 %vm523_vm1, %v1467_v1  ;;  %v3481_v1 = vrot.slane %v5772_v30, 3  ;;  %v1920_v30 = vshrl.u32 %v5658_v10, 16 }
 0x11f   : > { %v1899_v62 = vor.u32 %v1898_v27, %v1895_v54 }
 0x120   : > { %4789 = vmatmul.mubr.msk.bf16.vlgmr.msra.gmra.mrb[0].mxu0 %vm523_vm1, %v3466_v6  ;;  %v3483_v6 = vrot.slane %v5777_v15, 3  ;;  %v1922_v33 = vrot.slane %v1920_v30, 1 }
 0x121   : > { %4792 = vmatprep.mubr.msk.bf16.mxu0 %vm523_vm1, %v3468_v24  ;;  %v1914_v24 = vshll.u32 %v5654_v5, 16  ;;  %v1900_v15 = vsel %vm1766_vm2, %v1890_v57, %v1899_v62  ;;  %v1909_v5 = vsel %vm1766_vm2, %v1899_v62, %v1908_v37 }
 0x122   : > { %v3484_v4 = vsel %vm3461_vm6, %v3481_v1, %v3483_v6  ;;  %v3486_v18 = vsel %vm3461_vm6, %v3483_v6, %v3485_v29 }
 0x125   : > { %4613 = vmatmul.mubr.msk.bf16.gmra.mrb[24].mxu1 %vm523_vm1, %v1469_v34  ;;  %v3482_v34 = vsel %vm3461_vm6, %v3479_v45, %v3481_v1  ;;  %v6134_v1 = vld [vmem:[%s6232_s2] ss:$0 sm:$0xff] }
 0x126   : > { %4616 = vmatprep.mubr.msk.bf16.mxu1 %vm523_vm1, %v1471_v22  ;;  %v1923_v22 = vshll.u32 %v5658_v10, 16 }
 0x128   : > { %4793 = vmatmul.mubr.msk.bf16.gmra.mrb[4].mxu0 %vm523_vm1, %v3470_v9  ;;  %v1916_v9 = vrot.slane %v1914_v24, 2  ;;  %v1925_v51 = vrot.slane %v1923_v22, 2 }
 0x129   : > { %4796 = vmatprep.mubr.msk.bf16.mxu0 %vm523_vm1, %v3472_v41  ;;  %v3487_v41 = vrot.slane %v5799_v63, 3  ;;  %v1934_v63 = vrot.slane %v1932_v2, 2 }
 0x12a   : > { %v1917_v10 = vor.u32 %v1916_v9, %v1913_v61 }
 0x12b   : > { %v3488_v46 = vsel %vm3461_vm6, %v3485_v29, %v3487_v41  ;;  %v3490_v38 = vsel %vm3461_vm6, %v3487_v41, %v3489_v35 }
 0x12c   : > { %v1918_v36 = vsel %vm1766_vm2, %v1908_v37, %v1917_v10 }
 0x12d   : > { %4617 = vmatmul.mubr.msk.bf16.gmra.mrb[28].mxu1 %vm523_vm1, %v1473_v49  ;;  %v1929_v49 = vshrl.u32 %v5674_v56, 16 }
 0x12e   : > { %4620 = vmatprep.mubr.msk.bf16.mxu1 %vm523_vm1, %v1475_v23  ;;  %v1926_v23 = vor.u32 %v1925_v51, %v1922_v33 }
 0x12f   : > { %v1931_v25 = vrot.slane %v1929_v49, 1 }
 0x130   : > { %4797 = vmatmul.mubr.msk.bf16.gmra.mrb[8].mxu0 %vm523_vm1, %v3474_v3  ;;  %v1927_v44 = vsel %vm1766_vm2, %v1917_v10, %v1926_v23  ;;  %v3492_v3 = vsel %vm3461_vm6, %v3489_v35, %v3491_v42 }
 0x131   : > { %4800 = vmatprep.mubr.msk.bf16.mxu0 %vm523_vm1, %v3476_v43  ;;  %v1935_v56 = vor.u32 %v1934_v63, %v1931_v25  ;;  %v3497_v43 = vrot.slane %v5981_v20, 3 }
 0x133   : > { %v1936_v50 = vsel %vm1766_vm2, %v1926_v23, %v1935_v56 }
 0x135   : > { %4621 = vmatmul.mubr.msk.bf16.gmra.mrb[32].mxu1 %vm523_vm1, %v1477_v58  ;;  %v3498_v58 = vsel %vm3461_vm6, %v3495_v16, %v3497_v43 }
 0x136   : > { %4648 = vmatprep.mubr.msk.bf16.mxu1 %vm523_vm1, %v1873_v26 }
 0x138   : > { %4801 = vmatmul.mubr.msk.bf16.gmra.mrb[12].mxu0 %vm523_vm1, %v3478_v11 }
 0x139   : > { %4804 = vmatprep.mubr.msk.bf16.mxu0 %vm523_vm1, %v3480_v47 }
 0x13d   : > { %4649 = vmatmul.mubr.msk.bf16.vlgmr.msra.gmra.mrb[20].mxu1 %vm523_vm1, %v1882_v7 }
 0x13e   : > { %4652 = vmatprep.mubr.msk.bf16.mxu1 %vm523_vm1, %v1891_v32 }
 0x140   : > { %4805 = vmatmul.mubr.msk.bf16.gmra.mrb[16].mxu0 %vm523_vm1, %v3482_v34 }
 0x141   : > { %4808 = vmatprep.mubr.msk.bf16.mxu0 %vm523_vm1, %v3484_v4 }
 0x145   : > { %4653 = vmatmul.mubr.msk.bf16.gmra.mrb[24].mxu1 %vm523_vm1, %v1900_v15 }
 0x146   : > { %4656 = vmatprep.mubr.msk.bf16.mxu1 %vm523_vm1, %v1909_v5 }
 0x148   : > { %4809 = vmatmul.mubr.msk.bf16.gmra.mrb[20].mxu0 %vm523_vm1, %v3486_v18 }
 0x149   : > { %4812 = vmatprep.mubr.msk.bf16.mxu0 %vm523_vm1, %v3488_v46 }
 0x14d   : > { %4657 = vmatmul.mubr.msk.bf16.gmra.mrb[28].mxu1 %vm523_vm1, %v1918_v36 }
 0x14e   : > { %4660 = vmatprep.mubr.msk.bf16.mxu1 %vm523_vm1, %v1927_v44 }
 0x150   : > { %4813 = vmatmul.mubr.msk.bf16.gmra.mrb[24].mxu0 %vm523_vm1, %v3490_v38 }
 0x151   : > { %4816 = vmatprep.mubr.msk.bf16.mxu0 %vm523_vm1, %v3492_v3 }
 0x155   : > { %4661 = vmatmul.mubr.msk.bf16.gmra.mrb[32].mxu1 %vm523_vm1, %v1936_v50 }
 0x158   : > { %4817 = vmatmul.mubr.msk.bf16.gmra.mrb[28].mxu0 %vm523_vm1, %v3494_v28 }
 0x159   : > { %4820 = vmatprep.mubr.msk.bf16.mxu0 %vm523_vm1, %v3496_v31 }
 0x160   : > { %4821 = vmatmul.mubr.msk.bf16.gmra.mrb[32].mxu0 %vm523_vm1, %v3498_v58 }
 0x1c8   : > { %v4590_v8 = vpop.f32.mrb[0].mxu1 }
 0x1c9   : > { %v1578_v40 = vpop.f32.mrb[1].mxu1 }
 0x1ca   : > { %v4591_v55 = vpop.f32.mrb[2].mxu1 }
 0x1cb   : > { %v1581_v17 = vpop.f32.mrb[3].mxu1 }
 0x1d0   : > { %v4594_v53 = vpop.f32.mrb[4].mxu1 }
 0x1d1   : > { %v1594_v26 = vpop.f32.mrb[5].mxu1 }
 0x1d2   : > { %v4595_v59 = vpop.f32.mrb[6].mxu1 }
 0x1d3   : > { %v1597_v0 = vpop.f32.mrb[7].mxu1 }
 0x1d8   : > { %v4598_v45 = vpop.f32.mrb[8].mxu1 }
 0x1d9   : > { %v1610_v52 = vpop.f32.mrb[9].mxu1 }
 0x1da   : > { %v4599_v21 = vpop.f32.mrb[10].mxu1 }
 0x1db   : > { %v1613_v48 = vpop.f32.mrb[11].mxu1 }
 0x1e0   : > { %v6114_v11 = vpop.f32.mrb[12].mxu1 }
 0x1e1   : > { %v6116_v20 = vpop.f32.mrb[13].mxu1 }
 0x1e2   : > { %v6118_v57 = vpop.f32.mrb[14].mxu1 }
 0x1e3   : > { %v6120_v39 = vpop.f32.mrb[15].mxu1 }
 0x1e8   : > { %v6122_v12 = vpop.f32.mrb[16].mxu1 }
 0x1e9   : > { %v6124_v47 = vpop.f32.mrb[17].mxu1 }
 0x1ea   : > { %v6126_v7 = vpop.f32.mrb[18].mxu1 }
 0x1eb   : > { %v6128_v54 = vpop.f32.mrb[19].mxu1 }
 0x1f3   : > { %v4790_v27 = vpop.f32.mrb[0].mxu0 }
 0x1f4   : > { %v4828_v32 = vadd.f32 %v4790_v27, %v4590_v8  ;;  %v3599_v60 = vpop.f32.mrb[1].mxu0 }
 0x1f5   : > { %v4829_v13 = vadd.f32 %v3599_v60, %v1578_v40  ;;  %v4791_v6 = vpop.f32.mrb[2].mxu0 }
 0x1f6   : > { %v3787_v62 = vadd.f32 %v4828_v32, %v6134_v1  ;;  %v4830_v19 = vadd.f32 %v4791_v6, %v4591_v55  ;;  %v3602_v24 = vpop.f32.mrb[3].mxu0 }
 0x1f7   : > { %v3785_v34 = vadd.f32 %v4829_v13, %v6134_v1  ;;  %v4831_v37 = vadd.f32 %v3602_v24, %v1581_v17 }
 0x1f8   : > { %v3823_v30 = vmul.f32 0.05, %v3787_v62  ;;  %v3788_v22 = vadd.f32 %v4830_v19, %v6134_v1 }
 0x1f9   : > { %v3821_v4 = vmul.f32 0.05, %v3785_v34  ;;  %v3786_v15 = vadd.f32 %v4831_v37, %v6134_v1 }
 0x1fa   : > { %3859 = vst [vmem:[%s6140_s19 + $0x10] sm:$0xff] %v3823_v30  ;;  %v3824_v61 = vmul.f32 0.05, %v3788_v22 }
 0x1fb   : > { %3857 = vst [vmem:[%s6140_s19] sm:$0xff] %v3821_v4  ;;  %v3822_v9 = vmul.f32 0.05, %v3786_v15  ;;  %v4794_v29 = vpop.f32.mrb[4].mxu0 }
 0x1fc   : > { %3860 = vst [vmem:[%s6140_s19 + $0x18] sm:$0xff] %v3824_v61  ;;  %v4832_v5 = vadd.f32 %v4794_v29, %v4594_v53  ;;  %v3615_v33 = vpop.f32.mrb[5].mxu0 }
 0x1fd   : > { %3858 = vst [vmem:[%s6140_s19 + $0x8] sm:$0xff] %v3822_v9  ;;  %v4833_v51 = vadd.f32 %v3615_v33, %v1594_v26  ;;  %v4795_v41 = vpop.f32.mrb[6].mxu0 }
 0x1fe   : > { %v3791_v10 = vadd.f32 %v4832_v5, %v6134_v1  ;;  %v4834_v49 = vadd.f32 %v4795_v41, %v4595_v59  ;;  %v3618_v2 = vpop.f32.mrb[7].mxu0 }
 0x1ff   : > { %v3789_v18 = vadd.f32 %v4833_v51, %v6134_v1  ;;  %v4835_v23 = vadd.f32 %v3618_v2, %v1597_v0 }
 0x200   : > { %v3827_v46 = vmul.f32 0.05, %v3791_v10  ;;  %v3792_v36 = vadd.f32 %v4834_v49, %v6134_v1 }
 0x201   : > { %v3825_v25 = vmul.f32 0.05, %v3789_v18  ;;  %v3790_v63 = vadd.f32 %v4835_v23, %v6134_v1 }
 0x202   : > { %3863 = vst [vmem:[%s6140_s19 + $0x30] sm:$0xff] %v3827_v46  ;;  %v3828_v35 = vmul.f32 0.05, %v3792_v36 }
 0x203   : > { %3861 = vst [vmem:[%s6140_s19 + $0x20] sm:$0xff] %v3825_v25  ;;  %v3826_v44 = vmul.f32 0.05, %v3790_v63  ;;  %v4798_v42 = vpop.f32.mrb[8].mxu0 }
 0x204   : > { %3864 = vst [vmem:[%s6140_s19 + $0x38] sm:$0xff] %v3828_v35  ;;  %v4836_v56 = vadd.f32 %v4798_v42, %v4598_v45  ;;  %v3631_v38 = vpop.f32.mrb[9].mxu0 }
 0x205   : > { %3862 = vst [vmem:[%s6140_s19 + $0x28] sm:$0xff] %v3826_v44  ;;  %v4837_v3 = vadd.f32 %v3631_v38, %v1610_v52  ;;  %v4799_v50 = vpop.f32.mrb[10].mxu0 }
 0x206   : > { %v3795_v14 = vadd.f32 %v4836_v56, %v6134_v1  ;;  %v4838_v16 = vadd.f32 %v4799_v50, %v4599_v21  ;;  %v3634_v28 = vpop.f32.mrb[11].mxu0 }
 0x207   : > { %v3793_v31 = vadd.f32 %v4837_v3, %v6134_v1  ;;  %v4839_v43 = vadd.f32 %v3634_v28, %v1613_v48 }
 0x208   : > { %v3831_v58 = vmul.f32 0.05, %v3795_v14  ;;  %v3796_v8 = vadd.f32 %v4838_v16, %v6134_v1 }
 0x209   : > { %v3829_v40 = vmul.f32 0.05, %v3793_v31  ;;  %v3794_v55 = vadd.f32 %v4839_v43, %v6134_v1 }
 0x20a   : > { %3867 = vst [vmem:[%s6140_s19 + $0x50] sm:$0xff] %v3831_v58  ;;  %v3832_v17 = vmul.f32 0.05, %v3796_v8 }
 0x20b   : > { %3865 = vst [vmem:[%s6140_s19 + $0x40] sm:$0xff] %v3829_v40  ;;  %v3830_v53 = vmul.f32 0.05, %v3794_v55  ;;  %v4802_v26 = vpop.f32.mrb[12].mxu0 }
 0x20c   : > { %3868 = vst [vmem:[%s6140_s19 + $0x58] sm:$0xff] %v3832_v17  ;;  %v4840_v59 = vadd.f32 %v4802_v26, %v6114_v11  ;;  %v3647_v0 = vpop.f32.mrb[13].mxu0 }
 0x20d   : > { %3866 = vst [vmem:[%s6140_s19 + $0x48] sm:$0xff] %v3830_v53  ;;  %v4841_v45 = vadd.f32 %v3647_v0, %v6116_v20  ;;  %v4803_v52 = vpop.f32.mrb[14].mxu0 }
 0x20e   : > { %v3799_v21 = vadd.f32 %v4840_v59, %v6134_v1  ;;  %v4842_v48 = vadd.f32 %v4803_v52, %v6118_v57  ;;  %v3650_v27 = vpop.f32.mrb[15].mxu0 }
 0x20f   : > { %v3797_v60 = vadd.f32 %v4841_v45, %v6134_v1  ;;  %v4843_v13 = vadd.f32 %v3650_v27, %v6120_v39 }
 0x210   : > { %v4650_v32 = vpop.f32.mrb[20].mxu1  ;;  %v3835_v6 = vmul.f32 0.05, %v3799_v21  ;;  %v3800_v62 = vadd.f32 %v4842_v48, %v6134_v1 }
 0x211   : > { %v2117_v11 = vpop.f32.mrb[21].mxu1  ;;  %v3833_v20 = vmul.f32 0.05, %v3797_v60  ;;  %v3798_v24 = vadd.f32 %v4843_v13, %v6134_v1 }
 0x212   : > { %v4651_v19 = vpop.f32.mrb[22].mxu1  ;;  %3871 = vst [vmem:[%s6140_s19 + $0x70] sm:$0xff] %v3835_v6  ;;  %v3836_v37 = vmul.f32 0.05, %v3800_v62 }
 0x213   : > { %v2120_v34 = vpop.f32.mrb[23].mxu1  ;;  %3869 = vst [vmem:[%s6140_s19 + $0x60] sm:$0xff] %v3833_v20  ;;  %v3834_v57 = vmul.f32 0.05, %v3798_v24  ;;  %v4806_v30 = vpop.f32.mrb[16].mxu0 }
 0x214   : > { %3872 = vst [vmem:[%s6140_s19 + $0x78] sm:$0xff] %v3836_v37  ;;  %v4844_v22 = vadd.f32 %v4806_v30, %v6122_v12  ;;  %v3663_v4 = vpop.f32.mrb[17].mxu0 }
 0x215   : > { %3870 = vst [vmem:[%s6140_s19 + $0x68] sm:$0xff] %v3834_v57  ;;  %v4845_v39 = vadd.f32 %v3663_v4, %v6124_v47  ;;  %v4807_v15 = vpop.f32.mrb[18].mxu0 }
 0x216   : > { %v3803_v61 = vadd.f32 %v4844_v22, %v6134_v1  ;;  %v4846_v9 = vadd.f32 %v4807_v15, %v6126_v7  ;;  %v3666_v29 = vpop.f32.mrb[19].mxu0 }
 0x217   : > { %v3801_v33 = vadd.f32 %v4845_v39, %v6134_v1  ;;  %v4847_v51 = vadd.f32 %v3666_v29, %v6128_v54 }
 0x218   : > { %v4654_v5 = vpop.f32.mrb[24].mxu1  ;;  %v3839_v41 = vmul.f32 0.05, %v3803_v61  ;;  %v3804_v10 = vadd.f32 %v4846_v9, %v6134_v1 }
 0x219   : > { %v2133_v12 = vpop.f32.mrb[25].mxu1  ;;  %v3837_v47 = vmul.f32 0.05, %v3801_v33  ;;  %v3802_v2 = vadd.f32 %v4847_v51, %v6134_v1 }
 0x21a   : > { %v4655_v49 = vpop.f32.mrb[26].mxu1  ;;  %3875 = vst [vmem:[%s6140_s19 + $0x90] sm:$0xff] %v3839_v41  ;;  %v3840_v23 = vmul.f32 0.05, %v3804_v10 }
 0x21b   : > { %v2136_v18 = vpop.f32.mrb[27].mxu1  ;;  %3873 = vst [vmem:[%s6140_s19 + $0x80] sm:$0xff] %v3837_v47  ;;  %v3838_v7 = vmul.f32 0.05, %v3802_v2  ;;  %v4810_v46 = vpop.f32.mrb[20].mxu0 }
 0x21c   : > { %3876 = vst [vmem:[%s6140_s19 + $0x98] sm:$0xff] %v3840_v23  ;;  %v4848_v36 = vadd.f32 %v4810_v46, %v4650_v32  ;;  %v3679_v25 = vpop.f32.mrb[21].mxu0 }
 0x21d   : > { %3874 = vst [vmem:[%s6140_s19 + $0x88] sm:$0xff] %v3838_v7  ;;  %v4849_v54 = vadd.f32 %v3679_v25, %v2117_v11  ;;  %v4811_v63 = vpop.f32.mrb[22].mxu0 }
 0x21e   : > { %v3807_v35 = vadd.f32 %v4848_v36, %v6134_v1  ;;  %v4850_v44 = vadd.f32 %v4811_v63, %v4651_v19  ;;  %v3682_v42 = vpop.f32.mrb[23].mxu0 }
 0x21f   : > { %v3805_v38 = vadd.f32 %v4849_v54, %v6134_v1  ;;  %v4851_v3 = vadd.f32 %v3682_v42, %v2120_v34 }
 0x220   : > { %v4658_v56 = vpop.f32.mrb[28].mxu1  ;;  %v3843_v14 = vmul.f32 0.05, %v3807_v35  ;;  %v3808_v16 = vadd.f32 %v4850_v44, %v6134_v1 }
 0x221   : > { %v2149_v50 = vpop.f32.mrb[29].mxu1  ;;  %v3841_v31 = vmul.f32 0.05, %v3805_v38  ;;  %v3806_v43 = vadd.f32 %v4851_v3, %v6134_v1 }
 0x222   : > { %v4659_v28 = vpop.f32.mrb[30].mxu1  ;;  %3879 = vst [vmem:[%s6140_s19 + $0xb0] sm:$0xff] %v3843_v14  ;;  %v3844_v8 = vmul.f32 0.05, %v3808_v16 }
 0x223   : > { %v2152_v58 = vpop.f32.mrb[31].mxu1  ;;  %3877 = vst [vmem:[%s6140_s19 + $0xa0] sm:$0xff] %v3841_v31  ;;  %v3842_v40 = vmul.f32 0.05, %v3806_v43  ;;  %v4814_v55 = vpop.f32.mrb[24].mxu0 }
 0x224   : > { %3880 = vst [vmem:[%s6140_s19 + $0xb8] sm:$0xff] %v3844_v8  ;;  %v4852_v17 = vadd.f32 %v4814_v55, %v4654_v5  ;;  %v3695_v53 = vpop.f32.mrb[25].mxu0 }
 0x225   : > { %3878 = vst [vmem:[%s6140_s19 + $0xa8] sm:$0xff] %v3842_v40  ;;  %v4853_v26 = vadd.f32 %v3695_v53, %v2133_v12  ;;  %v4815_v59 = vpop.f32.mrb[26].mxu0 }
 0x226   : > { %v3811_v0 = vadd.f32 %v4852_v17, %v6134_v1  ;;  %v4854_v45 = vadd.f32 %v4815_v59, %v4655_v49  ;;  %v3698_v52 = vpop.f32.mrb[27].mxu0 }
 0x227   : > { %v3809_v48 = vadd.f32 %v4853_v26, %v6134_v1  ;;  %v4855_v27 = vadd.f32 %v3698_v52, %v2136_v18 }
 0x228   : > { %v4662_v21 = vpop.f32.mrb[32].mxu1  ;;  %v3847_v60 = vmul.f32 0.05, %v3811_v0  ;;  %v3812_v13 = vadd.f32 %v4854_v45, %v6134_v1 }
 0x229   : > { %v2165_v32 = vpop.f32.mrb[33].mxu1  ;;  %v3845_v6 = vmul.f32 0.05, %v3809_v48  ;;  %v3810_v62 = vadd.f32 %v4855_v27, %v6134_v1 }
 0x22a   : > { %v4663_v11 = vpop.f32.mrb[34].mxu1  ;;  %3883 = vst [vmem:[%s6140_s19 + $0xd0] sm:$0xff] %v3847_v60  ;;  %v3848_v20 = vmul.f32 0.05, %v3812_v13 }
 0x22b   : > { %v2168_v19 = vpop.f32.mrb[35].mxu1  ;;  %3881 = vst [vmem:[%s6140_s19 + $0xc0] sm:$0xff] %v3845_v6  ;;  %v3846_v24 = vmul.f32 0.05, %v3810_v62  ;;  %v4818_v34 = vpop.f32.mrb[28].mxu0 }
 0x22c   : > { %3884 = vst [vmem:[%s6140_s19 + $0xd8] sm:$0xff] %v3848_v20  ;;  %v4856_v37 = vadd.f32 %v4818_v34, %v4658_v56  ;;  %v3711_v57 = vpop.f32.mrb[29].mxu0 }
 0x22d   : > { %3882 = vst [vmem:[%s6140_s19 + $0xc8] sm:$0xff] %v3846_v24  ;;  %v4857_v30 = vadd.f32 %v3711_v57, %v2149_v50  ;;  %v4819_v22 = vpop.f32.mrb[30].mxu0 }
 0x22e   : > { %v3815_v4 = vadd.f32 %v4856_v37, %v6134_v1  ;;  %v4858_v39 = vadd.f32 %v4819_v22, %v4659_v28  ;;  %v3714_v15 = vpop.f32.mrb[31].mxu0 }
 0x22f   : > { %v3813_v61 = vadd.f32 %v4857_v30, %v6134_v1  ;;  %v4859_v9 = vadd.f32 %v3714_v15, %v2152_v58 }
 0x230   : > { %v3851_v29 = vmul.f32 0.05, %v3815_v4  ;;  %v3816_v5 = vadd.f32 %v4858_v39, %v6134_v1 }
 0x231   : > { %v3849_v33 = vmul.f32 0.05, %v3813_v61  ;;  %v3814_v51 = vadd.f32 %v4859_v9, %v6134_v1 }
 0x232   : > { %3887 = vst [vmem:[%s6140_s19 + $0xf0] sm:$0xff] %v3851_v29  ;;  %v3852_v12 = vmul.f32 0.05, %v3816_v5 }
 0x233   : > { %3885 = vst [vmem:[%s6140_s19 + $0xe0] sm:$0xff] %v3849_v33  ;;  %v3850_v41 = vmul.f32 0.05, %v3814_v51  ;;  %v4822_v10 = vpop.f32.mrb[32].mxu0 }
 0x234   : > { %3888 = vst [vmem:[%s6140_s19 + $0xf8] sm:$0xff] %v3852_v12  ;;  %v4860_v49 = vadd.f32 %v4822_v10, %v4662_v21  ;;  %v3727_v47 = vpop.f32.mrb[33].mxu0 }
 0x235   : > { %3886 = vst [vmem:[%s6140_s19 + $0xe8] sm:$0xff] %v3850_v41  ;;  %v4861_v2 = vadd.f32 %v3727_v47, %v2165_v32  ;;  %v4823_v18 = vpop.f32.mrb[34].mxu0 }
 0x236   : > { %v3819_v23 = vadd.f32 %v4860_v49, %v6134_v1  ;;  %v4862_v7 = vadd.f32 %v4823_v18, %v4663_v11  ;;  %v3730_v46 = vpop.f32.mrb[35].mxu0 }
 0x237   : > { %v3817_v36 = vadd.f32 %v4861_v2, %v6134_v1  ;;  %v4863_v25 = vadd.f32 %v3730_v46, %v2168_v19 }
 0x238   : > { %v3855_v54 = vmul.f32 0.05, %v3819_v23  ;;  %v3820_v63 = vadd.f32 %v4862_v7, %v6134_v1 }
 0x239   : > { %v3853_v35 = vmul.f32 0.05, %v3817_v36  ;;  %v3818_v44 = vadd.f32 %v4863_v25, %v6134_v1 }
 0x23a   : > { %3891 = vst [vmem:[%s6140_s19 + $0x110] sm:$0xff] %v3855_v54  ;;  %v3856_v42 = vmul.f32 0.05, %v3820_v63 }
 0x23b   : > { %3889 = vst [vmem:[%s6140_s19 + $0x100] sm:$0xff] %v3853_v35  ;;  %v3854_v56 = vmul.f32 0.05, %v3818_v44 }
 0x23c   : > { %3892 = vst [vmem:[%s6140_s19 + $0x118] sm:$0xff] %v3856_v42 }
 0x23d   : > { %3890 = vst [vmem:[%s6140_s19 + $0x108] sm:$0xff] %v3854_v56 }
 0x23e PF: > { %s13_s14 = sadd.s32 1, %s5256_s14   ;;  %s6234_s12 = smov %s5252_s13 }
 0x23f   : > { %p10_p5 = scmp.ge.s32.totalorder %s13_s14, 4   ;;  %s6235_s13 = smov %s6237_s15 }
 0x241   :  { %12 = sbr.rel (!%p10_p5) target bundleno = 2 (0x2), region = 76 }

// kernel: _lambda_.1
= control target key start
LH: loop header
LB: loop body
LE: loop exit
PB: predicated region body
PF: predicated region fallthrough
CT: control target
= control target key end

     0   :  { %s5960_s12 = smov 0   ;;  %s5962_s13 = smov 0   ;;  %s7088_s0 = inlined_call_operand.vmem [shape: f32[2,352,32], index: 0, kind: input, shape index: {}]   ;;  %s7089_s1 = inlined_call_operand.vmem [shape: f32[9,32,128], index: 1, kind: input, shape index: {}]   ;;  %s7090_s2 = inlined_call_operand.vmem [shape: f32[1,128], index: 2, kind: input, shape index: {}]   ;;  %s7091_s3 = inlined_call_operand.vmem [shape: f32[2,288,128], index: 3, kind: output, shape index: {}]  }
   0x1   :  { %s5964_s14 = smov 0  }
   0x2 LB: > { %s25_s15 = sadd.s32 1, %s5934_s13  ;;  %p4246_p0 = scmp.ge.s32.totalorder %s5938_s14, 1  ;;  %s5938_s14 = sphi %s5964_s14, %s13_s14   ;;  %s5934_s13 = sphi %s5962_s13, %s7093_s13   ;;  %s5930_s12 = sphi %s5960_s12, %s7092_s12  }
   0x3   : > { %p27_p1 = scmp.ge.s32.totalorder %s25_s15, 2  ;;  %p168_p2 = scmp.lt.s32.totalorder %s5938_s14, 3 }
   0x5   : > { %s7095_s15 = smov (%p27_p1, %s25_s15), 0  ;;  %p169_p3 = pnand %p4246_p0, %p168_p2 }
   0x6   : > { %v4249_v0 = vld [vmem:[%s7089_s1 + $0x20] sm:$0xff] (!%p169_p3)  ;;  %v4250_v1 = vld [vmem:[%s7089_s1 + $0x28] sm:$0xff] (!%p169_p3)  ;;  %p202_p4 = scmp.lt.s32.totalorder (!%p169_p3), %s5930_s12, 1  ;;  %v4251_v5 = vld [vmem:[%s7089_s1 + $0x30] sm:$0xff] (!%p169_p3)  ;;  %vm303_vm0 = vcmask (!%p169_p3), 261120  }
   0x7   : > { %172 = sbr.rel (%p169_p3) target bundleno = 560 (0x230), region = 32  ;;  %v4405_v2 = vld [vmem:[%s7089_s1 + $0x80] sm:$0xff] (!%p169_p3)  ;;  %v5526_v3 = vpack.c.bf16 (!%p169_p3), %v4250_v1, %v4249_v0  ;;  %v4406_v4 = vld [vmem:[%s7089_s1 + $0x88] sm:$0xff] (!%p169_p3)  ;;  %v4252_v6 = vld [vmem:[%s7089_s1 + $0x38] sm:$0xff] (!%p169_p3) }
   0x8   : > { %v5996_v7 = vpack.c.bf16 (!%p169_p3), %v4406_v4, %v4405_v2  ;;  %v5530_v8 = vpack.c.bf16 (!%p169_p3), %v4252_v6, %v4251_v5  ;;  %v4407_v9 = vld [vmem:[%s7089_s1 + $0x90] sm:$0xff] (!%p169_p3)  ;;  %v4408_v10 = vld [vmem:[%s7089_s1 + $0x98] sm:$0xff] (!%p169_p3)  ;;  %v258_v11 = vld [vmem:[%s7089_s1] sm:$0xff] (!%p169_p3) }
   0x9   : > { %5527 = vmatprep.subr.bf16.mxu1 (!%p169_p3), %v5526_v3  ;;  %v6009_v12 = vpack.c.bf16 (!%p169_p3), %v4408_v10, %v4407_v9  ;;  %v259_v13 = vld [vmem:[%s7089_s1 + $0x8] sm:$0xff] (!%p169_p3)  ;;  %v4445_v14 = vld [vmem:[%s7089_s1 + $0xa0] sm:$0xff] (!%p169_p3)  ;;  %v4447_v18 = vld [vmem:[%s7089_s1 + $0xb0] sm:$0xff] (!%p169_p3) }
   0xa   : > { %v4446_v15 = vld [vmem:[%s7089_s1 + $0xa8] sm:$0xff] (!%p169_p3)  ;;  %5559 = vmatprep.subr.bf16.mxu0 (!%p169_p3), %v5996_v7  ;;  %5529 = vmatpush3.bf16.msra.mxu1 (!%p169_p3), %v5526_v3  ;;  %v5534_v16 = vpack.c.bf16 (!%p169_p3), %v259_v13, %v258_v11  ;;  %v4448_v21 = vld [vmem:[%s7089_s1 + $0xb8] sm:$0xff] (!%p169_p3)  ;;  %v260_v23 = vld [vmem:[%s7089_s1 + $0x10] sm:$0xff] (!%p169_p3) }
   0xb   : > { %5561 = vmatpush3.bf16.msra.mxu0 (!%p169_p3), %v5996_v7  ;;  %5531 = vmatprep.subr.bf16.mxu1 (!%p169_p3), %v5530_v8  ;;  %v5566_v17 = vpack.c.bf16 (!%p169_p3), %v4446_v15, %v4445_v14  ;;  %v261_v24 = vld [vmem:[%s7089_s1 + $0x18] sm:$0xff] (!%p169_p3)  ;;  %v5570_v27 = vpack.c.bf16 (!%p169_p3), %v4448_v21, %v4447_v18  ;;  %v4485_v30 = vld [vmem:[%s7089_s1 + $0xc0] sm:$0xff] (!%p169_p3)  ;;  %v4486_v31 = vld [vmem:[%s7089_s1 + $0xc8] sm:$0xff] (!%p169_p3) }
   0xc   : > { %5563 = vmatprep.subr.bf16.mxu0 (!%p169_p3), %v6009_v12  ;;  %v5538_v29 = vpack.c.bf16 (!%p169_p3), %v261_v24, %v260_v23  ;;  %v4325_v33 = vld [vmem:[%s7089_s1 + $0x40] sm:$0xff] (!%p169_p3)  ;;  %v4326_v34 = vld [vmem:[%s7089_s1 + $0x48] sm:$0xff] (!%p169_p3)  ;;  %v6070_v38 = vpack.c.bf16 (!%p169_p3), %v4486_v31, %v4485_v30  ;;  %v4487_v4 = vld [vmem:[%s7089_s1 + $0xd0] sm:$0xff] (!%p169_p3) }
   0xd   : > { %v6073_v39 = vpack.c.bf16 (!%p169_p3), %v4326_v34, %v4325_v33  ;;  %v4488_v5 = vld [vmem:[%s7089_s1 + $0xd8] sm:$0xff] (!%p169_p3)  ;;  %v4525_v13 = vld [vmem:[%s7089_s1 + $0xe0] sm:$0xff] (!%p169_p3)  ;;  %v4526_v14 = vld [vmem:[%s7089_s1 + $0xe8] sm:$0xff] (!%p169_p3) }
   0xe   : > { %s7097_s12 = smov (!%p202_p4, %s5930_s12), 1  ;;  %5533 = vmatpush3.bf16.msra.mxu1 %v5530_v8  ;;  %v5578_v11 = vpack.c.bf16 %v4488_v5, %v4487_v4 }
   0xf   : > { %s5890_s17 = smul.u32 352, %s7097_s12  ;;  %5565 = vmatpush3.bf16.msra.mxu0 %v6009_v12  ;;  %5535 = vmatprep.subr.bf16.mxu1 %v5534_v16 }
  0x10   : > { %5567 = vmatprep.subr.bf16.mxu0 %v5566_v17 }
  0x11   : > { %s6027_s20 = scalar_lea.vmem %s7088_s0, %s5890_s17 }
  0x12   : > { %v262_v19 = vld [vmem:[%s6027_s20 + $0x1] sm:$0xff]  ;;  %v1870_v20 = vld [vmem:[%s6027_s20 + $0x13] sm:$0xff]  ;;  %v263_v22 = vld [vmem:[%s6027_s20 + $0x9] sm:$0xff] }
  0x13   : > { %4976 = vmatprep.mubr.msk.f32.mxu1 %vm303_vm0, %v262_v19  ;;  %5224 = vmatprep.mubr.msk.f32.mxu0 %vm303_vm0, %v1870_v20  ;;  %v1871_v25 = vld [vmem:[%s6027_s20 + $0x1b] sm:$0xff]  ;;  %v264_v26 = vld [vmem:[%s6027_s20 + $0x11] sm:$0xff]  ;;  %v1872_v28 = vld [vmem:[%s6027_s20 + $0x23] sm:$0xff]  ;;  %v6168_v19 = vpack.c.bf16 %v4526_v14, %v4525_v13 }
  0x14   : > { %4977 = vmatmul.mubr.msk.f32.vlgmr.msra.gmra.mrb[0].mxu1 %vm303_vm0, %v263_v22  ;;  %5225 = vmatmul.mubr.msk.f32.vlgmr.msra.gmra.mrb[0].mxu0 %vm303_vm0, %v1871_v25  ;;  %v265_v32 = vld [vmem:[%s6027_s20 + $0x19] sm:$0xff]  ;;  %v1873_v35 = vld [vmem:[%s6027_s20 + $0x2b] sm:$0xff]  ;;  %v266_v36 = vld [vmem:[%s6027_s20 + $0x21] sm:$0xff] }
  0x15   : > { %5537 = vmatpush3.bf16.msra.mxu1 %v5534_v16  ;;  %5569 = vmatpush3.bf16.msra.mxu0 %v5566_v17  ;;  %v1874_v37 = vld [vmem:[%s6027_s20 + $0x33] sm:$0xff]  ;;  %v267_v40 = vld [vmem:[%s6027_s20 + $0x29] sm:$0xff]  ;;  %v1875_v41 = vld [vmem:[%s6027_s20 + $0x3b] sm:$0xff] }
  0x16   : > { %4979 = vmatprep.mubr.msk.f32.mxu1 %vm303_vm0, %v264_v26  ;;  %5227 = vmatprep.mubr.msk.f32.mxu0 %vm303_vm0, %v1872_v28  ;;  %v268_v42 = vld [vmem:[%s6027_s20 + $0x31] sm:$0xff]  ;;  %v1876_v43 = vld [vmem:[%s6027_s20 + $0x43] sm:$0xff]  ;;  %v269_v44 = vld [vmem:[%s6027_s20 + $0x39] sm:$0xff] }
  0x17   : > { %5571 = vmatprep.subr.bf16.mxu0 %v5570_v27  ;;  %5539 = vmatprep.subr.bf16.mxu1 %v5538_v29  ;;  %v1877_v45 = vld [vmem:[%s6027_s20 + $0x4b] sm:$0xff]  ;;  %v270_v46 = vld [vmem:[%s6027_s20 + $0x41] sm:$0xff]  ;;  %v1878_v47 = vld [vmem:[%s6027_s20 + $0x53] sm:$0xff] }
  0x18   : > { %4980 = vmatmul.mubr.msk.f32.gmra.mrb[2].mxu1 %vm303_vm0, %v265_v32  ;;  %5228 = vmatmul.mubr.msk.f32.gmra.mrb[2].mxu0 %vm303_vm0, %v1873_v35  ;;  %v271_v48 = vld [vmem:[%s6027_s20 + $0x49] sm:$0xff]  ;;  %v1879_v49 = vld [vmem:[%s6027_s20 + $0x5b] sm:$0xff]  ;;  %v272_v50 = vld [vmem:[%s6027_s20 + $0x51] sm:$0xff] }
  0x19   : > { %4982 = vmatprep.mubr.msk.f32.mxu1 %vm303_vm0, %v266_v36  ;;  %5230 = vmatprep.mubr.msk.f32.mxu0 %vm303_vm0, %v1874_v37  ;;  %v1880_v51 = vld [vmem:[%s6027_s20 + $0x63] sm:$0xff]  ;;  %v273_v52 = vld [vmem:[%s6027_s20 + $0x59] sm:$0xff]  ;;  %v1881_v53 = vld [vmem:[%s6027_s20 + $0x6b] sm:$0xff] }
  0x1a   : > { %5573 = vmatpush3.bf16.msra.mxu0 %v5570_v27  ;;  %5541 = vmatpush3.bf16.msra.mxu1 %v5538_v29  ;;  %v274_v54 = vld [vmem:[%s6027_s20 + $0x61] sm:$0xff]  ;;  %v1882_v55 = vld [vmem:[%s6027_s20 + $0x73] sm:$0xff]  ;;  %v275_v56 = vld [vmem:[%s6027_s20 + $0x69] sm:$0xff] }
  0x1b   : > { %5575 = vmatprep.subr.bf16.mxu0 %v6070_v38  ;;  %5543 = vmatprep.subr.bf16.mxu1 %v6073_v39  ;;  %v1883_v57 = vld [vmem:[%s6027_s20 + $0x7b] sm:$0xff]  ;;  %v276_v58 = vld [vmem:[%s6027_s20 + $0x71] sm:$0xff]  ;;  %v1884_v59 = vld [vmem:[%s6027_s20 + $0x83] sm:$0xff] }
  0x1c   : > { %4983 = vmatmul.mubr.msk.f32.gmra.mrb[4].mxu1 %vm303_vm0, %v267_v40  ;;  %5231 = vmatmul.mubr.msk.f32.gmra.mrb[4].mxu0 %vm303_vm0, %v1875_v41  ;;  %v277_v60 = vld [vmem:[%s6027_s20 + $0x79] sm:$0xff]  ;;  %v1885_v61 = vld [vmem:[%s6027_s20 + $0x8b] sm:$0xff]  ;;  %v278_v62 = vld [vmem:[%s6027_s20 + $0x81] sm:$0xff] }
  0x1d   : > { %4985 = vmatprep.mubr.msk.f32.mxu1 %vm303_vm0, %v268_v42  ;;  %5233 = vmatprep.mubr.msk.f32.mxu0 %vm303_vm0, %v1876_v43  ;;  %v1886_v63 = vld [vmem:[%s6027_s20 + $0x93] sm:$0xff]  ;;  %v279_v0 = vld [vmem:[%s6027_s20 + $0x89] sm:$0xff]  ;;  %v1887_v1 = vld [vmem:[%s6027_s20 + $0x9b] sm:$0xff] }
  0x1e   : > { %v280_v2 = vld [vmem:[%s6027_s20 + $0x91] sm:$0xff]  ;;  %v281_v6 = vld [vmem:[%s6027_s20 + $0x99] sm:$0xff]  ;;  %v282_v9 = vld [vmem:[%s6027_s20 + $0xa1] sm:$0xff] }
  0x1f   : > { %v2300_v3 = vld [vmem:[%s6027_s20 + $0x14] sm:$0xff]  ;;  %v2301_v8 = vld [vmem:[%s6027_s20 + $0x1c] sm:$0xff]  ;;  %v6146_v10 = vld [vmem:[%s6027_s20 + $0x24] sm:$0xff] }
  0x20   : > { %4986 = vmatmul.mubr.msk.f32.gmra.mrb[6].mxu1 %vm303_vm0, %v269_v44  ;;  %5234 = vmatmul.mubr.msk.f32.gmra.mrb[6].mxu0 %vm303_vm0, %v1877_v45  ;;  %v283_v15 = vld [vmem:[%s6027_s20 + $0xa9] sm:$0xff]  ;;  %v284_v17 = vld [vmem:[%s6027_s20 + $0xb1] sm:$0xff]  ;;  %v285_v20 = vld [vmem:[%s6027_s20 + $0xb9] sm:$0xff] }
  0x21   : > { %4988 = vmatprep.mubr.msk.f32.mxu1 %vm303_vm0, %v270_v46  ;;  %5236 = vmatprep.mubr.msk.f32.mxu0 %vm303_vm0, %v1878_v47  ;;  %v6162_v16 = vld [vmem:[%s6027_s20 + $0x2c] sm:$0xff]  ;;  %v6166_v18 = vld [vmem:[%s6027_s20 + $0x34] sm:$0xff]  ;;  %v6178_v21 = vld [vmem:[%s6027_s20 + $0x3c] sm:$0xff] }
  0x22   : > { %v286_v22 = vld [vmem:[%s6027_s20 + $0xc1] sm:$0xff]  ;;  %v287_v24 = vld [vmem:[%s6027_s20 + $0xc9] sm:$0xff]  ;;  %v288_v26 = vld [vmem:[%s6027_s20 + $0xd1] sm:$0xff] }
  0x23   : > { %v6182_v23 = vld [vmem:[%s6027_s20 + $0x44] sm:$0xff]  ;;  %v6193_v25 = vld [vmem:[%s6027_s20 + $0x4c] sm:$0xff]  ;;  %v6197_v27 = vld [vmem:[%s6027_s20 + $0x54] sm:$0xff] }
  0x24   : > { %4989 = vmatmul.mubr.msk.f32.gmra.mrb[8].mxu1 %vm303_vm0, %v271_v48  ;;  %5237 = vmatmul.mubr.msk.f32.gmra.mrb[8].mxu0 %vm303_vm0, %v1879_v49  ;;  %v289_v28 = vld [vmem:[%s6027_s20 + $0xd9] sm:$0xff]  ;;  %v290_v30 = vld [vmem:[%s6027_s20 + $0xe1] sm:$0xff]  ;;  %v291_v32 = vld [vmem:[%s6027_s20 + $0xe9] sm:$0xff] }
  0x25   : > { %4991 = vmatprep.mubr.msk.f32.mxu1 %vm303_vm0, %v272_v50  ;;  %5239 = vmatprep.mubr.msk.f32.mxu0 %vm303_vm0, %v1880_v51  ;;  %v6207_v29 = vld [vmem:[%s6027_s20 + $0x5c] sm:$0xff]  ;;  %v6211_v31 = vld [vmem:[%s6027_s20 + $0x64] sm:$0xff]  ;;  %v6221_v33 = vld [vmem:[%s6027_s20 + $0x6c] sm:$0xff] }
  0x26   : > { %v292_v34 = vld [vmem:[%s6027_s20 + $0xf1] sm:$0xff]  ;;  %v293_v36 = vld [vmem:[%s6027_s20 + $0xf9] sm:$0xff]  ;;  %v6239_v40 = vld [vmem:[%s6027_s20 + $0x84] sm:$0xff] }
  0x27   : > { %v6225_v35 = vld [vmem:[%s6027_s20 + $0x74] sm:$0xff]  ;;  %v6235_v37 = vld [vmem:[%s6027_s20 + $0x7c] sm:$0xff]  ;;  %v295_v41 = vld [vmem:[%s6027_s20 + $0x109] sm:$0xff] }
  0x28   : > { %4992 = vmatmul.mubr.msk.f32.gmra.mrb[10].mxu1 %vm303_vm0, %v273_v52  ;;  %5240 = vmatmul.mubr.msk.f32.gmra.mrb[10].mxu0 %vm303_vm0, %v1881_v53  ;;  %v6249_v42 = vld [vmem:[%s6027_s20 + $0x8c] sm:$0xff]  ;;  %v6253_v44 = vld [vmem:[%s6027_s20 + $0x94] sm:$0xff]  ;;  %v6263_v46 = vld [vmem:[%s6027_s20 + $0x9c] sm:$0xff] }
  0x29   : > { %4994 = vmatprep.mubr.msk.f32.mxu1 %vm303_vm0, %v274_v54  ;;  %5242 = vmatprep.mubr.msk.f32.mxu0 %vm303_vm0, %v1882_v55  ;;  %v296_v43 = vld [vmem:[%s6027_s20 + $0x111] sm:$0xff]  ;;  %v297_v45 = vld [vmem:[%s6027_s20 + $0x119] sm:$0xff]  ;;  %v6267_v48 = vld [vmem:[%s6027_s20 + $0xa4] sm:$0xff] }
  0x2a   : > { %v222_v47 = vld [vmem:[%s6027_s20] sm:$0xff]  ;;  %v4327_v49 = vld [vmem:[%s7089_s1 + $0x50] sm:$0xff]  ;;  %v4328_v50 = vld [vmem:[%s7089_s1 + $0x58] sm:$0xff] }
  0x2b   : > { %v223_v51 = vld [vmem:[%s6027_s20 + $0x8] sm:$0xff]  ;;  %v224_v53 = vld [vmem:[%s6027_s20 + $0x10] sm:$0xff]  ;;  %v5546_v55 = vpack.c.bf16 %v4328_v50, %v4327_v49  ;;  %v230_v4 = vld [vmem:[%s6027_s20 + $0x40] sm:$0xff] }
  0x2c   : > { %4995 = vmatmul.mubr.msk.f32.gmra.mrb[12].mxu1 %vm303_vm0, %v275_v56  ;;  %5243 = vmatmul.mubr.msk.f32.gmra.mrb[12].mxu0 %vm303_vm0, %v1883_v57  ;;  %v6283_v52 = vld [vmem:[%s6027_s20 + $0xac] sm:$0xff]  ;;  %v6287_v54 = vld [vmem:[%s6027_s20 + $0xb4] sm:$0xff]  ;;  %v4365_v56 = vld [vmem:[%s7089_s1 + $0x60] sm:$0xff] }
  0x2d   : > { %4997 = vmatprep.mubr.msk.f32.mxu1 %vm303_vm0, %v276_v58  ;;  %5245 = vmatprep.mubr.msk.f32.mxu0 %vm303_vm0, %v1884_v59  ;;  %v4366_v57 = vld [vmem:[%s7089_s1 + $0x68] sm:$0xff]  ;;  %v225_v58 = vld [vmem:[%s6027_s20 + $0x18] sm:$0xff]  ;;  %v242_v49 = vld [vmem:[%s6027_s20 + $0xa0] sm:$0xff] }
  0x2e   : > { %v6304_v59 = vld [vmem:[%s6027_s20 + $0xbc] sm:$0xff]  ;;  %v6339_v5 = vld [vmem:[%s6027_s20 + $0xe4] sm:$0xff] }
  0x2f   : > { %v233_v13 = vld [vmem:[%s6027_s20 + $0x58] sm:$0xff] }
  0x30   : > { %4998 = vmatmul.mubr.msk.f32.gmra.mrb[14].mxu1 %vm303_vm0, %v277_v60  ;;  %5246 = vmatmul.mubr.msk.f32.gmra.mrb[14].mxu0 %vm303_vm0, %v1885_v61  ;;  %v226_v60 = vld [vmem:[%s6027_s20 + $0x20] sm:$0xff] }
  0x31   : > { %5000 = vmatprep.mubr.msk.f32.mxu1 %vm303_vm0, %v278_v62  ;;  %5248 = vmatprep.mubr.msk.f32.mxu0 %vm303_vm0, %v1886_v63  ;;  %v6308_v61 = vld [vmem:[%s6027_s20 + $0xc4] sm:$0xff]  ;;  %v6310_v62 = vpack.c.bf16 %v4366_v57, %v4365_v56  ;;  %v6320_v63 = vld [vmem:[%s6027_s20 + $0xcc] sm:$0xff]  ;;  %v6363_v14 = vld [vmem:[%s6027_s20 + $0xfc] sm:$0xff] }
  0x32   : > { %v4368_v57 = vld [vmem:[%s7089_s1 + $0x78] sm:$0xff] }
  0x34   : > { %5001 = vmatmul.mubr.msk.f32.gmra.mrb[16].mxu1 %vm303_vm0, %v279_v0  ;;  %5249 = vmatmul.mubr.msk.f32.gmra.mrb[16].mxu0 %vm303_vm0, %v1887_v1  ;;  %v228_v0 = vld [vmem:[%s6027_s20 + $0x30] sm:$0xff] }
  0x35   : > { %5003 = vmatprep.mubr.msk.f32.mxu1 %vm303_vm0, %v280_v2  ;;  %5286 = vmatprep.mubr.msk.f32.mxu0 %vm303_vm0, %v2300_v3  ;;  %v6324_v1 = vld [vmem:[%s6027_s20 + $0xd4] sm:$0xff]  ;;  %v6335_v3 = vld [vmem:[%s6027_s20 + $0xdc] sm:$0xff] }
  0x36   : > { %v229_v2 = vld [vmem:[%s6027_s20 + $0x38] sm:$0xff] }
  0x38   : > { %5004 = vmatmul.mubr.msk.f32.gmra.mrb[18].mxu1 %vm303_vm0, %v281_v6  ;;  %5287 = vmatmul.mubr.msk.f32.vlgmr.msra.gmra.mrb[0].mxu0 %vm303_vm0, %v2301_v8  ;;  %v231_v6 = vld [vmem:[%s6027_s20 + $0x48] sm:$0xff] }
  0x39   : > { %5006 = vmatprep.mubr.msk.f32.mxu1 %vm303_vm0, %v282_v9  ;;  %5577 = vmatpush3.bf16.msra.mxu0 %v6070_v38  ;;  %v294_v38 = vld [vmem:[%s6027_s20 + $0x101] sm:$0xff]  ;;  %v6349_v8 = vld [vmem:[%s6027_s20 + $0xec] sm:$0xff] }
  0x3a   : > { %5289 = vmatprep.mubr.msk.f32.mxu0 %vm303_vm0, %v6146_v10  ;;  %5579 = vmatprep.subr.bf16.mxu0 %v5578_v11  ;;  %v232_v9 = vld [vmem:[%s6027_s20 + $0x50] sm:$0xff] }
  0x3c   : > { %5007 = vmatmul.mubr.msk.f32.gmra.mrb[20].mxu1 %vm303_vm0, %v283_v15  ;;  %5290 = vmatmul.mubr.msk.f32.gmra.mrb[2].mxu0 %vm303_vm0, %v6162_v16  ;;  %v234_v15 = vld [vmem:[%s6027_s20 + $0x60] sm:$0xff] }
  0x3d   : > { %5009 = vmatprep.mubr.msk.f32.mxu1 %vm303_vm0, %v284_v17  ;;  %5292 = vmatprep.mubr.msk.f32.mxu0 %vm303_vm0, %v6166_v18  ;;  %v6367_v17 = vld [vmem:[%s6027_s20 + $0x104] sm:$0xff] }
  0x3e   : > { %5581 = vmatpush3.bf16.msra.mxu0 %v5578_v11  ;;  %v6353_v11 = vld [vmem:[%s6027_s20 + $0xf4] sm:$0xff] }
  0x3f   : > { %5583 = vmatprep.subr.bf16.mxu0 %v6168_v19 }
  0x40   : > { %5010 = vmatmul.mubr.msk.f32.gmra.mrb[22].mxu1 %vm303_vm0, %v285_v20  ;;  %5293 = vmatmul.mubr.msk.f32.gmra.mrb[4].mxu0 %vm303_vm0, %v6178_v21  ;;  %v235_v20 = vld [vmem:[%s6027_s20 + $0x68] sm:$0xff] }
  0x41   : > { %5012 = vmatprep.mubr.msk.f32.mxu1 %vm303_vm0, %v286_v22  ;;  %5295 = vmatprep.mubr.msk.f32.mxu0 %vm303_vm0, %v6182_v23  ;;  %v6377_v22 = vld [vmem:[%s6027_s20 + $0x10c] sm:$0xff] }
  0x44   : > { %5013 = vmatmul.mubr.msk.f32.gmra.mrb[24].mxu1 %vm303_vm0, %v287_v24  ;;  %5296 = vmatmul.mubr.msk.f32.gmra.mrb[6].mxu0 %vm303_vm0, %v6193_v25  ;;  %v236_v24 = vld [vmem:[%s6027_s20 + $0x70] sm:$0xff] }
  0x45   : > { %5015 = vmatprep.mubr.msk.f32.mxu1 %vm303_vm0, %v288_v26  ;;  %5298 = vmatprep.mubr.msk.f32.mxu0 %vm303_vm0, %v6197_v27  ;;  %v6381_v26 = vld [vmem:[%s6027_s20 + $0x114] sm:$0xff] }
  0x48   : > { %5016 = vmatmul.mubr.msk.f32.gmra.mrb[26].mxu1 %vm303_vm0, %v289_v28  ;;  %5299 = vmatmul.mubr.msk.f32.gmra.mrb[8].mxu0 %vm303_vm0, %v6207_v29  ;;  %v237_v28 = vld [vmem:[%s6027_s20 + $0x78] sm:$0xff] }
  0x49   : > { %5018 = vmatprep.mubr.msk.f32.mxu1 %vm303_vm0, %v290_v30  ;;  %5301 = vmatprep.mubr.msk.f32.mxu0 %vm303_vm0, %v6211_v31  ;;  %v6391_v30 = vld [vmem:[%s6027_s20 + $0x11c] sm:$0xff] }
  0x4c   : > { %5019 = vmatmul.mubr.msk.f32.gmra.mrb[28].mxu1 %vm303_vm0, %v291_v32  ;;  %5302 = vmatmul.mubr.msk.f32.gmra.mrb[10].mxu0 %vm303_vm0, %v6221_v33  ;;  %v238_v32 = vld [vmem:[%s6027_s20 + $0x80] sm:$0xff] }
  0x4d   : > { %5021 = vmatprep.mubr.msk.f32.mxu1 %vm303_vm0, %v292_v34  ;;  %5304 = vmatprep.mubr.msk.f32.mxu0 %vm303_vm0, %v6225_v35  ;;  %v6395_v34 = vld [vmem:[%s6027_s20 + $0x124] sm:$0xff] }
  0x50   : > { %5022 = vmatmul.mubr.msk.f32.gmra.mrb[30].mxu1 %vm303_vm0, %v293_v36  ;;  %5305 = vmatmul.mubr.msk.f32.gmra.mrb[12].mxu0 %vm303_vm0, %v6235_v37  ;;  %v239_v36 = vld [vmem:[%s6027_s20 + $0x88] sm:$0xff] }
  0x51   : > { %5024 = vmatprep.mubr.msk.f32.mxu1 %vm303_vm0, %v294_v38  ;;  %5307 = vmatprep.mubr.msk.f32.mxu0 %vm303_vm0, %v6239_v40  ;;  %v6405_v38 = vld [vmem:[%s6027_s20 + $0x12c] sm:$0xff] }
  0x54   : > { %5025 = vmatmul.mubr.msk.f32.gmra.mrb[32].mxu1 %vm303_vm0, %v295_v41  ;;  %5308 = vmatmul.mubr.msk.f32.gmra.mrb[14].mxu0 %vm303_vm0, %v6249_v42  ;;  %v240_v41 = vld [vmem:[%s6027_s20 + $0x90] sm:$0xff] }
  0x55   : > { %5027 = vmatprep.mubr.msk.f32.mxu1 %vm303_vm0, %v296_v43  ;;  %5310 = vmatprep.mubr.msk.f32.mxu0 %vm303_vm0, %v6253_v44  ;;  %v4527_v43 = vld [vmem:[%s7089_s1 + $0xf0] sm:$0xff] }
  0x58   : > { %5028 = vmatmul.mubr.msk.f32.gmra.mrb[34].mxu1 %vm303_vm0, %v297_v45  ;;  %5311 = vmatmul.mubr.msk.f32.gmra.mrb[16].mxu0 %vm303_vm0, %v6263_v46  ;;  %v4528_v45 = vld [vmem:[%s7089_s1 + $0xf8] sm:$0xff] }
  0x59   : > { %5038 = vmatprep.mubr.msk.f32.mxu1 %vm303_vm0, %v222_v47  ;;  %5313 = vmatprep.mubr.msk.f32.mxu0 %vm303_vm0, %v6267_v48  ;;  %v241_v47 = vld [vmem:[%s6027_s20 + $0x98] sm:$0xff]  ;;  %v5586_v50 = vpack.c.bf16 %v4528_v45, %v4527_v43  ;;  %v6682_v45 = vld [vmem:[%s6027_s20 + $0xca] sm:$0xff] }
  0x5a   : > { %v3166_v43 = vld [vmem:[%s6027_s20 + $0x55] sm:$0xff] }
  0x5c   : > { %5039 = vmatmul.mubr.msk.f32.vlgmr.msra.gmra.mrb[0].mxu1 %vm303_vm0, %v223_v51  ;;  %5314 = vmatmul.mubr.msk.f32.gmra.mrb[18].mxu0 %vm303_vm0, %v6283_v52  ;;  %v4565_v51 = vld [vmem:[%s7089_s1 + $0x100] sm:$0xff] }
  0x5d   : > { %5545 = vmatpush3.bf16.msra.mxu1 %v6073_v39  ;;  %5041 = vmatprep.mubr.msk.f32.mxu1 %vm303_vm0, %v224_v53  ;;  %v227_v39 = vld [vmem:[%s6027_s20 + $0x28] sm:$0xff] }
  0x5e   : > { %5316 = vmatprep.mubr.msk.f32.mxu0 %vm303_vm0, %v6287_v54  ;;  %5547 = vmatprep.subr.bf16.mxu1 %v5546_v55  ;;  %v4566_v53 = vld [vmem:[%s7089_s1 + $0x108] sm:$0xff] }
  0x5f   : > { %v6437_v56 = vpack.c.bf16 %v4566_v53, %v4565_v51  ;;  %v6696_v51 = vld [vmem:[%s6027_s20 + $0xda] sm:$0xff]  ;;  %v3169_v53 = vld [vmem:[%s6027_s20 + $0x6d] sm:$0xff] }
  0x60   : > { %5042 = vmatmul.mubr.msk.f32.gmra.mrb[2].mxu1 %vm303_vm0, %v225_v58  ;;  %5317 = vmatmul.mubr.msk.f32.gmra.mrb[20].mxu0 %vm303_vm0, %v6304_v59 }
  0x61   : > { %5044 = vmatprep.mubr.msk.f32.mxu1 %vm303_vm0, %v226_v60  ;;  %5319 = vmatprep.mubr.msk.f32.mxu0 %vm303_vm0, %v6308_v61  ;;  %v6517_v60 = vld [vmem:[%s6027_s20 + $0x1a] sm:$0xff] }
  0x62   : > { %5549 = vmatpush3.bf16.msra.mxu1 %v5546_v55  ;;  %v244_v55 = vld [vmem:[%s6027_s20 + $0xb0] sm:$0xff] }
  0x63   : > { %5551 = vmatprep.subr.bf16.mxu1 %v6310_v62 }
  0x64   : > { %5045 = vmatmul.mubr.msk.f32.gmra.mrb[4].mxu1 %vm303_vm0, %v227_v39  ;;  %5320 = vmatmul.mubr.msk.f32.gmra.mrb[22].mxu0 %vm303_vm0, %v6320_v63  ;;  %v6562_v39 = vld [vmem:[%s6027_s20 + $0x4a] sm:$0xff] }
  0x65   : > { %5047 = vmatprep.mubr.msk.f32.mxu1 %vm303_vm0, %v228_v0  ;;  %5322 = vmatprep.mubr.msk.f32.mxu0 %vm303_vm0, %v6324_v1  ;;  %v6576_v0 = vld [vmem:[%s6027_s20 + $0x5a] sm:$0xff] }
  0x68   : > { %5048 = vmatmul.mubr.msk.f32.gmra.mrb[6].mxu1 %vm303_vm0, %v229_v2  ;;  %5323 = vmatmul.mubr.msk.f32.gmra.mrb[24].mxu0 %vm303_vm0, %v6335_v3  ;;  %v6590_v2 = vld [vmem:[%s6027_s20 + $0x6a] sm:$0xff] }
  0x69   : > { %5050 = vmatprep.mubr.msk.f32.mxu1 %vm303_vm0, %v230_v4  ;;  %5325 = vmatprep.mubr.msk.f32.mxu0 %vm303_vm0, %v6339_v5  ;;  %v6604_v4 = vld [vmem:[%s6027_s20 + $0x7a] sm:$0xff] }
  0x6c   : > { %5051 = vmatmul.mubr.msk.f32.gmra.mrb[8].mxu1 %vm303_vm0, %v231_v6  ;;  %5326 = vmatmul.mubr.msk.f32.gmra.mrb[26].mxu0 %vm303_vm0, %v6349_v8  ;;  %v2764_v6 = vld [vmem:[%s6027_s20 + $0x134] sm:$0xff] }
  0x6d   : > { %5053 = vmatprep.mubr.msk.f32.mxu1 %vm303_vm0, %v232_v9  ;;  %5328 = vmatprep.mubr.msk.f32.mxu0 %vm303_vm0, %v6353_v11  ;;  %v2765_v9 = vld [vmem:[%s6027_s20 + $0x13c] sm:$0xff] }
  0x70   : > { %5054 = vmatmul.mubr.msk.f32.gmra.mrb[10].mxu1 %vm303_vm0, %v233_v13  ;;  %5329 = vmatmul.mubr.msk.f32.gmra.mrb[28].mxu0 %vm303_vm0, %v6363_v14  ;;  %v3160_v13 = vld [vmem:[%s6027_s20 + $0x25] sm:$0xff] }
  0x71   : > { %5056 = vmatprep.mubr.msk.f32.mxu1 %vm303_vm0, %v234_v15  ;;  %5331 = vmatprep.mubr.msk.f32.mxu0 %vm303_vm0, %v6367_v17  ;;  %v4568_v15 = vld [vmem:[%s7089_s1 + $0x118] sm:$0xff] }
  0x74   : > { %5057 = vmatmul.mubr.msk.f32.gmra.mrb[12].mxu1 %vm303_vm0, %v235_v20  ;;  %5332 = vmatmul.mubr.msk.f32.gmra.mrb[30].mxu0 %vm303_vm0, %v6377_v22  ;;  %v3161_v20 = vld [vmem:[%s6027_s20 + $0x2d] sm:$0xff] }
  0x75   : > { %5059 = vmatprep.mubr.msk.f32.mxu1 %vm303_vm0, %v236_v24  ;;  %5334 = vmatprep.mubr.msk.f32.mxu0 %vm303_vm0, %v6381_v26  ;;  %v3162_v24 = vld [vmem:[%s6027_s20 + $0x35] sm:$0xff] }
  0x78   : > { %5060 = vmatmul.mubr.msk.f32.gmra.mrb[14].mxu1 %vm303_vm0, %v237_v28  ;;  %5335 = vmatmul.mubr.msk.f32.gmra.mrb[32].mxu0 %vm303_vm0, %v6391_v30  ;;  %v6653_v28 = vld [vmem:[%s6027_s20 + $0xaa] sm:$0xff] }
  0x79   : > { %5062 = vmatprep.mubr.msk.f32.mxu1 %vm303_vm0, %v238_v32  ;;  %5337 = vmatprep.mubr.msk.f32.mxu0 %vm303_vm0, %v6395_v34  ;;  %v6659_v32 = vld [vmem:[%s6027_s20 + $0xb2] sm:$0xff] }
  0x7c   : > { %5063 = vmatmul.mubr.msk.f32.gmra.mrb[16].mxu1 %vm303_vm0, %v239_v36  ;;  %5338 = vmatmul.mubr.msk.f32.gmra.mrb[34].mxu0 %vm303_vm0, %v6405_v38  ;;  %v6668_v36 = vld [vmem:[%s6027_s20 + $0xba] sm:$0xff] }
  0x7d   : > { %5065 = vmatprep.mubr.msk.f32.mxu1 %vm303_vm0, %v240_v41  ;;  %5348 = vmatprep.mubr.msk.f32.mxu0 %vm303_vm0, %v6146_v10  ;;  %v243_v10 = vld [vmem:[%s6027_s20 + $0xa8] sm:$0xff] }
  0x7e   : > { %v6673_v41 = vld [vmem:[%s6027_s20 + $0xc2] sm:$0xff] }
  0x80   : > { %5066 = vmatmul.mubr.msk.f32.gmra.mrb[18].mxu1 %vm303_vm0, %v241_v47  ;;  %5349 = vmatmul.mubr.msk.f32.vlgmr.msra.gmra.mrb[0].mxu0 %vm303_vm0, %v6162_v16  ;;  %v245_v16 = vld [vmem:[%s6027_s20 + $0xb8] sm:$0xff] }
  0x81   : > { %5068 = vmatprep.mubr.msk.f32.mxu1 %vm303_vm0, %v242_v49  ;;  %5585 = vmatpush3.bf16.msra.mxu0 %v6168_v19  ;;  %v246_v19 = vld [vmem:[%s6027_s20 + $0xc0] sm:$0xff]  ;;  %v6687_v49 = vld [vmem:[%s6027_s20 + $0xd2] sm:$0xff] }
  0x82   : > { %5351 = vmatprep.mubr.msk.f32.mxu0 %vm303_vm0, %v6166_v18  ;;  %5587 = vmatprep.subr.bf16.mxu0 %v5586_v50  ;;  %v247_v18 = vld [vmem:[%s6027_s20 + $0xc8] sm:$0xff]  ;;  %v3167_v47 = vld [vmem:[%s6027_s20 + $0x5d] sm:$0xff] }
  0x84   : > { %5069 = vmatmul.mubr.msk.f32.gmra.mrb[20].mxu1 %vm303_vm0, %v243_v10  ;;  %5352 = vmatmul.mubr.msk.f32.gmra.mrb[2].mxu0 %vm303_vm0, %v6178_v21  ;;  %v248_v21 = vld [vmem:[%s6027_s20 + $0xd0] sm:$0xff]  ;;  %v6701_v10 = vld [vmem:[%s6027_s20 + $0xe2] sm:$0xff] }
  0x85   : > { %5071 = vmatprep.mubr.msk.f32.mxu1 %vm303_vm0, %v244_v55  ;;  %5354 = vmatprep.mubr.msk.f32.mxu0 %vm303_vm0, %v6182_v23  ;;  %v249_v23 = vld [vmem:[%s6027_s20 + $0xd8] sm:$0xff] }
  0x86   : > { %5589 = vmatpush3.bf16.msra.mxu0 %v5586_v50  ;;  %v3168_v50 = vld [vmem:[%s6027_s20 + $0x65] sm:$0xff]  ;;  %v3170_v55 = vld [vmem:[%s6027_s20 + $0x75] sm:$0xff] }
  0x87   : > { %5591 = vmatprep.subr.bf16.mxu0 %v6437_v56 }
  0x88   : > { %5072 = vmatmul.mubr.msk.f32.gmra.mrb[22].mxu1 %vm303_vm0, %v245_v16  ;;  %5355 = vmatmul.mubr.msk.f32.gmra.mrb[4].mxu0 %vm303_vm0, %v6193_v25  ;;  %v250_v25 = vld [vmem:[%s6027_s20 + $0xe0] sm:$0xff] }
  0x89   : > { %5074 = vmatprep.mubr.msk.f32.mxu1 %vm303_vm0, %v246_v19  ;;  %5357 = vmatprep.mubr.msk.f32.mxu0 %vm303_vm0, %v6197_v27  ;;  %v251_v27 = vld [vmem:[%s6027_s20 + $0xe8] sm:$0xff]  ;;  %v3171_v16 = vld [vmem:[%s6027_s20 + $0x7d] sm:$0xff]  ;;  %v6715_v19 = vld [vmem:[%s6027_s20 + $0xf2] sm:$0xff] }
  0x8c   : > { %5075 = vmatmul.mubr.msk.f32.gmra.mrb[24].mxu1 %vm303_vm0, %v247_v18  ;;  %5358 = vmatmul.mubr.msk.f32.gmra.mrb[6].mxu0 %vm303_vm0, %v6207_v29  ;;  %v252_v29 = vld [vmem:[%s6027_s20 + $0xf0] sm:$0xff]  ;;  %v3172_v18 = vld [vmem:[%s6027_s20 + $0x85] sm:$0xff] }
  0x8d   : > { %5077 = vmatprep.mubr.msk.f32.mxu1 %vm303_vm0, %v248_v21  ;;  %5360 = vmatprep.mubr.msk.f32.mxu0 %vm303_vm0, %v6211_v31  ;;  %v253_v31 = vld [vmem:[%s6027_s20 + $0xf8] sm:$0xff] }
  0x8e   : > { %v6724_v21 = vld [vmem:[%s6027_s20 + $0xfa] sm:$0xff] }
  0x90   : > { %5078 = vmatmul.mubr.msk.f32.gmra.mrb[26].mxu1 %vm303_vm0, %v249_v23  ;;  %5361 = vmatmul.mubr.msk.f32.gmra.mrb[8].mxu0 %vm303_vm0, %v6221_v33  ;;  %v254_v33 = vld [vmem:[%s6027_s20 + $0x100] sm:$0xff]  ;;  %v3173_v23 = vld [vmem:[%s6027_s20 + $0x8d] sm:$0xff] }
  0x91   : > { %5080 = vmatprep.mubr.msk.f32.mxu1 %vm303_vm0, %v250_v25  ;;  %5363 = vmatprep.mubr.msk.f32.mxu0 %vm303_vm0, %v6225_v35  ;;  %v255_v35 = vld [vmem:[%s6027_s20 + $0x108] sm:$0xff] }
  0x92   : > { %v6729_v25 = vld [vmem:[%s6027_s20 + $0x102] sm:$0xff] }
  0x94   : > { %5081 = vmatmul.mubr.msk.f32.gmra.mrb[28].mxu1 %vm303_vm0, %v251_v27  ;;  %5364 = vmatmul.mubr.msk.f32.gmra.mrb[10].mxu0 %vm303_vm0, %v6235_v37  ;;  %v256_v37 = vld [vmem:[%s6027_s20 + $0x110] sm:$0xff] }
  0x95   : > { %5083 = vmatprep.mubr.msk.f32.mxu1 %vm303_vm0, %v252_v29  ;;  %5366 = vmatprep.mubr.msk.f32.mxu0 %vm303_vm0, %v6239_v40  ;;  %v257_v40 = vld [vmem:[%s6027_s20 + $0x118] sm:$0xff]  ;;  %v6738_v29 = vld [vmem:[%s6027_s20 + $0x10a] sm:$0xff] }
  0x96   : > { %v3174_v27 = vld [vmem:[%s6027_s20 + $0x95] sm:$0xff] }
  0x98   : > { %5084 = vmatmul.mubr.msk.f32.gmra.mrb[30].mxu1 %vm303_vm0, %v253_v31  ;;  %5367 = vmatmul.mubr.msk.f32.gmra.mrb[12].mxu0 %vm303_vm0, %v6249_v42  ;;  %v1010_v42 = vld [vmem:[%s6027_s20 + $0x2] sm:$0xff] }
  0x99   : > { %5086 = vmatprep.mubr.msk.f32.mxu1 %vm303_vm0, %v254_v33  ;;  %5369 = vmatprep.mubr.msk.f32.mxu0 %vm303_vm0, %v6253_v44  ;;  %v4367_v44 = vld [vmem:[%s7089_s1 + $0x70] sm:$0xff]  ;;  %v3175_v31 = vld [vmem:[%s6027_s20 + $0x9d] sm:$0xff] }
  0x9a   : > { %v5554_v58 = vpack.c.bf16 %v4368_v57, %v4367_v44  ;;  %v6743_v33 = vld [vmem:[%s6027_s20 + $0x112] sm:$0xff]  ;;  %v3179_v44 = vld [vmem:[%s6027_s20 + $0xbd] sm:$0xff]  ;;  %v3180_v57 = vld [vmem:[%s6027_s20 + $0xc5] sm:$0xff] }
  0x9c   : > { %5087 = vmatmul.mubr.msk.f32.gmra.mrb[32].mxu1 %vm303_vm0, %v255_v35  ;;  %5370 = vmatmul.mubr.msk.f32.gmra.mrb[14].mxu0 %vm303_vm0, %v6263_v46  ;;  %v1011_v46 = vld [vmem:[%s6027_s20 + $0xa] sm:$0xff] }
  0x9d   : > { %5089 = vmatprep.mubr.msk.f32.mxu1 %vm303_vm0, %v256_v37  ;;  %5372 = vmatprep.mubr.msk.f32.mxu0 %vm303_vm0, %v6267_v48  ;;  %v6510_v48 = vld [vmem:[%s6027_s20 + $0x12] sm:$0xff]  ;;  %v3176_v35 = vld [vmem:[%s6027_s20 + $0xa5] sm:$0xff]  ;;  %v6752_v37 = vld [vmem:[%s6027_s20 + $0x11a] sm:$0xff] }
  0xa0   : > { %5090 = vmatmul.mubr.msk.f32.gmra.mrb[34].mxu1 %vm303_vm0, %v257_v40  ;;  %5373 = vmatmul.mubr.msk.f32.gmra.mrb[16].mxu0 %vm303_vm0, %v6283_v52  ;;  %v6524_v52 = vld [vmem:[%s6027_s20 + $0x22] sm:$0xff]  ;;  %v3177_v40 = vld [vmem:[%s6027_s20 + $0xad] sm:$0xff] }
  0xa1   : > { %5100 = vmatprep.mubr.msk.f32.mxu1 %vm303_vm0, %v1010_v42  ;;  %5375 = vmatprep.mubr.msk.f32.mxu0 %vm303_vm0, %v6287_v54  ;;  %v6533_v54 = vld [vmem:[%s6027_s20 + $0x2a] sm:$0xff]  ;;  %v3178_v42 = vld [vmem:[%s6027_s20 + $0xb5] sm:$0xff] }
  0xa4   : > { %5101 = vmatmul.mubr.msk.f32.vlgmr.msra.gmra.mrb[0].mxu1 %vm303_vm0, %v1011_v46  ;;  %5376 = vmatmul.mubr.msk.f32.gmra.mrb[18].mxu0 %vm303_vm0, %v6304_v59  ;;  %v6538_v59 = vld [vmem:[%s6027_s20 + $0x32] sm:$0xff] }
  0xa5   : > { %5553 = vmatpush3.bf16.msra.mxu1 %v6310_v62  ;;  %5103 = vmatprep.mubr.msk.f32.mxu1 %vm303_vm0, %v6510_v48  ;;  %v6553_v62 = vld [vmem:[%s6027_s20 + $0x42] sm:$0xff]  ;;  %v3181_v46 = vld [vmem:[%s6027_s20 + $0xcd] sm:$0xff] }
  0xa6   : > { %5378 = vmatprep.mubr.msk.f32.mxu0 %vm303_vm0, %v6308_v61  ;;  %5555 = vmatprep.subr.bf16.mxu1 %v5554_v58  ;;  %v6548_v61 = vld [vmem:[%s6027_s20 + $0x3a] sm:$0xff] }
  0xa8   : > { %5104 = vmatmul.mubr.msk.f32.gmra.mrb[2].mxu1 %vm303_vm0, %v6517_v60  ;;  %5379 = vmatmul.mubr.msk.f32.gmra.mrb[20].mxu0 %vm303_vm0, %v6320_v63  ;;  %v6567_v63 = vld [vmem:[%s6027_s20 + $0x52] sm:$0xff] }
  0xa9   : > { %5106 = vmatprep.mubr.msk.f32.mxu1 %vm303_vm0, %v6524_v52  ;;  %5381 = vmatprep.mubr.msk.f32.mxu0 %vm303_vm0, %v6324_v1  ;;  %v6581_v1 = vld [vmem:[%s6027_s20 + $0x62] sm:$0xff] }
  0xaa   : > { %5557 = vmatpush3.bf16.msra.mxu1 %v5554_v58  ;;  %v3184_v58 = vld [vmem:[%s6027_s20 + $0xe5] sm:$0xff] }
  0xab   : > { %5598 = vmatprep.subr.bf16.mxu1 %v5996_v7 }
  0xac   : > { %5107 = vmatmul.mubr.msk.f32.gmra.mrb[4].mxu1 %vm303_vm0, %v6533_v54  ;;  %5382 = vmatmul.mubr.msk.f32.gmra.mrb[22].mxu0 %vm303_vm0, %v6335_v3  ;;  %v6595_v3 = vld [vmem:[%s6027_s20 + $0x72] sm:$0xff] }
  0xad   : > { %5109 = vmatprep.mubr.msk.f32.mxu1 %vm303_vm0, %v6538_v59  ;;  %5384 = vmatprep.mubr.msk.f32.mxu0 %vm303_vm0, %v6339_v5  ;;  %v6609_v5 = vld [vmem:[%s6027_s20 + $0x82] sm:$0xff] }
  0xb0   : > { %5110 = vmatmul.mubr.msk.f32.gmra.mrb[6].mxu1 %vm303_vm0, %v6548_v61  ;;  %5385 = vmatmul.mubr.msk.f32.gmra.mrb[24].mxu0 %vm303_vm0, %v6349_v8  ;;  %v6619_v8 = vld [vmem:[%s6027_s20 + $0x8a] sm:$0xff] }
  0xb1   : > { %5112 = vmatprep.mubr.msk.f32.mxu1 %vm303_vm0, %v6553_v62  ;;  %5387 = vmatprep.mubr.msk.f32.mxu0 %vm303_vm0, %v6353_v11  ;;  %v6624_v11 = vld [vmem:[%s6027_s20 + $0x92] sm:$0xff] }
  0xb4   : > { %5113 = vmatmul.mubr.msk.f32.gmra.mrb[8].mxu1 %vm303_vm0, %v6562_v39  ;;  %5388 = vmatmul.mubr.msk.f32.gmra.mrb[26].mxu0 %vm303_vm0, %v6363_v14  ;;  %v4567_v14 = vld [vmem:[%s7089_s1 + $0x110] sm:$0xff] }
  0xb5   : > { %5115 = vmatprep.mubr.msk.f32.mxu1 %vm303_vm0, %v6567_v63  ;;  %5390 = vmatprep.mubr.msk.f32.mxu0 %vm303_vm0, %v6367_v17  ;;  %v6639_v17 = vld [vmem:[%s6027_s20 + $0x9a] sm:$0xff] }
  0xb8   : > { %5116 = vmatmul.mubr.msk.f32.gmra.mrb[10].mxu1 %vm303_vm0, %v6576_v0  ;;  %5391 = vmatmul.mubr.msk.f32.gmra.mrb[28].mxu0 %vm303_vm0, %v6377_v22  ;;  %v6644_v22 = vld [vmem:[%s6027_s20 + $0xa2] sm:$0xff] }
  0xb9   : > { %5118 = vmatprep.mubr.msk.f32.mxu1 %vm303_vm0, %v6581_v1  ;;  %5393 = vmatprep.mubr.msk.f32.mxu0 %vm303_vm0, %v6381_v26  ;;  %v5594_v26 = vpack.c.bf16 %v4568_v15, %v4567_v14  ;;  %v3599_v14 = vld [vmem:[%s6027_s20 + $0x6e] sm:$0xff]  ;;  %v3600_v15 = vld [vmem:[%s6027_s20 + $0x76] sm:$0xff] }
  0xbc   : > { %5119 = vmatmul.mubr.msk.f32.gmra.mrb[12].mxu1 %vm303_vm0, %v6590_v2  ;;  %5394 = vmatmul.mubr.msk.f32.gmra.mrb[30].mxu0 %vm303_vm0, %v6391_v30  ;;  %v3163_v30 = vld [vmem:[%s6027_s20 + $0x3d] sm:$0xff] }
  0xbd   : > { %5121 = vmatprep.mubr.msk.f32.mxu1 %vm303_vm0, %v6595_v3  ;;  %5396 = vmatprep.mubr.msk.f32.mxu0 %vm303_vm0, %v6395_v34  ;;  %v3164_v34 = vld [vmem:[%s6027_s20 + $0x45] sm:$0xff] }
  0xc0   : > { %5122 = vmatmul.mubr.msk.f32.gmra.mrb[14].mxu1 %vm303_vm0, %v6604_v4  ;;  %5397 = vmatmul.mubr.msk.f32.gmra.mrb[32].mxu0 %vm303_vm0, %v6405_v38  ;;  %v3165_v38 = vld [vmem:[%s6027_s20 + $0x4d] sm:$0xff] }
  0xc1   : > { %5124 = vmatprep.mubr.msk.f32.mxu1 %vm303_vm0, %v6609_v5  ;;  %5399 = vmatprep.mubr.msk.f32.mxu0 %vm303_vm0, %v2764_v6  ;;  %v3594_v6 = vld [vmem:[%s6027_s20 + $0x46] sm:$0xff] }
  0xc4   : > { %5125 = vmatmul.mubr.msk.f32.gmra.mrb[16].mxu1 %vm303_vm0, %v6619_v8  ;;  %5400 = vmatmul.mubr.msk.f32.gmra.mrb[34].mxu0 %vm303_vm0, %v2765_v9  ;;  %v3596_v9 = vld [vmem:[%s6027_s20 + $0x56] sm:$0xff] }
  0xc5   : > { %5127 = vmatprep.mubr.msk.f32.mxu1 %vm303_vm0, %v6624_v11  ;;  %5410 = vmatprep.mubr.msk.f32.mxu0 %vm303_vm0, %v3160_v13  ;;  %v3598_v13 = vld [vmem:[%s6027_s20 + $0x66] sm:$0xff] }
  0xc8   : > { %5128 = vmatmul.mubr.msk.f32.gmra.mrb[18].mxu1 %vm303_vm0, %v6639_v17  ;;  %5411 = vmatmul.mubr.msk.f32.vlgmr.msra.gmra.mrb[0].mxu0 %vm303_vm0, %v3161_v20  ;;  %v3602_v20 = vld [vmem:[%s6027_s20 + $0x86] sm:$0xff] }
  0xc9   : > { %5130 = vmatprep.mubr.msk.f32.mxu1 %vm303_vm0, %v6644_v22  ;;  %5593 = vmatpush3.bf16.msra.mxu0 %v6437_v56  ;;  %v6710_v56 = vld [vmem:[%s6027_s20 + $0xea] sm:$0xff] }
  0xca   : > { %5413 = vmatprep.mubr.msk.f32.mxu0 %vm303_vm0, %v3162_v24  ;;  %5595 = vmatprep.subr.bf16.mxu0 %v5594_v26  ;;  %v3604_v24 = vld [vmem:[%s6027_s20 + $0x96] sm:$0xff] }
  0xcc   : > { %5131 = vmatmul.mubr.msk.f32.gmra.mrb[20].mxu1 %vm303_vm0, %v6653_v28  ;;  %5414 = vmatmul.mubr.msk.f32.gmra.mrb[2].mxu0 %vm303_vm0, %v3163_v30  ;;  %v3606_v30 = vld [vmem:[%s6027_s20 + $0xa6] sm:$0xff] }
  0xcd   : > { %5133 = vmatprep.mubr.msk.f32.mxu1 %vm303_vm0, %v6659_v32  ;;  %5416 = vmatprep.mubr.msk.f32.mxu0 %vm303_vm0, %v3164_v34  ;;  %v3607_v34 = vld [vmem:[%s6027_s20 + $0xae] sm:$0xff] }
  0xce   : > { %5597 = vmatpush3.bf16.msra.mxu0 %v5594_v26  ;;  %v3605_v26 = vld [vmem:[%s6027_s20 + $0x9e] sm:$0xff] }
  0xd0   : > { %5134 = vmatmul.mubr.msk.f32.gmra.mrb[22].mxu1 %vm303_vm0, %v6668_v36  ;;  %5417 = vmatmul.mubr.msk.f32.gmra.mrb[4].mxu0 %vm303_vm0, %v3165_v38  ;;  %v3608_v38 = vld [vmem:[%s6027_s20 + $0xb6] sm:$0xff] }
  0xd1   : > { %5136 = vmatprep.mubr.msk.f32.mxu1 %vm303_vm0, %v6673_v41  ;;  %5419 = vmatprep.mubr.msk.f32.mxu0 %vm303_vm0, %v3166_v43  ;;  %v3609_v43 = vld [vmem:[%s6027_s20 + $0xbe] sm:$0xff] }
  0xd4   : > { %5137 = vmatmul.mubr.msk.f32.gmra.mrb[24].mxu1 %vm303_vm0, %v6682_v45  ;;  %5420 = vmatmul.mubr.msk.f32.gmra.mrb[6].mxu0 %vm303_vm0, %v3167_v47  ;;  %v3610_v47 = vld [vmem:[%s6027_s20 + $0xc6] sm:$0xff] }
  0xd5   : > { %5139 = vmatprep.mubr.msk.f32.mxu1 %vm303_vm0, %v6687_v49  ;;  %5422 = vmatprep.mubr.msk.f32.mxu0 %vm303_vm0, %v3168_v50  ;;  %v3611_v50 = vld [vmem:[%s6027_s20 + $0xce] sm:$0xff] }
  0xd8   : > { %5140 = vmatmul.mubr.msk.f32.gmra.mrb[26].mxu1 %vm303_vm0, %v6696_v51  ;;  %5423 = vmatmul.mubr.msk.f32.gmra.mrb[8].mxu0 %vm303_vm0, %v3169_v53  ;;  %v3612_v53 = vld [vmem:[%s6027_s20 + $0xd6] sm:$0xff] }
  0xd9   : > { %5142 = vmatprep.mubr.msk.f32.mxu1 %vm303_vm0, %v6701_v10  ;;  %5425 = vmatprep.mubr.msk.f32.mxu0 %vm303_vm0, %v3170_v55  ;;  %v3613_v55 = vld [vmem:[%s6027_s20 + $0xde] sm:$0xff] }
  0xdc   : > { %5143 = vmatmul.mubr.msk.f32.gmra.mrb[28].mxu1 %vm303_vm0, %v6710_v56  ;;  %5426 = vmatmul.mubr.msk.f32.gmra.mrb[10].mxu0 %vm303_vm0, %v3171_v16  ;;  %v3614_v16 = vld [vmem:[%s6027_s20 + $0xe6] sm:$0xff] }
  0xdd   : > { %5145 = vmatprep.mubr.msk.f32.mxu1 %vm303_vm0, %v6715_v19  ;;  %5428 = vmatprep.mubr.msk.f32.mxu0 %vm303_vm0, %v3172_v18  ;;  %v3615_v18 = vld [vmem:[%s6027_s20 + $0xee] sm:$0xff] }
  0xe0   : > { %5146 = vmatmul.mubr.msk.f32.gmra.mrb[30].mxu1 %vm303_vm0, %v6724_v21  ;;  %5429 = vmatmul.mubr.msk.f32.gmra.mrb[12].mxu0 %vm303_vm0, %v3173_v23  ;;  %v3616_v23 = vld [vmem:[%s6027_s20 + $0xf6] sm:$0xff] }
  0xe1   : > { %5148 = vmatprep.mubr.msk.f32.mxu1 %vm303_vm0, %v6729_v25  ;;  %5431 = vmatprep.mubr.msk.f32.mxu0 %vm303_vm0, %v3174_v27  ;;  %v3617_v27 = vld [vmem:[%s6027_s20 + $0xfe] sm:$0xff] }
  0xe4   : > { %5149 = vmatmul.mubr.msk.f32.gmra.mrb[32].mxu1 %vm303_vm0, %v6738_v29  ;;  %5432 = vmatmul.mubr.msk.f32.gmra.mrb[14].mxu0 %vm303_vm0, %v3175_v31  ;;  %v3618_v31 = vld [vmem:[%s6027_s20 + $0x106] sm:$0xff] }
  0xe5   : > { %5151 = vmatprep.mubr.msk.f32.mxu1 %vm303_vm0, %v6743_v33  ;;  %5434 = vmatprep.mubr.msk.f32.mxu0 %vm303_vm0, %v3176_v35  ;;  %v3619_v35 = vld [vmem:[%s6027_s20 + $0x10e] sm:$0xff] }
  0xe8   : > { %5152 = vmatmul.mubr.msk.f32.gmra.mrb[34].mxu1 %vm303_vm0, %v6752_v37  ;;  %5435 = vmatmul.mubr.msk.f32.gmra.mrb[16].mxu0 %vm303_vm0, %v3177_v40  ;;  %v3620_v40 = vld [vmem:[%s6027_s20 + $0x116] sm:$0xff] }
  0xe9   : > { %5162 = vmatprep.mubr.msk.f32.mxu1 %vm303_vm0, %v6510_v48  ;;  %5437 = vmatprep.mubr.msk.f32.mxu0 %vm303_vm0, %v3178_v42  ;;  %v3182_v48 = vld [vmem:[%s6027_s20 + $0xd5] sm:$0xff]  ;;  %v1901_v42 = vld [vmem:[%s6027_s20 + $0x10b] sm:$0xff] }
  0xec   : > { %5163 = vmatmul.mubr.msk.f32.vlgmr.msra.gmra.mrb[0].mxu1 %vm303_vm0, %v6517_v60  ;;  %5438 = vmatmul.mubr.msk.f32.gmra.mrb[18].mxu0 %vm303_vm0, %v3179_v44  ;;  %v3185_v60 = vld [vmem:[%s6027_s20 + $0xed] sm:$0xff]  ;;  %v3621_v44 = vld [vmem:[%s6027_s20 + $0x11e] sm:$0xff] }
  0xed   : > { %5600 = vmatpush3.bf16.msra.mxu1 %v5996_v7  ;;  %5165 = vmatprep.mubr.msk.f32.mxu1 %vm303_vm0, %v6524_v52  ;;  %v3183_v7 = vld [vmem:[%s6027_s20 + $0xdd] sm:$0xff]  ;;  %v3186_v52 = vld [vmem:[%s6027_s20 + $0xf5] sm:$0xff] }
  0xee   : > { %5440 = vmatprep.mubr.msk.f32.mxu0 %vm303_vm0, %v3180_v57  ;;  %5599 = vmatprep.subr.bf16.mxu1 %v6009_v12  ;;  %v1902_v57 = vld [vmem:[%s6027_s20 + $0x113] sm:$0xff] }
  0xf0   : > { %5166 = vmatmul.mubr.msk.f32.gmra.mrb[2].mxu1 %vm303_vm0, %v6533_v54  ;;  %5441 = vmatmul.mubr.msk.f32.gmra.mrb[20].mxu0 %vm303_vm0, %v3181_v46  ;;  %v3188_v54 = vld [vmem:[%s6027_s20 + $0x105] sm:$0xff] }
  0xf1   : > { %5168 = vmatprep.mubr.msk.f32.mxu1 %vm303_vm0, %v6538_v59  ;;  %5443 = vmatprep.mubr.msk.f32.mxu0 %vm303_vm0, %v3182_v48  ;;  %v3189_v59 = vld [vmem:[%s6027_s20 + $0x10d] sm:$0xff]  ;;  %v1903_v48 = vld [vmem:[%s6027_s20 + $0x11b] sm:$0xff] }
  0xf2   : > { %5601 = vmatpush3.bf16.msra.mxu1 %v6009_v12  ;;  %v3187_v12 = vld [vmem:[%s6027_s20 + $0xfd] sm:$0xff]  ;;  %v3622_v46 = vld [vmem:[%s6027_s20 + $0x126] sm:$0xff] }
  0xf4   : > { %5169 = vmatmul.mubr.msk.f32.gmra.mrb[4].mxu1 %vm303_vm0, %v6548_v61  ;;  %5444 = vmatmul.mubr.msk.f32.gmra.mrb[22].mxu0 %vm303_vm0, %v3183_v7  ;;  %v3190_v61 = vld [vmem:[%s6027_s20 + $0x115] sm:$0xff] }
  0xf5   : > { %5171 = vmatprep.mubr.msk.f32.mxu1 %vm303_vm0, %v6553_v62  ;;  %5446 = vmatprep.mubr.msk.f32.mxu0 %vm303_vm0, %v3184_v58  ;;  %v3191_v62 = vld [vmem:[%s6027_s20 + $0x11d] sm:$0xff]  ;;  %v3623_v7 = vld [vmem:[%s6027_s20 + $0x12e] sm:$0xff] }
  0xf6   : > { %v1904_v58 = vld [vmem:[%s6027_s20 + $0x123] sm:$0xff] }
  0xf8   : > { %5172 = vmatmul.mubr.msk.f32.gmra.mrb[6].mxu1 %vm303_vm0, %v6562_v39  ;;  %5447 = vmatmul.mubr.msk.f32.gmra.mrb[24].mxu0 %vm303_vm0, %v3185_v60  ;;  %v3192_v39 = vld [vmem:[%s6027_s20 + $0x125] sm:$0xff]  ;;  %v3624_v60 = vld [vmem:[%s6027_s20 + $0x136] sm:$0xff] }
  0xf9   : > { %5174 = vmatprep.mubr.msk.f32.mxu1 %vm303_vm0, %v6567_v63  ;;  %5449 = vmatprep.mubr.msk.f32.mxu0 %vm303_vm0, %v3186_v52  ;;  %v3193_v63 = vld [vmem:[%s6027_s20 + $0x12d] sm:$0xff] }
  0xfa   : > { %v1905_v52 = vld [vmem:[%s6027_s20 + $0x12b] sm:$0xff] }
  0xfc   : > { %5175 = vmatmul.mubr.msk.f32.gmra.mrb[8].mxu1 %vm303_vm0, %v6576_v0  ;;  %5450 = vmatmul.mubr.msk.f32.gmra.mrb[26].mxu0 %vm303_vm0, %v3187_v12  ;;  %v3194_v0 = vld [vmem:[%s6027_s20 + $0x135] sm:$0xff]  ;;  %v3625_v12 = vld [vmem:[%s6027_s20 + $0x13e] sm:$0xff] }
  0xfd   : > { %5177 = vmatprep.mubr.msk.f32.mxu1 %vm303_vm0, %v6581_v1  ;;  %5452 = vmatprep.mubr.msk.f32.mxu0 %vm303_vm0, %v3188_v54  ;;  %v3195_v1 = vld [vmem:[%s6027_s20 + $0x13d] sm:$0xff] }
 0x100   : > { %5178 = vmatmul.mubr.msk.f32.gmra.mrb[10].mxu1 %vm303_vm0, %v6590_v2  ;;  %5453 = vmatmul.mubr.msk.f32.gmra.mrb[28].mxu0 %vm303_vm0, %v3189_v59  ;;  %v3590_v2 = vld [vmem:[%s6027_s20 + $0x26] sm:$0xff] }
 0x101   : > { %5180 = vmatprep.mubr.msk.f32.mxu1 %vm303_vm0, %v6595_v3  ;;  %5455 = vmatprep.mubr.msk.f32.mxu0 %vm303_vm0, %v3190_v61  ;;  %v3591_v3 = vld [vmem:[%s6027_s20 + $0x2e] sm:$0xff] }
 0x104   : > { %5181 = vmatmul.mubr.msk.f32.gmra.mrb[12].mxu1 %vm303_vm0, %v6604_v4  ;;  %5456 = vmatmul.mubr.msk.f32.gmra.mrb[30].mxu0 %vm303_vm0, %v3191_v62  ;;  %v3592_v4 = vld [vmem:[%s6027_s20 + $0x36] sm:$0xff] }
 0x105   : > { %5183 = vmatprep.mubr.msk.f32.mxu1 %vm303_vm0, %v6609_v5  ;;  %5458 = vmatprep.mubr.msk.f32.mxu0 %vm303_vm0, %v3192_v39  ;;  %v3593_v5 = vld [vmem:[%s6027_s20 + $0x3e] sm:$0xff] }
 0x108   : > { %5184 = vmatmul.mubr.msk.f32.gmra.mrb[14].mxu1 %vm303_vm0, %v6619_v8  ;;  %5459 = vmatmul.mubr.msk.f32.gmra.mrb[32].mxu0 %vm303_vm0, %v3193_v63  ;;  %v3595_v8 = vld [vmem:[%s6027_s20 + $0x4e] sm:$0xff] }
 0x109   : > { %5186 = vmatprep.mubr.msk.f32.mxu1 %vm303_vm0, %v6624_v11  ;;  %5461 = vmatprep.mubr.msk.f32.mxu0 %vm303_vm0, %v3194_v0  ;;  %v3597_v11 = vld [vmem:[%s6027_s20 + $0x5e] sm:$0xff] }
 0x10c   : > { %5187 = vmatmul.mubr.msk.f32.gmra.mrb[16].mxu1 %vm303_vm0, %v6639_v17  ;;  %5462 = vmatmul.mubr.msk.f32.gmra.mrb[34].mxu0 %vm303_vm0, %v3195_v1  ;;  %v3601_v17 = vld [vmem:[%s6027_s20 + $0x7e] sm:$0xff] }
 0x10d   : > { %5189 = vmatprep.mubr.msk.f32.mxu1 %vm303_vm0, %v6644_v22  ;;  %5472 = vmatprep.mubr.msk.f32.mxu0 %vm303_vm0, %v3590_v2  ;;  %v3603_v22 = vld [vmem:[%s6027_s20 + $0x8e] sm:$0xff] }
 0x110   : > { %5190 = vmatmul.mubr.msk.f32.gmra.mrb[18].mxu1 %vm303_vm0, %v6653_v28  ;;  %5473 = vmatmul.mubr.msk.f32.vlgmr.msra.gmra.mrb[0].mxu0 %vm303_vm0, %v3591_v3  ;;  %v1474_v28 = vld [vmem:[%s6027_s20 + $0x122] sm:$0xff] }
 0x111   : > { %5192 = vmatprep.mubr.msk.f32.mxu1 %vm303_vm0, %v6659_v32  ;;  %5475 = vmatprep.mubr.msk.f32.mxu0 %vm303_vm0, %v3592_v4  ;;  %v1475_v32 = vld [vmem:[%s6027_s20 + $0x12a] sm:$0xff] }
 0x114   : > { %5193 = vmatmul.mubr.msk.f32.gmra.mrb[20].mxu1 %vm303_vm0, %v6668_v36  ;;  %5476 = vmatmul.mubr.msk.f32.gmra.mrb[2].mxu0 %vm303_vm0, %v3593_v5  ;;  %v1888_v36 = vld [vmem:[%s6027_s20 + $0xa3] sm:$0xff] }
 0x115   : > { %5195 = vmatprep.mubr.msk.f32.mxu1 %vm303_vm0, %v6673_v41  ;;  %5478 = vmatprep.mubr.msk.f32.mxu0 %vm303_vm0, %v3594_v6  ;;  %v1889_v41 = vld [vmem:[%s6027_s20 + $0xab] sm:$0xff] }
 0x118   : > { %5196 = vmatmul.mubr.msk.f32.gmra.mrb[22].mxu1 %vm303_vm0, %v6682_v45  ;;  %5479 = vmatmul.mubr.msk.f32.gmra.mrb[4].mxu0 %vm303_vm0, %v3595_v8  ;;  %v1890_v45 = vld [vmem:[%s6027_s20 + $0xb3] sm:$0xff] }
 0x119   : > { %5198 = vmatprep.mubr.msk.f32.mxu1 %vm303_vm0, %v6687_v49  ;;  %5481 = vmatprep.mubr.msk.f32.mxu0 %vm303_vm0, %v3596_v9  ;;  %v1891_v49 = vld [vmem:[%s6027_s20 + $0xbb] sm:$0xff] }
 0x11c   : > { %5199 = vmatmul.mubr.msk.f32.gmra.mrb[24].mxu1 %vm303_vm0, %v6696_v51  ;;  %5482 = vmatmul.mubr.msk.f32.gmra.mrb[6].mxu0 %vm303_vm0, %v3597_v11  ;;  %v1892_v51 = vld [vmem:[%s6027_s20 + $0xc3] sm:$0xff] }
 0x11d   : > { %5201 = vmatprep.mubr.msk.f32.mxu1 %vm303_vm0, %v6701_v10  ;;  %5484 = vmatprep.mubr.msk.f32.mxu0 %vm303_vm0, %v3598_v13  ;;  %v1893_v10 = vld [vmem:[%s6027_s20 + $0xcb] sm:$0xff] }
 0x120   : > { %5202 = vmatmul.mubr.msk.f32.gmra.mrb[26].mxu1 %vm303_vm0, %v6710_v56  ;;  %5485 = vmatmul.mubr.msk.f32.gmra.mrb[8].mxu0 %vm303_vm0, %v3599_v14  ;;  %v1894_v56 = vld [vmem:[%s6027_s20 + $0xd3] sm:$0xff] }
 0x121   : > { %5204 = vmatprep.mubr.msk.f32.mxu1 %vm303_vm0, %v6715_v19  ;;  %5487 = vmatprep.mubr.msk.f32.mxu0 %vm303_vm0, %v3600_v15  ;;  %v1895_v19 = vld [vmem:[%s6027_s20 + $0xdb] sm:$0xff] }
 0x124   : > { %5205 = vmatmul.mubr.msk.f32.gmra.mrb[28].mxu1 %vm303_vm0, %v6724_v21  ;;  %5488 = vmatmul.mubr.msk.f32.gmra.mrb[10].mxu0 %vm303_vm0, %v3601_v17  ;;  %v1896_v21 = vld [vmem:[%s6027_s20 + $0xe3] sm:$0xff]  ;;  %v6994_v17 = vld [vmem:[%s7090_s2] ss:$0 sm:$0xff] }
 0x125   : > { %5207 = vmatprep.mubr.msk.f32.mxu1 %vm303_vm0, %v6729_v25  ;;  %5490 = vmatprep.mubr.msk.f32.mxu0 %vm303_vm0, %v3602_v20  ;;  %v1897_v25 = vld [vmem:[%s6027_s20 + $0xeb] sm:$0xff] }
 0x128   : > { %5208 = vmatmul.mubr.msk.f32.gmra.mrb[30].mxu1 %vm303_vm0, %v6738_v29  ;;  %5491 = vmatmul.mubr.msk.f32.gmra.mrb[12].mxu0 %vm303_vm0, %v3603_v22  ;;  %v1898_v29 = vld [vmem:[%s6027_s20 + $0xf3] sm:$0xff] }
 0x129   : > { %5210 = vmatprep.mubr.msk.f32.mxu1 %vm303_vm0, %v6743_v33  ;;  %5493 = vmatprep.mubr.msk.f32.mxu0 %vm303_vm0, %v3604_v24  ;;  %v1899_v33 = vld [vmem:[%s6027_s20 + $0xfb] sm:$0xff] }
 0x12c   : > { %5211 = vmatmul.mubr.msk.f32.gmra.mrb[32].mxu1 %vm303_vm0, %v6752_v37  ;;  %5494 = vmatmul.mubr.msk.f32.gmra.mrb[14].mxu0 %vm303_vm0, %v3605_v26  ;;  %v1900_v37 = vld [vmem:[%s6027_s20 + $0x103] sm:$0xff]  ;;  %s5891_s20 = smul.u32 288, %s7097_s12 }
 0x12d   : > { %5213 = vmatprep.mubr.msk.f32.mxu1 %vm303_vm0, %v1474_v28  ;;  %5496 = vmatprep.mubr.msk.f32.mxu0 %vm303_vm0, %v3606_v30 }
 0x12e   : > { %s7000_s29 = scalar_lea.vmem %s7091_s3, %s5891_s20 }
 0x130   : > { %5214 = vmatmul.mubr.msk.f32.gmra.mrb[34].mxu1 %vm303_vm0, %v1475_v32  ;;  %5497 = vmatmul.mubr.msk.f32.gmra.mrb[16].mxu0 %vm303_vm0, %v3607_v34 }
 0x131   : > { %5251 = vmatprep.mubr.msk.f32.mxu1 %vm303_vm0, %v1888_v36  ;;  %5499 = vmatprep.mubr.msk.f32.mxu0 %vm303_vm0, %v3608_v38 }
 0x134   : > { %5252 = vmatmul.mubr.msk.f32.vlgmr.msra.gmra.mrb[18].mxu1 %vm303_vm0, %v1889_v41  ;;  %5500 = vmatmul.mubr.msk.f32.gmra.mrb[18].mxu0 %vm303_vm0, %v3609_v43 }
 0x135   : > { %5254 = vmatprep.mubr.msk.f32.mxu1 %vm303_vm0, %v1890_v45  ;;  %5502 = vmatprep.mubr.msk.f32.mxu0 %vm303_vm0, %v3610_v47 }
 0x138   : > { %5255 = vmatmul.mubr.msk.f32.gmra.mrb[20].mxu1 %vm303_vm0, %v1891_v49  ;;  %5503 = vmatmul.mubr.msk.f32.gmra.mrb[20].mxu0 %vm303_vm0, %v3611_v50 }
 0x139   : > { %5257 = vmatprep.mubr.msk.f32.mxu1 %vm303_vm0, %v1892_v51  ;;  %5505 = vmatprep.mubr.msk.f32.mxu0 %vm303_vm0, %v3612_v53 }
 0x13c   : > { %5258 = vmatmul.mubr.msk.f32.gmra.mrb[22].mxu1 %vm303_vm0, %v1893_v10  ;;  %5506 = vmatmul.mubr.msk.f32.gmra.mrb[22].mxu0 %vm303_vm0, %v3613_v55 }
 0x13d   : > { %5260 = vmatprep.mubr.msk.f32.mxu1 %vm303_vm0, %v1894_v56  ;;  %5508 = vmatprep.mubr.msk.f32.mxu0 %vm303_vm0, %v3614_v16 }
 0x140   : > { %5261 = vmatmul.mubr.msk.f32.gmra.mrb[24].mxu1 %vm303_vm0, %v1895_v19  ;;  %5509 = vmatmul.mubr.msk.f32.gmra.mrb[24].mxu0 %vm303_vm0, %v3615_v18 }
 0x141   : > { %5263 = vmatprep.mubr.msk.f32.mxu1 %vm303_vm0, %v1896_v21  ;;  %5511 = vmatprep.mubr.msk.f32.mxu0 %vm303_vm0, %v3616_v23 }
 0x144   : > { %5264 = vmatmul.mubr.msk.f32.gmra.mrb[26].mxu1 %vm303_vm0, %v1897_v25  ;;  %5512 = vmatmul.mubr.msk.f32.gmra.mrb[26].mxu0 %vm303_vm0, %v3617_v27 }
 0x145   : > { %5266 = vmatprep.mubr.msk.f32.mxu1 %vm303_vm0, %v1898_v29  ;;  %5514 = vmatprep.mubr.msk.f32.mxu0 %vm303_vm0, %v3618_v31 }
 0x148   : > { %5267 = vmatmul.mubr.msk.f32.gmra.mrb[28].mxu1 %vm303_vm0, %v1899_v33  ;;  %5515 = vmatmul.mubr.msk.f32.gmra.mrb[28].mxu0 %vm303_vm0, %v3619_v35 }
 0x149   : > { %5269 = vmatprep.mubr.msk.f32.mxu1 %vm303_vm0, %v1900_v37  ;;  %5517 = vmatprep.mubr.msk.f32.mxu0 %vm303_vm0, %v3620_v40 }
 0x14c   : > { %5270 = vmatmul.mubr.msk.f32.gmra.mrb[30].mxu1 %vm303_vm0, %v1901_v42  ;;  %5518 = vmatmul.mubr.msk.f32.gmra.mrb[30].mxu0 %vm303_vm0, %v3621_v44 }
 0x14d   : > { %5272 = vmatprep.mubr.msk.f32.mxu1 %vm303_vm0, %v1902_v57  ;;  %5520 = vmatprep.mubr.msk.f32.mxu0 %vm303_vm0, %v3622_v46 }
 0x150   : > { %5273 = vmatmul.mubr.msk.f32.gmra.mrb[32].mxu1 %vm303_vm0, %v1903_v48  ;;  %5521 = vmatmul.mubr.msk.f32.gmra.mrb[32].mxu0 %vm303_vm0, %v3623_v7 }
 0x151   : > { %5275 = vmatprep.mubr.msk.f32.mxu1 %vm303_vm0, %v1904_v58  ;;  %5523 = vmatprep.mubr.msk.f32.mxu0 %vm303_vm0, %v3624_v60 }
 0x154   : > { %5276 = vmatmul.mubr.msk.f32.gmra.mrb[34].mxu1 %vm303_vm0, %v1905_v52  ;;  %5524 = vmatmul.mubr.msk.f32.gmra.mrb[34].mxu0 %vm303_vm0, %v3625_v12 }
 0x1bf   : > { %v5164_v54 = vpop.f32.mrb[0].mxu1 }
 0x1c0   : > { %v1655_v59 = vpop.f32.mrb[1].mxu1 }
 0x1c3   : > { %v5167_v61 = vpop.f32.mrb[2].mxu1 }
 0x1c4   : > { %v1665_v62 = vpop.f32.mrb[3].mxu1 }
 0x1c7   : > { %v5170_v39 = vpop.f32.mrb[4].mxu1 }
 0x1c8   : > { %v1675_v63 = vpop.f32.mrb[5].mxu1 }
 0x1cb   : > { %v5173_v0 = vpop.f32.mrb[6].mxu1 }
 0x1cc   : > { %v1685_v1 = vpop.f32.mrb[7].mxu1 }
 0x1cf   : > { %v5176_v2 = vpop.f32.mrb[8].mxu1 }
 0x1d0   : > { %v1695_v3 = vpop.f32.mrb[9].mxu1 }
 0x1d3   : > { %v5179_v4 = vpop.f32.mrb[10].mxu1 }
 0x1d4   : > { %v1705_v5 = vpop.f32.mrb[11].mxu1 }
 0x1d7   : > { %v6978_v6 = vpop.f32.mrb[12].mxu1 }
 0x1d8   : > { %v6980_v8 = vpop.f32.mrb[13].mxu1 }
 0x1db   : > { %v6982_v9 = vpop.f32.mrb[14].mxu1 }
 0x1dc   : > { %v6984_v11 = vpop.f32.mrb[15].mxu1 }
 0x1df   : > { %v6986_v13 = vpop.f32.mrb[16].mxu1 }
 0x1e0   : > { %v6988_v14 = vpop.f32.mrb[17].mxu1 }
 0x1e3   : > { %v5474_v15 = vpop.f32.mrb[0].mxu0 }
 0x1e4   : > { %v5602_v20 = vadd.f32 %v5474_v15, %v5164_v54  ;;  %v3805_v22 = vpop.f32.mrb[1].mxu0 }
 0x1e5   : > { %v5603_v24 = vadd.f32 %v3805_v22, %v1655_v59 }
 0x1e6   : > { %v4028_v26 = vadd.f32 %v5602_v20, %v6994_v17 }
 0x1e7   : > { %v4027_v28 = vadd.f32 %v5603_v24, %v6994_v17  ;;  %v5477_v30 = vpop.f32.mrb[2].mxu0 }
 0x1e8   : > { %v4064_v32 = vmul.f32 0.05, %v4028_v26  ;;  %v5604_v34 = vadd.f32 %v5477_v30, %v5167_v61  ;;  %v3815_v36 = vpop.f32.mrb[3].mxu0 }
 0x1e9   : > { %v4063_v38 = vmul.f32 0.05, %v4027_v28  ;;  %v5605_v41 = vadd.f32 %v3815_v36, %v1665_v62 }
 0x1ea   : > { %4100 = vst [vmem:[%s7000_s29 + $0x8] sm:$0xff] %v4064_v32  ;;  %v4030_v43 = vadd.f32 %v5604_v34, %v6994_v17 }
 0x1eb   : > { %4099 = vst [vmem:[%s7000_s29] sm:$0xff] %v4063_v38  ;;  %v4029_v45 = vadd.f32 %v5605_v41, %v6994_v17  ;;  %v5480_v47 = vpop.f32.mrb[4].mxu0 }
 0x1ec   : > { %v4066_v49 = vmul.f32 0.05, %v4030_v43  ;;  %v5606_v50 = vadd.f32 %v5480_v47, %v5170_v39  ;;  %v3825_v51 = vpop.f32.mrb[5].mxu0 }
 0x1ed   : > { %v4065_v53 = vmul.f32 0.05, %v4029_v45  ;;  %v5607_v10 = vadd.f32 %v3825_v51, %v1675_v63 }
 0x1ee   : > { %4102 = vst [vmem:[%s7000_s29 + $0x18] sm:$0xff] %v4066_v49  ;;  %v4032_v55 = vadd.f32 %v5606_v50, %v6994_v17 }
 0x1ef   : > { %4101 = vst [vmem:[%s7000_s29 + $0x10] sm:$0xff] %v4065_v53  ;;  %v4031_v56 = vadd.f32 %v5607_v10, %v6994_v17  ;;  %v5483_v16 = vpop.f32.mrb[6].mxu0 }
 0x1f0   : > { %v4068_v19 = vmul.f32 0.05, %v4032_v55  ;;  %v5608_v18 = vadd.f32 %v5483_v16, %v5173_v0  ;;  %v3835_v21 = vpop.f32.mrb[7].mxu0 }
 0x1f1   : > { %v4067_v23 = vmul.f32 0.05, %v4031_v56  ;;  %v5609_v25 = vadd.f32 %v3835_v21, %v1685_v1 }
 0x1f2   : > { %4104 = vst [vmem:[%s7000_s29 + $0x28] sm:$0xff] %v4068_v19  ;;  %v4034_v27 = vadd.f32 %v5608_v18, %v6994_v17 }
 0x1f3   : > { %4103 = vst [vmem:[%s7000_s29 + $0x20] sm:$0xff] %v4067_v23  ;;  %v4033_v29 = vadd.f32 %v5609_v25, %v6994_v17  ;;  %v5486_v31 = vpop.f32.mrb[8].mxu0 }
 0x1f4   : > { %v4070_v33 = vmul.f32 0.05, %v4034_v27  ;;  %v5610_v35 = vadd.f32 %v5486_v31, %v5176_v2  ;;  %v3845_v37 = vpop.f32.mrb[9].mxu0 }
 0x1f5   : > { %v4069_v40 = vmul.f32 0.05, %v4033_v29  ;;  %v5611_v42 = vadd.f32 %v3845_v37, %v1695_v3 }
 0x1f6   : > { %4106 = vst [vmem:[%s7000_s29 + $0x38] sm:$0xff] %v4070_v33  ;;  %v4036_v44 = vadd.f32 %v5610_v35, %v6994_v17 }
 0x1f7   : > { %4105 = vst [vmem:[%s7000_s29 + $0x30] sm:$0xff] %v4069_v40  ;;  %v4035_v57 = vadd.f32 %v5611_v42, %v6994_v17  ;;  %v5489_v46 = vpop.f32.mrb[10].mxu0 }
 0x1f8   : > { %v4072_v48 = vmul.f32 0.05, %v4036_v44  ;;  %v5612_v7 = vadd.f32 %v5489_v46, %v5179_v4  ;;  %v3855_v58 = vpop.f32.mrb[11].mxu0 }
 0x1f9   : > { %v4071_v60 = vmul.f32 0.05, %v4035_v57  ;;  %v5613_v52 = vadd.f32 %v3855_v58, %v1705_v5 }
 0x1fa   : > { %4108 = vst [vmem:[%s7000_s29 + $0x48] sm:$0xff] %v4072_v48  ;;  %v4038_v12 = vadd.f32 %v5612_v7, %v6994_v17 }
 0x1fb   : > { %4107 = vst [vmem:[%s7000_s29 + $0x40] sm:$0xff] %v4071_v60  ;;  %v4037_v54 = vadd.f32 %v5613_v52, %v6994_v17  ;;  %v5492_v59 = vpop.f32.mrb[12].mxu0 }
 0x1fc   : > { %v4074_v61 = vmul.f32 0.05, %v4038_v12  ;;  %v5614_v62 = vadd.f32 %v5492_v59, %v6978_v6  ;;  %v3865_v39 = vpop.f32.mrb[13].mxu0 }
 0x1fd   : > { %v4073_v63 = vmul.f32 0.05, %v4037_v54  ;;  %v5615_v0 = vadd.f32 %v3865_v39, %v6980_v8 }
 0x1fe   : > { %4110 = vst [vmem:[%s7000_s29 + $0x58] sm:$0xff] %v4074_v61  ;;  %v4040_v1 = vadd.f32 %v5614_v62, %v6994_v17 }
 0x1ff   : > { %4109 = vst [vmem:[%s7000_s29 + $0x50] sm:$0xff] %v4073_v63  ;;  %v4039_v2 = vadd.f32 %v5615_v0, %v6994_v17  ;;  %v5495_v3 = vpop.f32.mrb[14].mxu0 }
 0x200   : > { %v4076_v4 = vmul.f32 0.05, %v4040_v1  ;;  %v5616_v5 = vadd.f32 %v5495_v3, %v6982_v9  ;;  %v3875_v15 = vpop.f32.mrb[15].mxu0 }
 0x201   : > { %v4075_v20 = vmul.f32 0.05, %v4039_v2  ;;  %v5617_v6 = vadd.f32 %v3875_v15, %v6984_v11 }
 0x202   : > { %4112 = vst [vmem:[%s7000_s29 + $0x68] sm:$0xff] %v4076_v4  ;;  %v4042_v22 = vadd.f32 %v5616_v5, %v6994_v17 }
 0x203   : > { %4111 = vst [vmem:[%s7000_s29 + $0x60] sm:$0xff] %v4075_v20  ;;  %v4041_v8 = vadd.f32 %v5617_v6, %v6994_v17  ;;  %v5498_v24 = vpop.f32.mrb[16].mxu0 }
 0x204   : > { %v4078_v26 = vmul.f32 0.05, %v4042_v22  ;;  %v5618_v28 = vadd.f32 %v5498_v24, %v6986_v13  ;;  %v3885_v30 = vpop.f32.mrb[17].mxu0 }
 0x205   : > { %v4077_v32 = vmul.f32 0.05, %v4041_v8  ;;  %v5619_v9 = vadd.f32 %v3885_v30, %v6988_v14 }
 0x206   : > { %4114 = vst [vmem:[%s7000_s29 + $0x78] sm:$0xff] %v4078_v26  ;;  %v4044_v34 = vadd.f32 %v5618_v28, %v6994_v17 }
 0x207   : > { %v5253_v11 = vpop.f32.mrb[18].mxu1  ;;  %4113 = vst [vmem:[%s7000_s29 + $0x70] sm:$0xff] %v4077_v32  ;;  %v4043_v36 = vadd.f32 %v5619_v9, %v6994_v17  ;;  %v5501_v38 = vpop.f32.mrb[18].mxu0 }
 0x208   : > { %v2175_v41 = vpop.f32.mrb[19].mxu1  ;;  %v4080_v43 = vmul.f32 0.05, %v4044_v34  ;;  %v5620_v45 = vadd.f32 %v5501_v38, %v5253_v11  ;;  %v3895_v47 = vpop.f32.mrb[19].mxu0 }
 0x209   : > { %v4079_v13 = vmul.f32 0.05, %v4043_v36  ;;  %v5621_v49 = vadd.f32 %v3895_v47, %v2175_v41 }
 0x20a   : > { %4116 = vst [vmem:[%s7000_s29 + $0x88] sm:$0xff] %v4080_v43  ;;  %v4046_v14 = vadd.f32 %v5620_v45, %v6994_v17 }
 0x20b   : > { %v5256_v50 = vpop.f32.mrb[20].mxu1  ;;  %4115 = vst [vmem:[%s7000_s29 + $0x80] sm:$0xff] %v4079_v13  ;;  %v4045_v51 = vadd.f32 %v5621_v49, %v6994_v17  ;;  %v5504_v53 = vpop.f32.mrb[20].mxu0 }
 0x20c   : > { %v2185_v10 = vpop.f32.mrb[21].mxu1  ;;  %v4082_v55 = vmul.f32 0.05, %v4046_v14  ;;  %v5622_v56 = vadd.f32 %v5504_v53, %v5256_v50  ;;  %v3905_v16 = vpop.f32.mrb[21].mxu0 }
 0x20d   : > { %v4081_v19 = vmul.f32 0.05, %v4045_v51  ;;  %v5623_v18 = vadd.f32 %v3905_v16, %v2185_v10 }
 0x20e   : > { %4118 = vst [vmem:[%s7000_s29 + $0x98] sm:$0xff] %v4082_v55  ;;  %v4048_v21 = vadd.f32 %v5622_v56, %v6994_v17 }
 0x20f   : > { %v5259_v23 = vpop.f32.mrb[22].mxu1  ;;  %4117 = vst [vmem:[%s7000_s29 + $0x90] sm:$0xff] %v4081_v19  ;;  %v4047_v25 = vadd.f32 %v5623_v18, %v6994_v17  ;;  %v5507_v27 = vpop.f32.mrb[22].mxu0 }
 0x210   : > { %v2195_v29 = vpop.f32.mrb[23].mxu1  ;;  %v4084_v31 = vmul.f32 0.05, %v4048_v21  ;;  %v5624_v33 = vadd.f32 %v5507_v27, %v5259_v23  ;;  %v3915_v35 = vpop.f32.mrb[23].mxu0 }
 0x211   : > { %v4083_v37 = vmul.f32 0.05, %v4047_v25  ;;  %v5625_v40 = vadd.f32 %v3915_v35, %v2195_v29 }
 0x212   : > { %4120 = vst [vmem:[%s7000_s29 + $0xa8] sm:$0xff] %v4084_v31  ;;  %v4050_v42 = vadd.f32 %v5624_v33, %v6994_v17 }
 0x213   : > { %v5262_v44 = vpop.f32.mrb[24].mxu1  ;;  %4119 = vst [vmem:[%s7000_s29 + $0xa0] sm:$0xff] %v4083_v37  ;;  %v4049_v57 = vadd.f32 %v5625_v40, %v6994_v17  ;;  %v5510_v46 = vpop.f32.mrb[24].mxu0 }
 0x214   : > { %v2205_v48 = vpop.f32.mrb[25].mxu1  ;;  %v4086_v7 = vmul.f32 0.05, %v4050_v42  ;;  %v5626_v58 = vadd.f32 %v5510_v46, %v5262_v44  ;;  %v3925_v60 = vpop.f32.mrb[25].mxu0 }
 0x215   : > { %v4085_v52 = vmul.f32 0.05, %v4049_v57  ;;  %v5627_v12 = vadd.f32 %v3925_v60, %v2205_v48 }
 0x216   : > { %4122 = vst [vmem:[%s7000_s29 + $0xb8] sm:$0xff] %v4086_v7  ;;  %v4052_v54 = vadd.f32 %v5626_v58, %v6994_v17 }
 0x217   : > { %v5265_v59 = vpop.f32.mrb[26].mxu1  ;;  %4121 = vst [vmem:[%s7000_s29 + $0xb0] sm:$0xff] %v4085_v52  ;;  %v4051_v61 = vadd.f32 %v5627_v12, %v6994_v17  ;;  %v5513_v62 = vpop.f32.mrb[26].mxu0 }
 0x218   : > { %v2215_v39 = vpop.f32.mrb[27].mxu1  ;;  %v4088_v63 = vmul.f32 0.05, %v4052_v54  ;;  %v5628_v0 = vadd.f32 %v5513_v62, %v5265_v59  ;;  %v3935_v1 = vpop.f32.mrb[27].mxu0 }
 0x219   : > { %v4087_v2 = vmul.f32 0.05, %v4051_v61  ;;  %v5629_v3 = vadd.f32 %v3935_v1, %v2215_v39 }
 0x21a   : > { %4124 = vst [vmem:[%s7000_s29 + $0xc8] sm:$0xff] %v4088_v63  ;;  %v4054_v4 = vadd.f32 %v5628_v0, %v6994_v17 }
 0x21b   : > { %v5268_v5 = vpop.f32.mrb[28].mxu1  ;;  %4123 = vst [vmem:[%s7000_s29 + $0xc0] sm:$0xff] %v4087_v2  ;;  %v4053_v15 = vadd.f32 %v5629_v3, %v6994_v17  ;;  %v5516_v20 = vpop.f32.mrb[28].mxu0 }
 0x21c   : > { %v2225_v6 = vpop.f32.mrb[29].mxu1  ;;  %v4090_v22 = vmul.f32 0.05, %v4054_v4  ;;  %v5630_v8 = vadd.f32 %v5516_v20, %v5268_v5  ;;  %v3945_v24 = vpop.f32.mrb[29].mxu0 }
 0x21d   : > { %v4089_v26 = vmul.f32 0.05, %v4053_v15  ;;  %v5631_v28 = vadd.f32 %v3945_v24, %v2225_v6 }
 0x21e   : > { %4126 = vst [vmem:[%s7000_s29 + $0xd8] sm:$0xff] %v4090_v22  ;;  %v4056_v30 = vadd.f32 %v5630_v8, %v6994_v17 }
 0x21f   : > { %v5271_v32 = vpop.f32.mrb[30].mxu1  ;;  %4125 = vst [vmem:[%s7000_s29 + $0xd0] sm:$0xff] %v4089_v26  ;;  %v4055_v9 = vadd.f32 %v5631_v28, %v6994_v17  ;;  %v5519_v34 = vpop.f32.mrb[30].mxu0 }
 0x220   : > { %v2235_v11 = vpop.f32.mrb[31].mxu1  ;;  %v4092_v36 = vmul.f32 0.05, %v4056_v30  ;;  %v5632_v38 = vadd.f32 %v5519_v34, %v5271_v32  ;;  %v3955_v41 = vpop.f32.mrb[31].mxu0 }
 0x221   : > { %v4091_v43 = vmul.f32 0.05, %v4055_v9  ;;  %v5633_v45 = vadd.f32 %v3955_v41, %v2235_v11 }
 0x222   : > { %4128 = vst [vmem:[%s7000_s29 + $0xe8] sm:$0xff] %v4092_v36  ;;  %v4058_v47 = vadd.f32 %v5632_v38, %v6994_v17 }
 0x223   : > { %v5274_v13 = vpop.f32.mrb[32].mxu1  ;;  %4127 = vst [vmem:[%s7000_s29 + $0xe0] sm:$0xff] %v4091_v43  ;;  %v4057_v49 = vadd.f32 %v5633_v45, %v6994_v17  ;;  %v5522_v14 = vpop.f32.mrb[32].mxu0 }
 0x224   : > { %v2245_v50 = vpop.f32.mrb[33].mxu1  ;;  %v4094_v51 = vmul.f32 0.05, %v4058_v47  ;;  %v5634_v53 = vadd.f32 %v5522_v14, %v5274_v13  ;;  %v3965_v10 = vpop.f32.mrb[33].mxu0 }
 0x225   : > { %v4093_v55 = vmul.f32 0.05, %v4057_v49  ;;  %v5635_v56 = vadd.f32 %v3965_v10, %v2245_v50 }
 0x226   : > { %4130 = vst [vmem:[%s7000_s29 + $0xf8] sm:$0xff] %v4094_v51  ;;  %v4060_v16 = vadd.f32 %v5634_v53, %v6994_v17 }
 0x227   : > { %v5277_v19 = vpop.f32.mrb[34].mxu1  ;;  %4129 = vst [vmem:[%s7000_s29 + $0xf0] sm:$0xff] %v4093_v55  ;;  %v4059_v18 = vadd.f32 %v5635_v56, %v6994_v17  ;;  %v5525_v21 = vpop.f32.mrb[34].mxu0 }
 0x228   : > { %v2255_v23 = vpop.f32.mrb[35].mxu1  ;;  %v4096_v25 = vmul.f32 0.05, %v4060_v16  ;;  %v5636_v27 = vadd.f32 %v5525_v21, %v5277_v19  ;;  %v3975_v29 = vpop.f32.mrb[35].mxu0 }
 0x229   : > { %v4095_v31 = vmul.f32 0.05, %v4059_v18  ;;  %v5637_v33 = vadd.f32 %v3975_v29, %v2255_v23 }
 0x22a   : > { %4132 = vst [vmem:[%s7000_s29 + $0x108] sm:$0xff] %v4096_v25  ;;  %v4062_v35 = vadd.f32 %v5636_v27, %v6994_v17 }
 0x22b   : > { %4131 = vst [vmem:[%s7000_s29 + $0x100] sm:$0xff] %v4095_v31  ;;  %v4061_v37 = vadd.f32 %v5637_v33, %v6994_v17 }
 0x22c   : > { %v4098_v40 = vmul.f32 0.05, %v4062_v35 }
 0x22d   : > { %v4097_v42 = vmul.f32 0.05, %v4061_v37 }
 0x22e   : > { %4134 = vst [vmem:[%s7000_s29 + $0x118] sm:$0xff] %v4098_v40 }
 0x22f   : > { %4133 = vst [vmem:[%s7000_s29 + $0x110] sm:$0xff] %v4097_v42 }
 0x230 PF: > { %s13_s14 = sadd.s32 1, %s5938_s14   ;;  %s7092_s12 = smov %s5934_s13 }
 0x231   : > { %p10_p5 = scmp.ge.s32.totalorder %s13_s14, 4   ;;  %s7093_s13 = smov %s7095_s15 }
 0x233   :  { %12 = sbr.rel (!%p10_p5) target bundleno = 2 (0x2), region = 76 }

</bundles_post_ra>
